<compile_context>
chip_gen: v7x
topology: tpu7x:2x2x1
jax: 0.10.0
libtpu: 0.0.40
codegen_flags: <defaults>
</compile_context>

<pallas_src>
import math
from functools import partial

import jax
import jax.numpy as jnp
from jax.experimental import pallas as pl
from jax.experimental.pallas import tpu as pltpu


# ---------------------------------------------------------------------------
# Kernel
# ---------------------------------------------------------------------------

def _layernorm(x, gamma, beta, eps=1e-5):
    mu = jnp.mean(x, axis=-1, keepdims=True)
    xc = x - mu
    var = jnp.mean(xc * xc, axis=-1, keepdims=True)
    return xc * jax.lax.rsqrt(var + eps) * gamma + beta


def _fused_transformer_kernel(x_ref, wp_ref, bp_ref, pe_ref,
                              wqkv_ref, bqkv_ref, wo_ref,
                              w1_ref, b1_ref, w2_ref, vd_ref,
                              wc_ref, bc_ref,
                              o_ref, *, nhead, num_layers):
    """Fused: input proj + PE + num_layers post-norm encoder layers + head.

    Processes one batch tile (TB sequences) per grid step; all weights are
    VMEM-resident via constant-index BlockSpecs.
    """
    TB, S, IN = x_ref.shape
    D = wp_ref.shape[1]
    dh = D // nhead
    R = TB * S  # rows in this tile

    # --- input projection + positional encoding ---------------------------
    x2 = x_ref[...].reshape(R, IN)
    h2 = jnp.dot(x2, wp_ref[...],
                 preferred_element_type=jnp.float32) + bp_ref[...]   # (R, D)
    h2 = (h2.reshape(TB, S, D) + pe_ref[...]).reshape(R, D)

    # --- encoder layers (post-norm, ReLU FFN) ------------------------------
    # num_layers is small (2) -> keep the static unroll; switch to
    # lax.fori_loop over l once num_layers exceeds ~4 (vreg live ranges).
    for l in range(num_layers):
        vd = vd_ref[l]                      # (6, D): bo, g1, be1, b2, g2, be2
        bo, g1, be1 = vd[0:1], vd[1:2], vd[2:3]
        b2, g2, be2 = vd[3:4], vd[4:5], vd[5:6]

        # Multi-head self-attention, head-major packed weights:
        #   - per head, q/k/v are separate (D, dh) matmuls (no lane slicing
        #     of activations)
        #   - per-head context is folded through the matching W_o row-block,
        #     so there is no head concatenate and no extra (D, D) matmul.
        attn = jnp.zeros((R, D), jnp.float32)
        for hh in range(nhead):             # nhead static -> unrolled
            wi = (l * nhead + hh) * 3
            q = jnp.dot(h2, wqkv_ref[wi + 0],
                        preferred_element_type=jnp.float32) + bqkv_ref[wi + 0]
            k = jnp.dot(h2, wqkv_ref[wi + 1],
                        preferred_element_type=jnp.float32) + bqkv_ref[wi + 1]
            v = jnp.dot(h2, wqkv_ref[wi + 2],
                        preferred_element_type=jnp.float32) + bqkv_ref[wi + 2]
            q3 = q.reshape(TB, S, dh)
            k3 = k.reshape(TB, S, dh)
            v3 = v.reshape(TB, S, dh)
            # 1/sqrt(dh) is pre-folded into wq/bq at pack time.
            s = jnp.einsum('bqd,bkd->bqk', q3, k3,
                           preferred_element_type=jnp.float32)
            s = s - jnp.max(s, axis=-1, keepdims=True)
            p = jnp.exp(s)
            p = p / jnp.sum(p, axis=-1, keepdims=True)        # exact softmax
            ctx = jnp.einsum('bqk,bkd->bqd', p, v3,
                             preferred_element_type=jnp.float32)
            attn = attn + jnp.dot(ctx.reshape(R, dh), wo_ref[l * nhead + hh],
                                  preferred_element_type=jnp.float32)
        attn = attn + bo

        # residual + LayerNorm 1 (post-norm)
        h1 = _layernorm(h2 + attn, g1, be1)                          # (R, D)

        # feed-forward (Linear -> ReLU -> Linear)
        f = jnp.dot(h1, w1_ref[l],
                    preferred_element_type=jnp.float32) + b1_ref[l]
        f = jnp.maximum(f, 0.0)
        f = jnp.dot(f, w2_ref[l],
                    preferred_element_type=jnp.float32) + b2

        # residual + LayerNorm 2
        h2 = _layernorm(h1 + f, g2, be2)

    # --- classifier Linear(D,1) + sigmoid ----------------------------------
    h3 = h2.reshape(TB, S, D)
    logits = jnp.sum(h3 * wc_ref[...], axis=-1) + bc_ref[...]        # (TB, S)
    o_ref[...] = jax.nn.sigmoid(logits).reshape(TB, 1, S)


# ---------------------------------------------------------------------------
# Parameter construction (deterministic, synthetic)
# ---------------------------------------------------------------------------

def make_positional_encoding(max_len, d_model):
    position = jnp.arange(max_len, dtype=jnp.float32)[:, None]
    div_term = jnp.exp(jnp.arange(0, d_model, 2, dtype=jnp.float32)
                       * (-math.log(10000.0) / d_model))
    pe = jnp.zeros((max_len, d_model), dtype=jnp.float32)
    pe = pe.at[:, 0::2].set(jnp.sin(position * div_term))
    pe = pe.at[:, 1::2].set(jnp.cos(position * div_term))
    return pe


def init_params(key, input_dim, d_model, nhead, num_layers, dim_feedforward):
    def dense(key, fan_in, fan_out):
        kw, kb = jax.random.split(key)
        w = jax.random.normal(kw, (fan_in, fan_out), jnp.float32) * 0.02
        b = jax.random.normal(kb, (1, fan_out), jnp.float32) * 0.02
        return w, b

    keys = jax.random.split(key, 2 + num_layers)
    wp, bp = dense(keys[0], input_dim, d_model)
    wc, bc = dense(keys[1], d_model, 1)

    layers = []
    for i in range(num_layers):
        ks = jax.random.split(keys[2 + i], 6)
        wq, bq = dense(ks[0], d_model, d_model)
        wk, bk = dense(ks[1], d_model, d_model)
        wv, bv = dense(ks[2], d_model, d_model)
        wo, bo = dense(ks[3], d_model, d_model)
        w1, b1 = dense(ks[4], d_model, dim_feedforward)
        w2, b2 = dense(ks[5], dim_feedforward, d_model)
        layers.append(dict(
            wq=wq, wk=wk, wv=wv, bq=bq, bk=bk, bv=bv, wo=wo, bo=bo,
            g1=jnp.ones((1, d_model), jnp.float32),
            be1=jnp.zeros((1, d_model), jnp.float32),
            w1=w1, b1=b1, w2=w2, b2=b2,
            g2=jnp.ones((1, d_model), jnp.float32),
            be2=jnp.zeros((1, d_model), jnp.float32),
        ))
    return dict(wp=wp, bp=bp, wc=wc, bc=bc, layers=layers)


# ---------------------------------------------------------------------------
# Forward pass wrapper
# ---------------------------------------------------------------------------

def _pick_batch_tile(B, S):
    """Rows per grid step: target ~512 rows (amortizes per-step overhead,
    stays well under v7x's 64 MiB VMEM), but expose >=2 tiles when possible
    so v7x's two TensorCores both get work."""
    rows_target = 512
    tb = max(1, min(B, rows_target // max(S, 1)))
    while B % tb:            # keep the grid exact (no padded batch tiles)
        tb -= 1
    if tb == B and B % 2 == 0 and B >= 2:
        tb = B // 2
    return tb


def time_series_transformer_forward(params, x, pe, *, nhead):
    B, S, IN = x.shape
    D = params["wp"].shape[1]
    layers = params["layers"]
    L = len(layers)
    dh = D // nhead
    scale = 1.0 / math.sqrt(dh)

    # ---- head-major weight packing (free under jit; tiny arrays) ----------
    def cols_to_heads(w, mult=1.0):        # (D, D) -> (nhead, D, dh)
        return (w * mult).reshape(D, nhead, dh).transpose(1, 0, 2)

    def bias_to_heads(b, mult=1.0):        # (1, D) -> (nhead, 1, dh)
        return (b * mult).reshape(1, nhead, dh).transpose(1, 0, 2)

    wqkv_l, bqkv_l, wo_l = [], [], []
    for lp in layers:
        wq = cols_to_heads(lp["wq"], scale)      # attention scale folded in
        wk = cols_to_heads(lp["wk"])
        wv = cols_to_heads(lp["wv"])
        wqkv_l.append(jnp.stack([wq, wk, wv], axis=1).reshape(nhead * 3, D, dh))
        bq = bias_to_heads(lp["bq"], scale)
        bk = bias_to_heads(lp["bk"])
        bv = bias_to_heads(lp["bv"])
        bqkv_l.append(jnp.stack([bq, bk, bv], axis=1).reshape(nhead * 3, 1, dh))
        wo_l.append(lp["wo"].reshape(nhead, dh, D))   # W_o row-blocks per head

    w_qkv = jnp.concatenate(wqkv_l, axis=0)          # (L*H*3, D, dh)
    b_qkv = jnp.concatenate(bqkv_l, axis=0)          # (L*H*3, 1, dh)
    w_o = jnp.concatenate(wo_l, axis=0)              # (L*H,   dh, D)
    w_1 = jnp.stack([lp["w1"] for lp in layers])     # (L, D, F)
    b_1 = jnp.stack([lp["b1"] for lp in layers])     # (L, 1, F)
    w_2 = jnp.stack([lp["w2"] for lp in layers])     # (L, F, D)
    vd = jnp.stack([jnp.concatenate([lp["bo"], lp["g1"], lp["be1"],
                                     lp["b2"], lp["g2"], lp["be2"]], axis=0)
                    for lp in layers])               # (L, 6, D)

    wc_row = params["wc"].reshape(1, D)              # (D,1) -> (1,D)
    pe_s = pe[:S]                                    # (S, D)

    # ---- grid over batch tiles --------------------------------------------
    TB = _pick_batch_tile(B, S)
    grid = (B // TB,)

    def const_spec(a):
        return pl.BlockSpec(a.shape, lambda b, n=a.ndim: (0,) * n)

    out = pl.pallas_call(
        partial(_fused_transformer_kernel, nhead=nhead, num_layers=L),
        out_shape=jax.ShapeDtypeStruct((B, 1, S), jnp.float32),
        grid=grid,
        in_specs=[
            pl.BlockSpec((TB, S, IN), lambda b: (b, 0, 0)),   # x batch tile
            const_spec(params["wp"]), const_spec(params["bp"]),
            const_spec(pe_s),
            const_spec(w_qkv), const_spec(b_qkv), const_spec(w_o),
            const_spec(w_1), const_spec(b_1), const_spec(w_2), const_spec(vd),
            const_spec(wc_row), const_spec(params["bc"]),
        ],
        out_specs=pl.BlockSpec((TB, 1, S), lambda b: (b, 0, 0)),
        compiler_params=pltpu.CompilerParams(
            dimension_semantics=("parallel",),   # independent batch tiles
            vmem_limit_bytes=32 * 1024 * 1024),  # safe on v5e/v6e/v7x (64 MiB)
    )(x, params["wp"], params["bp"], pe_s,
      w_qkv, b_qkv, w_o, w_1, b_1, w_2, vd,
      wc_row, params["bc"])

    return out.reshape(B, S)


# ---------------------------------------------------------------------------
# Pure-JAX reference (same math, standard layout) for correctness check
# ---------------------------------------------------------------------------

def reference_forward(params, x, pe, *, nhead):
    B, S, IN = x.shape
    D = params["wp"].shape[1]
    dh = D // nhead
    h = x @ params["wp"] + params["bp"]
    h = h + pe[:S]
    for lp in params["layers"]:
        q = h @ lp["wq"] + lp["bq"]
        k = h @ lp["wk"] + lp["bk"]
        v = h @ lp["wv"] + lp["bv"]

        def split(t):  # (B,S,D) -> (B,H,S,dh)
            return t.reshape(B, S, nhead, dh).transpose(0, 2, 1, 3)

        qh, kh, vh = split(q), split(k), split(v)
        s = jnp.einsum('bhqd,bhkd->bhqk', qh, kh) / math.sqrt(dh)
        p = jax.nn.softmax(s, axis=-1)
        ctx = jnp.einsum('bhqk,bhkd->bhqd', p, vh)
        ctx = ctx.transpose(0, 2, 1, 3).reshape(B, S, D)
        attn = ctx @ lp["wo"] + lp["bo"]
        h = _layernorm(h + attn, lp["g1"], lp["be1"])
        f = jnp.maximum(h @ lp["w1"] + lp["b1"], 0.0)
        f = f @ lp["w2"] + lp["b2"]
        h = _layernorm(h + f, lp["g2"], lp["be2"])
    logits = (h @ params["wc"])[..., 0] + params["bc"][0, 0]
    return jax.nn.sigmoid(logits)


# ---------------------------------------------------------------------------
# Main
# ---------------------------------------------------------------------------

if __name__ == "__main__":
    # Small, module-consistent shapes
    BATCH = 2
    SEQ = 8            # number of "fields" / timesteps
    INPUT_DIM = 16
    D_MODEL = 32
    NHEAD = 4
    NUM_LAYERS = 2
    DIM_FF = 64
    NUM_FIELDS = 64    # PositionalEncoding max_len

    key = jax.random.PRNGKey(0)
    k_param, k_x = jax.random.split(key)

    params = init_params(k_param, INPUT_DIM, D_MODEL, NHEAD, NUM_LAYERS, DIM_FF)
    pe = make_positional_encoding(NUM_FIELDS, D_MODEL)
    x = jax.random.normal(k_x, (BATCH, SEQ, INPUT_DIM), jnp.float32)

    fwd = jax.jit(partial(time_series_transformer_forward, nhead=NHEAD))
    out = jax.block_until_ready(fwd(params, x, pe))

    assert out.shape == (BATCH, SEQ)
    assert bool(jnp.all((out >= 0.0) & (out <= 1.0)))

    with jax.default_matmul_precision("highest"):
        ref = reference_forward(params, x, pe, nhead=NHEAD)
    assert bool(jnp.allclose(out, ref, atol=1e-4, rtol=1e-4)), (
        float(jnp.max(jnp.abs(out - ref))))

    print("KERNEL_OK")
</pallas_src>

<mosaic_0001>
module attributes {stable_mosaic.version = 11 : i64} {
  func.func @_fused_transformer_kernel(%arg0: i32, %arg1: memref<1x8x16xf32, #tpu.memory_space<vmem>>, %arg2: memref<16x32xf32, #tpu.memory_space<vmem>>, %arg3: memref<1x32xf32, #tpu.memory_space<vmem>>, %arg4: memref<8x32xf32, #tpu.memory_space<vmem>>, %arg5: memref<24x32x8xf32, #tpu.memory_space<vmem>>, %arg6: memref<24x1x8xf32, #tpu.memory_space<vmem>>, %arg7: memref<8x8x32xf32, #tpu.memory_space<vmem>>, %arg8: memref<2x32x64xf32, #tpu.memory_space<vmem>>, %arg9: memref<2x1x64xf32, #tpu.memory_space<vmem>>, %arg10: memref<2x64x32xf32, #tpu.memory_space<vmem>>, %arg11: memref<2x6x32xf32, #tpu.memory_space<vmem>>, %arg12: memref<1x32xf32, #tpu.memory_space<vmem>>, %arg13: memref<1x1xf32, #tpu.memory_space<vmem>>, %arg14: memref<1x1x8xf32, #tpu.memory_space<vmem>>) attributes {dimension_semantics = [#tpu.dimension_semantics<parallel>], iteration_bounds = array<i64: 2>, scalar_prefetch = 0 : i64, scratch_operands = 0 : i64, tpu.core_type = #tpu.core_type<tc>, window_params = [{transform_indices = @transform_0, window_bounds = array<i64: 1, 8, 16>}, {pipeline_mode = #tpu.pipeline_mode<synchronous>, transform_indices = @transform_1, window_bounds = array<i64: 16, 32>}, {pipeline_mode = #tpu.pipeline_mode<synchronous>, transform_indices = @transform_2, window_bounds = array<i64: 1, 32>}, {pipeline_mode = #tpu.pipeline_mode<synchronous>, transform_indices = @transform_3, window_bounds = array<i64: 8, 32>}, {pipeline_mode = #tpu.pipeline_mode<synchronous>, transform_indices = @transform_4, window_bounds = array<i64: 24, 32, 8>}, {pipeline_mode = #tpu.pipeline_mode<synchronous>, transform_indices = @transform_5, window_bounds = array<i64: 24, 1, 8>}, {pipeline_mode = #tpu.pipeline_mode<synchronous>, transform_indices = @transform_6, window_bounds = array<i64: 8, 8, 32>}, {pipeline_mode = #tpu.pipeline_mode<synchronous>, transform_indices = @transform_7, window_bounds = array<i64: 2, 32, 64>}, {pipeline_mode = #tpu.pipeline_mode<synchronous>, transform_indices = @transform_8, window_bounds = array<i64: 2, 1, 64>}, {pipeline_mode = #tpu.pipeline_mode<synchronous>, transform_indices = @transform_9, window_bounds = array<i64: 2, 64, 32>}, {pipeline_mode = #tpu.pipeline_mode<synchronous>, transform_indices = @transform_10, window_bounds = array<i64: 2, 6, 32>}, {pipeline_mode = #tpu.pipeline_mode<synchronous>, transform_indices = @transform_11, window_bounds = array<i64: 1, 32>}, {pipeline_mode = #tpu.pipeline_mode<synchronous>, transform_indices = @transform_12, window_bounds = array<i64: 1, 1>}, {transform_indices = @transform_13, window_bounds = array<i64: 1, 1, 8>}]} {
    %c0 = arith.constant 0 : index
    %c0_0 = arith.constant 0 : index
    %c0_1 = arith.constant 0 : index
    %0 = vector.load %arg1[%c0, %c0_0, %c0_1] : memref<1x8x16xf32, #tpu.memory_space<vmem>>, vector<1x8x16xf32>
    %1 = vector.shape_cast %0 : vector<1x8x16xf32> to vector<8x16xf32>
    %c0_2 = arith.constant 0 : index
    %c0_3 = arith.constant 0 : index
    %2 = vector.load %arg2[%c0_2, %c0_3] : memref<16x32xf32, #tpu.memory_space<vmem>>, vector<16x32xf32>
    %cst = arith.constant dense<0.000000e+00> : vector<8x32xf32>
    %3 = tpu.matmul %1, %2, %cst {dimension_numbers = #tpu.dot_dimension_numbers<[1], [0], [0], [1], [0, 0, 1, 1], [], []>} : vector<8x16xf32>, vector<16x32xf32>, vector<8x32xf32> -> vector<8x32xf32>
    %c0_4 = arith.constant 0 : index
    %c0_5 = arith.constant 0 : index
    %4 = vector.load %arg3[%c0_4, %c0_5] : memref<1x32xf32, #tpu.memory_space<vmem>>, vector<1x32xf32>
    %5 = vector.broadcast %4 : vector<1x32xf32> to vector<8x32xf32>
    %6 = arith.addf %3, %5 : vector<8x32xf32>
    %7 = vector.shape_cast %6 : vector<8x32xf32> to vector<1x8x32xf32>
    %c0_6 = arith.constant 0 : index
    %c0_7 = arith.constant 0 : index
    %8 = vector.load %arg4[%c0_6, %c0_7] : memref<8x32xf32, #tpu.memory_space<vmem>>, vector<8x32xf32>
    %9 = vector.shape_cast %8 : vector<8x32xf32> to vector<1x8x32xf32>
    %10 = arith.addf %7, %9 : vector<1x8x32xf32>
    %11 = vector.shape_cast %10 : vector<1x8x32xf32> to vector<8x32xf32>
    %c0_8 = arith.constant 0 : index
    %c0_9 = arith.constant 0 : index
    %c0_10 = arith.constant 0 : index
    %12 = vector.load %arg11[%c0_8, %c0_9, %c0_10] : memref<2x6x32xf32, #tpu.memory_space<vmem>>, vector<1x6x32xf32>
    %13 = vector.shape_cast %12 : vector<1x6x32xf32> to vector<6x32xf32>
    %14 = vector.extract_strided_slice %13 {offsets = [0, 0], sizes = [1, 32], strides = [1, 1]} : vector<6x32xf32> to vector<1x32xf32>
    %15 = vector.extract_strided_slice %13 {offsets = [1, 0], sizes = [1, 32], strides = [1, 1]} : vector<6x32xf32> to vector<1x32xf32>
    %16 = vector.extract_strided_slice %13 {offsets = [2, 0], sizes = [1, 32], strides = [1, 1]} : vector<6x32xf32> to vector<1x32xf32>
    %17 = vector.extract_strided_slice %13 {offsets = [3, 0], sizes = [1, 32], strides = [1, 1]} : vector<6x32xf32> to vector<1x32xf32>
    %18 = vector.extract_strided_slice %13 {offsets = [4, 0], sizes = [1, 32], strides = [1, 1]} : vector<6x32xf32> to vector<1x32xf32>
    %19 = vector.extract_strided_slice %13 {offsets = [5, 0], sizes = [1, 32], strides = [1, 1]} : vector<6x32xf32> to vector<1x32xf32>
    %cst_11 = arith.constant 0.000000e+00 : f32
    %20 = vector.broadcast %cst_11 : f32 to vector<8x32xf32>
    %c0_12 = arith.constant 0 : index
    %c0_13 = arith.constant 0 : index
    %c0_14 = arith.constant 0 : index
    %21 = vector.load %arg5[%c0_12, %c0_13, %c0_14] : memref<24x32x8xf32, #tpu.memory_space<vmem>>, vector<1x32x8xf32>
    %22 = vector.shape_cast %21 : vector<1x32x8xf32> to vector<32x8xf32>
    %cst_15 = arith.constant dense<0.000000e+00> : vector<8x8xf32>
    %23 = tpu.matmul %11, %22, %cst_15 {dimension_numbers = #tpu.dot_dimension_numbers<[1], [0], [0], [1], [0, 0, 1, 1], [], []>} : vector<8x32xf32>, vector<32x8xf32>, vector<8x8xf32> -> vector<8x8xf32>
    %c0_16 = arith.constant 0 : index
    %c0_17 = arith.constant 0 : index
    %c0_18 = arith.constant 0 : index
    %24 = vector.load %arg6[%c0_16, %c0_17, %c0_18] : memref<24x1x8xf32, #tpu.memory_space<vmem>>, vector<1x1x8xf32>
    %25 = vector.shape_cast %24 : vector<1x1x8xf32> to vector<1x8xf32>
    %26 = vector.broadcast %25 : vector<1x8xf32> to vector<8x8xf32>
    %27 = arith.addf %23, %26 : vector<8x8xf32>
    %c1 = arith.constant 1 : index
    %c0_19 = arith.constant 0 : index
    %c0_20 = arith.constant 0 : index
    %28 = vector.load %arg5[%c1, %c0_19, %c0_20] : memref<24x32x8xf32, #tpu.memory_space<vmem>>, vector<1x32x8xf32>
    %29 = vector.shape_cast %28 : vector<1x32x8xf32> to vector<32x8xf32>
    %cst_21 = arith.constant dense<0.000000e+00> : vector<8x8xf32>
    %30 = tpu.matmul %11, %29, %cst_21 {dimension_numbers = #tpu.dot_dimension_numbers<[1], [0], [0], [1], [0, 0, 1, 1], [], []>} : vector<8x32xf32>, vector<32x8xf32>, vector<8x8xf32> -> vector<8x8xf32>
    %c1_22 = arith.constant 1 : index
    %c0_23 = arith.constant 0 : index
    %c0_24 = arith.constant 0 : index
    %31 = vector.load %arg6[%c1_22, %c0_23, %c0_24] : memref<24x1x8xf32, #tpu.memory_space<vmem>>, vector<1x1x8xf32>
    %32 = vector.shape_cast %31 : vector<1x1x8xf32> to vector<1x8xf32>
    %33 = vector.broadcast %32 : vector<1x8xf32> to vector<8x8xf32>
    %34 = arith.addf %30, %33 : vector<8x8xf32>
    %c2 = arith.constant 2 : index
    %c0_25 = arith.constant 0 : index
    %c0_26 = arith.constant 0 : index
    %35 = vector.load %arg5[%c2, %c0_25, %c0_26] : memref<24x32x8xf32, #tpu.memory_space<vmem>>, vector<1x32x8xf32>
    %36 = vector.shape_cast %35 : vector<1x32x8xf32> to vector<32x8xf32>
    %cst_27 = arith.constant dense<0.000000e+00> : vector<8x8xf32>
    %37 = tpu.matmul %11, %36, %cst_27 {dimension_numbers = #tpu.dot_dimension_numbers<[1], [0], [0], [1], [0, 0, 1, 1], [], []>} : vector<8x32xf32>, vector<32x8xf32>, vector<8x8xf32> -> vector<8x8xf32>
    %c2_28 = arith.constant 2 : index
    %c0_29 = arith.constant 0 : index
    %c0_30 = arith.constant 0 : index
    %38 = vector.load %arg6[%c2_28, %c0_29, %c0_30] : memref<24x1x8xf32, #tpu.memory_space<vmem>>, vector<1x1x8xf32>
    %39 = vector.shape_cast %38 : vector<1x1x8xf32> to vector<1x8xf32>
    %40 = vector.broadcast %39 : vector<1x8xf32> to vector<8x8xf32>
    %41 = arith.addf %37, %40 : vector<8x8xf32>
    %42 = vector.shape_cast %27 : vector<8x8xf32> to vector<1x8x8xf32>
    %43 = vector.shape_cast %34 : vector<8x8xf32> to vector<1x8x8xf32>
    %44 = vector.shape_cast %41 : vector<8x8xf32> to vector<1x8x8xf32>
    "tpu.trace_start"() <{level = 10 : i32, message = "bqd,bkd->bqk"}> : () -> ()
    %cst_31 = arith.constant dense<0.000000e+00> : vector<1x8x8xf32>
    %45 = tpu.matmul %42, %43, %cst_31 {dimension_numbers = #tpu.dot_dimension_numbers<[2], [2], [1], [1], [0, 0, 0, 1, 1, 1], [0], [0]>} : vector<1x8x8xf32>, vector<1x8x8xf32>, vector<1x8x8xf32> -> vector<1x8x8xf32>
    "tpu.trace_stop"() : () -> ()
    %cst_32 = arith.constant dense<0xFF800000> : vector<1x8xf32>
    %46 = vector.multi_reduction <maximumf>, %45, %cst_32 [2] : vector<1x8x8xf32> to vector<1x8xf32>
    %47 = vector.shape_cast %46 : vector<1x8xf32> to vector<1x8x1xf32>
    %48 = vector.broadcast %47 : vector<1x8x1xf32> to vector<1x8x8xf32>
    %49 = arith.subf %45, %48 : vector<1x8x8xf32>
    %50 = math.exp %49 : vector<1x8x8xf32>
    %cst_33 = arith.constant dense<0.000000e+00> : vector<1x8xf32>
    %51 = vector.multi_reduction <add>, %50, %cst_33 [2] : vector<1x8x8xf32> to vector<1x8xf32>
    %52 = vector.shape_cast %51 : vector<1x8xf32> to vector<1x8x1xf32>
    %53 = vector.broadcast %52 : vector<1x8x1xf32> to vector<1x8x8xf32>
    %54 = arith.divf %50, %53 : vector<1x8x8xf32>
    "tpu.trace_start"() <{level = 10 : i32, message = "bqk,bkd->bqd"}> : () -> ()
    %cst_34 = arith.constant dense<0.000000e+00> : vector<1x8x8xf32>
    %55 = tpu.matmul %54, %44, %cst_34 {dimension_numbers = #tpu.dot_dimension_numbers<[2], [1], [1], [2], [0, 0, 0, 1, 1, 2], [0], [0]>} : vector<1x8x8xf32>, vector<1x8x8xf32>, vector<1x8x8xf32> -> vector<1x8x8xf32>
    "tpu.trace_stop"() : () -> ()
    %56 = vector.shape_cast %55 : vector<1x8x8xf32> to vector<8x8xf32>
    %c0_35 = arith.constant 0 : index
    %c0_36 = arith.constant 0 : index
    %c0_37 = arith.constant 0 : index
    %57 = vector.load %arg7[%c0_35, %c0_36, %c0_37] : memref<8x8x32xf32, #tpu.memory_space<vmem>>, vector<1x8x32xf32>
    %58 = vector.shape_cast %57 : vector<1x8x32xf32> to vector<8x32xf32>
    %cst_38 = arith.constant dense<0.000000e+00> : vector<8x32xf32>
    %59 = tpu.matmul %56, %58, %cst_38 {dimension_numbers = #tpu.dot_dimension_numbers<[1], [0], [0], [1], [0, 0, 1, 1], [], []>} : vector<8x8xf32>, vector<8x32xf32>, vector<8x32xf32> -> vector<8x32xf32>
    %60 = arith.addf %20, %59 : vector<8x32xf32>
    %c3 = arith.constant 3 : index
    %c0_39 = arith.constant 0 : index
    %c0_40 = arith.constant 0 : index
    %61 = vector.load %arg5[%c3, %c0_39, %c0_40] : memref<24x32x8xf32, #tpu.memory_space<vmem>>, vector<1x32x8xf32>
    %62 = vector.shape_cast %61 : vector<1x32x8xf32> to vector<32x8xf32>
    %cst_41 = arith.constant dense<0.000000e+00> : vector<8x8xf32>
    %63 = tpu.matmul %11, %62, %cst_41 {dimension_numbers = #tpu.dot_dimension_numbers<[1], [0], [0], [1], [0, 0, 1, 1], [], []>} : vector<8x32xf32>, vector<32x8xf32>, vector<8x8xf32> -> vector<8x8xf32>
    %c3_42 = arith.constant 3 : index
    %c0_43 = arith.constant 0 : index
    %c0_44 = arith.constant 0 : index
    %64 = vector.load %arg6[%c3_42, %c0_43, %c0_44] : memref<24x1x8xf32, #tpu.memory_space<vmem>>, vector<1x1x8xf32>
    %65 = vector.shape_cast %64 : vector<1x1x8xf32> to vector<1x8xf32>
    %66 = vector.broadcast %65 : vector<1x8xf32> to vector<8x8xf32>
    %67 = arith.addf %63, %66 : vector<8x8xf32>
    %c4 = arith.constant 4 : index
    %c0_45 = arith.constant 0 : index
    %c0_46 = arith.constant 0 : index
    %68 = vector.load %arg5[%c4, %c0_45, %c0_46] : memref<24x32x8xf32, #tpu.memory_space<vmem>>, vector<1x32x8xf32>
    %69 = vector.shape_cast %68 : vector<1x32x8xf32> to vector<32x8xf32>
    %cst_47 = arith.constant dense<0.000000e+00> : vector<8x8xf32>
    %70 = tpu.matmul %11, %69, %cst_47 {dimension_numbers = #tpu.dot_dimension_numbers<[1], [0], [0], [1], [0, 0, 1, 1], [], []>} : vector<8x32xf32>, vector<32x8xf32>, vector<8x8xf32> -> vector<8x8xf32>
    %c4_48 = arith.constant 4 : index
    %c0_49 = arith.constant 0 : index
    %c0_50 = arith.constant 0 : index
    %71 = vector.load %arg6[%c4_48, %c0_49, %c0_50] : memref<24x1x8xf32, #tpu.memory_space<vmem>>, vector<1x1x8xf32>
    %72 = vector.shape_cast %71 : vector<1x1x8xf32> to vector<1x8xf32>
    %73 = vector.broadcast %72 : vector<1x8xf32> to vector<8x8xf32>
    %74 = arith.addf %70, %73 : vector<8x8xf32>
    %c5 = arith.constant 5 : index
    %c0_51 = arith.constant 0 : index
    %c0_52 = arith.constant 0 : index
    %75 = vector.load %arg5[%c5, %c0_51, %c0_52] : memref<24x32x8xf32, #tpu.memory_space<vmem>>, vector<1x32x8xf32>
    %76 = vector.shape_cast %75 : vector<1x32x8xf32> to vector<32x8xf32>
    %cst_53 = arith.constant dense<0.000000e+00> : vector<8x8xf32>
    %77 = tpu.matmul %11, %76, %cst_53 {dimension_numbers = #tpu.dot_dimension_numbers<[1], [0], [0], [1], [0, 0, 1, 1], [], []>} : vector<8x32xf32>, vector<32x8xf32>, vector<8x8xf32> -> vector<8x8xf32>
    %c5_54 = arith.constant 5 : index
    %c0_55 = arith.constant 0 : index
    %c0_56 = arith.constant 0 : index
    %78 = vector.load %arg6[%c5_54, %c0_55, %c0_56] : memref<24x1x8xf32, #tpu.memory_space<vmem>>, vector<1x1x8xf32>
    %79 = vector.shape_cast %78 : vector<1x1x8xf32> to vector<1x8xf32>
    %80 = vector.broadcast %79 : vector<1x8xf32> to vector<8x8xf32>
    %81 = arith.addf %77, %80 : vector<8x8xf32>
    %82 = vector.shape_cast %67 : vector<8x8xf32> to vector<1x8x8xf32>
    %83 = vector.shape_cast %74 : vector<8x8xf32> to vector<1x8x8xf32>
    %84 = vector.shape_cast %81 : vector<8x8xf32> to vector<1x8x8xf32>
    "tpu.trace_start"() <{level = 10 : i32, message = "bqd,bkd->bqk"}> : () -> ()
    %cst_57 = arith.constant dense<0.000000e+00> : vector<1x8x8xf32>
    %85 = tpu.matmul %82, %83, %cst_57 {dimension_numbers = #tpu.dot_dimension_numbers<[2], [2], [1], [1], [0, 0, 0, 1, 1, 1], [0], [0]>} : vector<1x8x8xf32>, vector<1x8x8xf32>, vector<1x8x8xf32> -> vector<1x8x8xf32>
    "tpu.trace_stop"() : () -> ()
    %cst_58 = arith.constant dense<0xFF800000> : vector<1x8xf32>
    %86 = vector.multi_reduction <maximumf>, %85, %cst_58 [2] : vector<1x8x8xf32> to vector<1x8xf32>
    %87 = vector.shape_cast %86 : vector<1x8xf32> to vector<1x8x1xf32>
    %88 = vector.broadcast %87 : vector<1x8x1xf32> to vector<1x8x8xf32>
    %89 = arith.subf %85, %88 : vector<1x8x8xf32>
    %90 = math.exp %89 : vector<1x8x8xf32>
    %cst_59 = arith.constant dense<0.000000e+00> : vector<1x8xf32>
    %91 = vector.multi_reduction <add>, %90, %cst_59 [2] : vector<1x8x8xf32> to vector<1x8xf32>
    %92 = vector.shape_cast %91 : vector<1x8xf32> to vector<1x8x1xf32>
    %93 = vector.broadcast %92 : vector<1x8x1xf32> to vector<1x8x8xf32>
    %94 = arith.divf %90, %93 : vector<1x8x8xf32>
    "tpu.trace_start"() <{level = 10 : i32, message = "bqk,bkd->bqd"}> : () -> ()
    %cst_60 = arith.constant dense<0.000000e+00> : vector<1x8x8xf32>
    %95 = tpu.matmul %94, %84, %cst_60 {dimension_numbers = #tpu.dot_dimension_numbers<[2], [1], [1], [2], [0, 0, 0, 1, 1, 2], [0], [0]>} : vector<1x8x8xf32>, vector<1x8x8xf32>, vector<1x8x8xf32> -> vector<1x8x8xf32>
    "tpu.trace_stop"() : () -> ()
    %96 = vector.shape_cast %95 : vector<1x8x8xf32> to vector<8x8xf32>
    %c1_61 = arith.constant 1 : index
    %c0_62 = arith.constant 0 : index
    %c0_63 = arith.constant 0 : index
    %97 = vector.load %arg7[%c1_61, %c0_62, %c0_63] : memref<8x8x32xf32, #tpu.memory_space<vmem>>, vector<1x8x32xf32>
    %98 = vector.shape_cast %97 : vector<1x8x32xf32> to vector<8x32xf32>
    %cst_64 = arith.constant dense<0.000000e+00> : vector<8x32xf32>
    %99 = tpu.matmul %96, %98, %cst_64 {dimension_numbers = #tpu.dot_dimension_numbers<[1], [0], [0], [1], [0, 0, 1, 1], [], []>} : vector<8x8xf32>, vector<8x32xf32>, vector<8x32xf32> -> vector<8x32xf32>
    %100 = arith.addf %60, %99 : vector<8x32xf32>
    %c6 = arith.constant 6 : index
    %c0_65 = arith.constant 0 : index
    %c0_66 = arith.constant 0 : index
    %101 = vector.load %arg5[%c6, %c0_65, %c0_66] : memref<24x32x8xf32, #tpu.memory_space<vmem>>, vector<1x32x8xf32>
    %102 = vector.shape_cast %101 : vector<1x32x8xf32> to vector<32x8xf32>
    %cst_67 = arith.constant dense<0.000000e+00> : vector<8x8xf32>
    %103 = tpu.matmul %11, %102, %cst_67 {dimension_numbers = #tpu.dot_dimension_numbers<[1], [0], [0], [1], [0, 0, 1, 1], [], []>} : vector<8x32xf32>, vector<32x8xf32>, vector<8x8xf32> -> vector<8x8xf32>
    %c6_68 = arith.constant 6 : index
    %c0_69 = arith.constant 0 : index
    %c0_70 = arith.constant 0 : index
    %104 = vector.load %arg6[%c6_68, %c0_69, %c0_70] : memref<24x1x8xf32, #tpu.memory_space<vmem>>, vector<1x1x8xf32>
    %105 = vector.shape_cast %104 : vector<1x1x8xf32> to vector<1x8xf32>
    %106 = vector.broadcast %105 : vector<1x8xf32> to vector<8x8xf32>
    %107 = arith.addf %103, %106 : vector<8x8xf32>
    %c7 = arith.constant 7 : index
    %c0_71 = arith.constant 0 : index
    %c0_72 = arith.constant 0 : index
    %108 = vector.load %arg5[%c7, %c0_71, %c0_72] : memref<24x32x8xf32, #tpu.memory_space<vmem>>, vector<1x32x8xf32>
    %109 = vector.shape_cast %108 : vector<1x32x8xf32> to vector<32x8xf32>
    %cst_73 = arith.constant dense<0.000000e+00> : vector<8x8xf32>
    %110 = tpu.matmul %11, %109, %cst_73 {dimension_numbers = #tpu.dot_dimension_numbers<[1], [0], [0], [1], [0, 0, 1, 1], [], []>} : vector<8x32xf32>, vector<32x8xf32>, vector<8x8xf32> -> vector<8x8xf32>
    %c7_74 = arith.constant 7 : index
    %c0_75 = arith.constant 0 : index
    %c0_76 = arith.constant 0 : index
    %111 = vector.load %arg6[%c7_74, %c0_75, %c0_76] : memref<24x1x8xf32, #tpu.memory_space<vmem>>, vector<1x1x8xf32>
    %112 = vector.shape_cast %111 : vector<1x1x8xf32> to vector<1x8xf32>
    %113 = vector.broadcast %112 : vector<1x8xf32> to vector<8x8xf32>
    %114 = arith.addf %110, %113 : vector<8x8xf32>
    %c8 = arith.constant 8 : index
    %c0_77 = arith.constant 0 : index
    %c0_78 = arith.constant 0 : index
    %115 = vector.load %arg5[%c8, %c0_77, %c0_78] : memref<24x32x8xf32, #tpu.memory_space<vmem>>, vector<1x32x8xf32>
    %116 = vector.shape_cast %115 : vector<1x32x8xf32> to vector<32x8xf32>
    %cst_79 = arith.constant dense<0.000000e+00> : vector<8x8xf32>
    %117 = tpu.matmul %11, %116, %cst_79 {dimension_numbers = #tpu.dot_dimension_numbers<[1], [0], [0], [1], [0, 0, 1, 1], [], []>} : vector<8x32xf32>, vector<32x8xf32>, vector<8x8xf32> -> vector<8x8xf32>
    %c8_80 = arith.constant 8 : index
    %c0_81 = arith.constant 0 : index
    %c0_82 = arith.constant 0 : index
    %118 = vector.load %arg6[%c8_80, %c0_81, %c0_82] : memref<24x1x8xf32, #tpu.memory_space<vmem>>, vector<1x1x8xf32>
    %119 = vector.shape_cast %118 : vector<1x1x8xf32> to vector<1x8xf32>
    %120 = vector.broadcast %119 : vector<1x8xf32> to vector<8x8xf32>
    %121 = arith.addf %117, %120 : vector<8x8xf32>
    %122 = vector.shape_cast %107 : vector<8x8xf32> to vector<1x8x8xf32>
    %123 = vector.shape_cast %114 : vector<8x8xf32> to vector<1x8x8xf32>
    %124 = vector.shape_cast %121 : vector<8x8xf32> to vector<1x8x8xf32>
    "tpu.trace_start"() <{level = 10 : i32, message = "bqd,bkd->bqk"}> : () -> ()
    %cst_83 = arith.constant dense<0.000000e+00> : vector<1x8x8xf32>
    %125 = tpu.matmul %122, %123, %cst_83 {dimension_numbers = #tpu.dot_dimension_numbers<[2], [2], [1], [1], [0, 0, 0, 1, 1, 1], [0], [0]>} : vector<1x8x8xf32>, vector<1x8x8xf32>, vector<1x8x8xf32> -> vector<1x8x8xf32>
    "tpu.trace_stop"() : () -> ()
    %cst_84 = arith.constant dense<0xFF800000> : vector<1x8xf32>
    %126 = vector.multi_reduction <maximumf>, %125, %cst_84 [2] : vector<1x8x8xf32> to vector<1x8xf32>
    %127 = vector.shape_cast %126 : vector<1x8xf32> to vector<1x8x1xf32>
    %128 = vector.broadcast %127 : vector<1x8x1xf32> to vector<1x8x8xf32>
    %129 = arith.subf %125, %128 : vector<1x8x8xf32>
    %130 = math.exp %129 : vector<1x8x8xf32>
    %cst_85 = arith.constant dense<0.000000e+00> : vector<1x8xf32>
    %131 = vector.multi_reduction <add>, %130, %cst_85 [2] : vector<1x8x8xf32> to vector<1x8xf32>
    %132 = vector.shape_cast %131 : vector<1x8xf32> to vector<1x8x1xf32>
    %133 = vector.broadcast %132 : vector<1x8x1xf32> to vector<1x8x8xf32>
    %134 = arith.divf %130, %133 : vector<1x8x8xf32>
    "tpu.trace_start"() <{level = 10 : i32, message = "bqk,bkd->bqd"}> : () -> ()
    %cst_86 = arith.constant dense<0.000000e+00> : vector<1x8x8xf32>
    %135 = tpu.matmul %134, %124, %cst_86 {dimension_numbers = #tpu.dot_dimension_numbers<[2], [1], [1], [2], [0, 0, 0, 1, 1, 2], [0], [0]>} : vector<1x8x8xf32>, vector<1x8x8xf32>, vector<1x8x8xf32> -> vector<1x8x8xf32>
    "tpu.trace_stop"() : () -> ()
    %136 = vector.shape_cast %135 : vector<1x8x8xf32> to vector<8x8xf32>
    %c2_87 = arith.constant 2 : index
    %c0_88 = arith.constant 0 : index
    %c0_89 = arith.constant 0 : index
    %137 = vector.load %arg7[%c2_87, %c0_88, %c0_89] : memref<8x8x32xf32, #tpu.memory_space<vmem>>, vector<1x8x32xf32>
    %138 = vector.shape_cast %137 : vector<1x8x32xf32> to vector<8x32xf32>
    %cst_90 = arith.constant dense<0.000000e+00> : vector<8x32xf32>
    %139 = tpu.matmul %136, %138, %cst_90 {dimension_numbers = #tpu.dot_dimension_numbers<[1], [0], [0], [1], [0, 0, 1, 1], [], []>} : vector<8x8xf32>, vector<8x32xf32>, vector<8x32xf32> -> vector<8x32xf32>
    %140 = arith.addf %100, %139 : vector<8x32xf32>
    %c9 = arith.constant 9 : index
    %c0_91 = arith.constant 0 : index
    %c0_92 = arith.constant 0 : index
    %141 = vector.load %arg5[%c9, %c0_91, %c0_92] : memref<24x32x8xf32, #tpu.memory_space<vmem>>, vector<1x32x8xf32>
    %142 = vector.shape_cast %141 : vector<1x32x8xf32> to vector<32x8xf32>
    %cst_93 = arith.constant dense<0.000000e+00> : vector<8x8xf32>
    %143 = tpu.matmul %11, %142, %cst_93 {dimension_numbers = #tpu.dot_dimension_numbers<[1], [0], [0], [1], [0, 0, 1, 1], [], []>} : vector<8x32xf32>, vector<32x8xf32>, vector<8x8xf32> -> vector<8x8xf32>
    %c9_94 = arith.constant 9 : index
    %c0_95 = arith.constant 0 : index
    %c0_96 = arith.constant 0 : index
    %144 = vector.load %arg6[%c9_94, %c0_95, %c0_96] : memref<24x1x8xf32, #tpu.memory_space<vmem>>, vector<1x1x8xf32>
    %145 = vector.shape_cast %144 : vector<1x1x8xf32> to vector<1x8xf32>
    %146 = vector.broadcast %145 : vector<1x8xf32> to vector<8x8xf32>
    %147 = arith.addf %143, %146 : vector<8x8xf32>
    %c10 = arith.constant 10 : index
    %c0_97 = arith.constant 0 : index
    %c0_98 = arith.constant 0 : index
    %148 = vector.load %arg5[%c10, %c0_97, %c0_98] : memref<24x32x8xf32, #tpu.memory_space<vmem>>, vector<1x32x8xf32>
    %149 = vector.shape_cast %148 : vector<1x32x8xf32> to vector<32x8xf32>
    %cst_99 = arith.constant dense<0.000000e+00> : vector<8x8xf32>
    %150 = tpu.matmul %11, %149, %cst_99 {dimension_numbers = #tpu.dot_dimension_numbers<[1], [0], [0], [1], [0, 0, 1, 1], [], []>} : vector<8x32xf32>, vector<32x8xf32>, vector<8x8xf32> -> vector<8x8xf32>
    %c10_100 = arith.constant 10 : index
    %c0_101 = arith.constant 0 : index
    %c0_102 = arith.constant 0 : index
    %151 = vector.load %arg6[%c10_100, %c0_101, %c0_102] : memref<24x1x8xf32, #tpu.memory_space<vmem>>, vector<1x1x8xf32>
    %152 = vector.shape_cast %151 : vector<1x1x8xf32> to vector<1x8xf32>
    %153 = vector.broadcast %152 : vector<1x8xf32> to vector<8x8xf32>
    %154 = arith.addf %150, %153 : vector<8x8xf32>
    %c11 = arith.constant 11 : index
    %c0_103 = arith.constant 0 : index
    %c0_104 = arith.constant 0 : index
    %155 = vector.load %arg5[%c11, %c0_103, %c0_104] : memref<24x32x8xf32, #tpu.memory_space<vmem>>, vector<1x32x8xf32>
    %156 = vector.shape_cast %155 : vector<1x32x8xf32> to vector<32x8xf32>
    %cst_105 = arith.constant dense<0.000000e+00> : vector<8x8xf32>
    %157 = tpu.matmul %11, %156, %cst_105 {dimension_numbers = #tpu.dot_dimension_numbers<[1], [0], [0], [1], [0, 0, 1, 1], [], []>} : vector<8x32xf32>, vector<32x8xf32>, vector<8x8xf32> -> vector<8x8xf32>
    %c11_106 = arith.constant 11 : index
    %c0_107 = arith.constant 0 : index
    %c0_108 = arith.constant 0 : index
    %158 = vector.load %arg6[%c11_106, %c0_107, %c0_108] : memref<24x1x8xf32, #tpu.memory_space<vmem>>, vector<1x1x8xf32>
    %159 = vector.shape_cast %158 : vector<1x1x8xf32> to vector<1x8xf32>
    %160 = vector.broadcast %159 : vector<1x8xf32> to vector<8x8xf32>
    %161 = arith.addf %157, %160 : vector<8x8xf32>
    %162 = vector.shape_cast %147 : vector<8x8xf32> to vector<1x8x8xf32>
    %163 = vector.shape_cast %154 : vector<8x8xf32> to vector<1x8x8xf32>
    %164 = vector.shape_cast %161 : vector<8x8xf32> to vector<1x8x8xf32>
    "tpu.trace_start"() <{level = 10 : i32, message = "bqd,bkd->bqk"}> : () -> ()
    %cst_109 = arith.constant dense<0.000000e+00> : vector<1x8x8xf32>
    %165 = tpu.matmul %162, %163, %cst_109 {dimension_numbers = #tpu.dot_dimension_numbers<[2], [2], [1], [1], [0, 0, 0, 1, 1, 1], [0], [0]>} : vector<1x8x8xf32>, vector<1x8x8xf32>, vector<1x8x8xf32> -> vector<1x8x8xf32>
    "tpu.trace_stop"() : () -> ()
    %cst_110 = arith.constant dense<0xFF800000> : vector<1x8xf32>
    %166 = vector.multi_reduction <maximumf>, %165, %cst_110 [2] : vector<1x8x8xf32> to vector<1x8xf32>
    %167 = vector.shape_cast %166 : vector<1x8xf32> to vector<1x8x1xf32>
    %168 = vector.broadcast %167 : vector<1x8x1xf32> to vector<1x8x8xf32>
    %169 = arith.subf %165, %168 : vector<1x8x8xf32>
    %170 = math.exp %169 : vector<1x8x8xf32>
    %cst_111 = arith.constant dense<0.000000e+00> : vector<1x8xf32>
    %171 = vector.multi_reduction <add>, %170, %cst_111 [2] : vector<1x8x8xf32> to vector<1x8xf32>
    %172 = vector.shape_cast %171 : vector<1x8xf32> to vector<1x8x1xf32>
    %173 = vector.broadcast %172 : vector<1x8x1xf32> to vector<1x8x8xf32>
    %174 = arith.divf %170, %173 : vector<1x8x8xf32>
    "tpu.trace_start"() <{level = 10 : i32, message = "bqk,bkd->bqd"}> : () -> ()
    %cst_112 = arith.constant dense<0.000000e+00> : vector<1x8x8xf32>
    %175 = tpu.matmul %174, %164, %cst_112 {dimension_numbers = #tpu.dot_dimension_numbers<[2], [1], [1], [2], [0, 0, 0, 1, 1, 2], [0], [0]>} : vector<1x8x8xf32>, vector<1x8x8xf32>, vector<1x8x8xf32> -> vector<1x8x8xf32>
    "tpu.trace_stop"() : () -> ()
    %176 = vector.shape_cast %175 : vector<1x8x8xf32> to vector<8x8xf32>
    %c3_113 = arith.constant 3 : index
    %c0_114 = arith.constant 0 : index
    %c0_115 = arith.constant 0 : index
    %177 = vector.load %arg7[%c3_113, %c0_114, %c0_115] : memref<8x8x32xf32, #tpu.memory_space<vmem>>, vector<1x8x32xf32>
    %178 = vector.shape_cast %177 : vector<1x8x32xf32> to vector<8x32xf32>
    %cst_116 = arith.constant dense<0.000000e+00> : vector<8x32xf32>
    %179 = tpu.matmul %176, %178, %cst_116 {dimension_numbers = #tpu.dot_dimension_numbers<[1], [0], [0], [1], [0, 0, 1, 1], [], []>} : vector<8x8xf32>, vector<8x32xf32>, vector<8x32xf32> -> vector<8x32xf32>
    %180 = arith.addf %140, %179 : vector<8x32xf32>
    %181 = vector.broadcast %14 : vector<1x32xf32> to vector<8x32xf32>
    %182 = arith.addf %180, %181 : vector<8x32xf32>
    %183 = arith.addf %11, %182 : vector<8x32xf32>
    %cst_117 = arith.constant dense<0.000000e+00> : vector<8xf32>
    %184 = vector.multi_reduction <add>, %183, %cst_117 [1] : vector<8x32xf32> to vector<8xf32>
    %185 = vector.shape_cast %184 : vector<8xf32> to vector<8x1xf32>
    %cst_118 = arith.constant 3.200000e+01 : f32
    %186 = vector.broadcast %cst_118 : f32 to vector<8x1xf32>
    %187 = arith.divf %185, %186 : vector<8x1xf32>
    %188 = vector.broadcast %187 : vector<8x1xf32> to vector<8x32xf32>
    %189 = arith.subf %183, %188 : vector<8x32xf32>
    %190 = arith.mulf %189, %189 : vector<8x32xf32>
    %cst_119 = arith.constant dense<0.000000e+00> : vector<8xf32>
    %191 = vector.multi_reduction <add>, %190, %cst_119 [1] : vector<8x32xf32> to vector<8xf32>
    %192 = vector.shape_cast %191 : vector<8xf32> to vector<8x1xf32>
    %cst_120 = arith.constant 3.200000e+01 : f32
    %193 = vector.broadcast %cst_120 : f32 to vector<8x1xf32>
    %194 = arith.divf %192, %193 : vector<8x1xf32>
    %cst_121 = arith.constant 9.99999974E-6 : f32
    %195 = vector.broadcast %cst_121 : f32 to vector<8x1xf32>
    %196 = arith.addf %194, %195 : vector<8x1xf32>
    %197 = math.rsqrt %196 : vector<8x1xf32>
    %198 = vector.broadcast %197 : vector<8x1xf32> to vector<8x32xf32>
    %199 = arith.mulf %189, %198 : vector<8x32xf32>
    %200 = vector.broadcast %15 : vector<1x32xf32> to vector<8x32xf32>
    %201 = arith.mulf %199, %200 : vector<8x32xf32>
    %202 = vector.broadcast %16 : vector<1x32xf32> to vector<8x32xf32>
    %203 = arith.addf %201, %202 : vector<8x32xf32>
    %c0_122 = arith.constant 0 : index
    %c0_123 = arith.constant 0 : index
    %c0_124 = arith.constant 0 : index
    %204 = vector.load %arg8[%c0_122, %c0_123, %c0_124] : memref<2x32x64xf32, #tpu.memory_space<vmem>>, vector<1x32x64xf32>
    %205 = vector.shape_cast %204 : vector<1x32x64xf32> to vector<32x64xf32>
    %cst_125 = arith.constant dense<0.000000e+00> : vector<8x64xf32>
    %206 = tpu.matmul %203, %205, %cst_125 {dimension_numbers = #tpu.dot_dimension_numbers<[1], [0], [0], [1], [0, 0, 1, 1], [], []>} : vector<8x32xf32>, vector<32x64xf32>, vector<8x64xf32> -> vector<8x64xf32>
    %c0_126 = arith.constant 0 : index
    %c0_127 = arith.constant 0 : index
    %c0_128 = arith.constant 0 : index
    %207 = vector.load %arg9[%c0_126, %c0_127, %c0_128] : memref<2x1x64xf32, #tpu.memory_space<vmem>>, vector<1x1x64xf32>
    %208 = vector.shape_cast %207 : vector<1x1x64xf32> to vector<1x64xf32>
    %209 = vector.broadcast %208 : vector<1x64xf32> to vector<8x64xf32>
    %210 = arith.addf %206, %209 : vector<8x64xf32>
    %cst_129 = arith.constant 0.000000e+00 : f32
    %211 = vector.broadcast %cst_129 : f32 to vector<8x64xf32>
    %212 = arith.maximumf %210, %211 : vector<8x64xf32>
    %c0_130 = arith.constant 0 : index
    %c0_131 = arith.constant 0 : index
    %c0_132 = arith.constant 0 : index
    %213 = vector.load %arg10[%c0_130, %c0_131, %c0_132] : memref<2x64x32xf32, #tpu.memory_space<vmem>>, vector<1x64x32xf32>
    %214 = vector.shape_cast %213 : vector<1x64x32xf32> to vector<64x32xf32>
    %cst_133 = arith.constant dense<0.000000e+00> : vector<8x32xf32>
    %215 = tpu.matmul %212, %214, %cst_133 {dimension_numbers = #tpu.dot_dimension_numbers<[1], [0], [0], [1], [0, 0, 1, 1], [], []>} : vector<8x64xf32>, vector<64x32xf32>, vector<8x32xf32> -> vector<8x32xf32>
    %216 = vector.broadcast %17 : vector<1x32xf32> to vector<8x32xf32>
    %217 = arith.addf %215, %216 : vector<8x32xf32>
    %218 = arith.addf %203, %217 : vector<8x32xf32>
    %cst_134 = arith.constant dense<0.000000e+00> : vector<8xf32>
    %219 = vector.multi_reduction <add>, %218, %cst_134 [1] : vector<8x32xf32> to vector<8xf32>
    %220 = vector.shape_cast %219 : vector<8xf32> to vector<8x1xf32>
    %cst_135 = arith.constant 3.200000e+01 : f32
    %221 = vector.broadcast %cst_135 : f32 to vector<8x1xf32>
    %222 = arith.divf %220, %221 : vector<8x1xf32>
    %223 = vector.broadcast %222 : vector<8x1xf32> to vector<8x32xf32>
    %224 = arith.subf %218, %223 : vector<8x32xf32>
    %225 = arith.mulf %224, %224 : vector<8x32xf32>
    %cst_136 = arith.constant dense<0.000000e+00> : vector<8xf32>
    %226 = vector.multi_reduction <add>, %225, %cst_136 [1] : vector<8x32xf32> to vector<8xf32>
    %227 = vector.shape_cast %226 : vector<8xf32> to vector<8x1xf32>
    %cst_137 = arith.constant 3.200000e+01 : f32
    %228 = vector.broadcast %cst_137 : f32 to vector<8x1xf32>
    %229 = arith.divf %227, %228 : vector<8x1xf32>
    %cst_138 = arith.constant 9.99999974E-6 : f32
    %230 = vector.broadcast %cst_138 : f32 to vector<8x1xf32>
    %231 = arith.addf %229, %230 : vector<8x1xf32>
    %232 = math.rsqrt %231 : vector<8x1xf32>
    %233 = vector.broadcast %232 : vector<8x1xf32> to vector<8x32xf32>
    %234 = arith.mulf %224, %233 : vector<8x32xf32>
    %235 = vector.broadcast %18 : vector<1x32xf32> to vector<8x32xf32>
    %236 = arith.mulf %234, %235 : vector<8x32xf32>
    %237 = vector.broadcast %19 : vector<1x32xf32> to vector<8x32xf32>
    %238 = arith.addf %236, %237 : vector<8x32xf32>
    %c1_139 = arith.constant 1 : index
    %c0_140 = arith.constant 0 : index
    %c0_141 = arith.constant 0 : index
    %239 = vector.load %arg11[%c1_139, %c0_140, %c0_141] : memref<2x6x32xf32, #tpu.memory_space<vmem>>, vector<1x6x32xf32>
    %240 = vector.shape_cast %239 : vector<1x6x32xf32> to vector<6x32xf32>
    %241 = vector.extract_strided_slice %240 {offsets = [0, 0], sizes = [1, 32], strides = [1, 1]} : vector<6x32xf32> to vector<1x32xf32>
    %242 = vector.extract_strided_slice %240 {offsets = [1, 0], sizes = [1, 32], strides = [1, 1]} : vector<6x32xf32> to vector<1x32xf32>
    %243 = vector.extract_strided_slice %240 {offsets = [2, 0], sizes = [1, 32], strides = [1, 1]} : vector<6x32xf32> to vector<1x32xf32>
    %244 = vector.extract_strided_slice %240 {offsets = [3, 0], sizes = [1, 32], strides = [1, 1]} : vector<6x32xf32> to vector<1x32xf32>
    %245 = vector.extract_strided_slice %240 {offsets = [4, 0], sizes = [1, 32], strides = [1, 1]} : vector<6x32xf32> to vector<1x32xf32>
    %246 = vector.extract_strided_slice %240 {offsets = [5, 0], sizes = [1, 32], strides = [1, 1]} : vector<6x32xf32> to vector<1x32xf32>
    %cst_142 = arith.constant 0.000000e+00 : f32
    %247 = vector.broadcast %cst_142 : f32 to vector<8x32xf32>
    %c12 = arith.constant 12 : index
    %c0_143 = arith.constant 0 : index
    %c0_144 = arith.constant 0 : index
    %248 = vector.load %arg5[%c12, %c0_143, %c0_144] : memref<24x32x8xf32, #tpu.memory_space<vmem>>, vector<1x32x8xf32>
    %249 = vector.shape_cast %248 : vector<1x32x8xf32> to vector<32x8xf32>
    %cst_145 = arith.constant dense<0.000000e+00> : vector<8x8xf32>
    %250 = tpu.matmul %238, %249, %cst_145 {dimension_numbers = #tpu.dot_dimension_numbers<[1], [0], [0], [1], [0, 0, 1, 1], [], []>} : vector<8x32xf32>, vector<32x8xf32>, vector<8x8xf32> -> vector<8x8xf32>
    %c12_146 = arith.constant 12 : index
    %c0_147 = arith.constant 0 : index
    %c0_148 = arith.constant 0 : index
    %251 = vector.load %arg6[%c12_146, %c0_147, %c0_148] : memref<24x1x8xf32, #tpu.memory_space<vmem>>, vector<1x1x8xf32>
    %252 = vector.shape_cast %251 : vector<1x1x8xf32> to vector<1x8xf32>
    %253 = vector.broadcast %252 : vector<1x8xf32> to vector<8x8xf32>
    %254 = arith.addf %250, %253 : vector<8x8xf32>
    %c13 = arith.constant 13 : index
    %c0_149 = arith.constant 0 : index
    %c0_150 = arith.constant 0 : index
    %255 = vector.load %arg5[%c13, %c0_149, %c0_150] : memref<24x32x8xf32, #tpu.memory_space<vmem>>, vector<1x32x8xf32>
    %256 = vector.shape_cast %255 : vector<1x32x8xf32> to vector<32x8xf32>
    %cst_151 = arith.constant dense<0.000000e+00> : vector<8x8xf32>
    %257 = tpu.matmul %238, %256, %cst_151 {dimension_numbers = #tpu.dot_dimension_numbers<[1], [0], [0], [1], [0, 0, 1, 1], [], []>} : vector<8x32xf32>, vector<32x8xf32>, vector<8x8xf32> -> vector<8x8xf32>
    %c13_152 = arith.constant 13 : index
    %c0_153 = arith.constant 0 : index
    %c0_154 = arith.constant 0 : index
    %258 = vector.load %arg6[%c13_152, %c0_153, %c0_154] : memref<24x1x8xf32, #tpu.memory_space<vmem>>, vector<1x1x8xf32>
    %259 = vector.shape_cast %258 : vector<1x1x8xf32> to vector<1x8xf32>
    %260 = vector.broadcast %259 : vector<1x8xf32> to vector<8x8xf32>
    %261 = arith.addf %257, %260 : vector<8x8xf32>
    %c14 = arith.constant 14 : index
    %c0_155 = arith.constant 0 : index
    %c0_156 = arith.constant 0 : index
    %262 = vector.load %arg5[%c14, %c0_155, %c0_156] : memref<24x32x8xf32, #tpu.memory_space<vmem>>, vector<1x32x8xf32>
    %263 = vector.shape_cast %262 : vector<1x32x8xf32> to vector<32x8xf32>
    %cst_157 = arith.constant dense<0.000000e+00> : vector<8x8xf32>
    %264 = tpu.matmul %238, %263, %cst_157 {dimension_numbers = #tpu.dot_dimension_numbers<[1], [0], [0], [1], [0, 0, 1, 1], [], []>} : vector<8x32xf32>, vector<32x8xf32>, vector<8x8xf32> -> vector<8x8xf32>
    %c14_158 = arith.constant 14 : index
    %c0_159 = arith.constant 0 : index
    %c0_160 = arith.constant 0 : index
    %265 = vector.load %arg6[%c14_158, %c0_159, %c0_160] : memref<24x1x8xf32, #tpu.memory_space<vmem>>, vector<1x1x8xf32>
    %266 = vector.shape_cast %265 : vector<1x1x8xf32> to vector<1x8xf32>
    %267 = vector.broadcast %266 : vector<1x8xf32> to vector<8x8xf32>
    %268 = arith.addf %264, %267 : vector<8x8xf32>
    %269 = vector.shape_cast %254 : vector<8x8xf32> to vector<1x8x8xf32>
    %270 = vector.shape_cast %261 : vector<8x8xf32> to vector<1x8x8xf32>
    %271 = vector.shape_cast %268 : vector<8x8xf32> to vector<1x8x8xf32>
    "tpu.trace_start"() <{level = 10 : i32, message = "bqd,bkd->bqk"}> : () -> ()
    %cst_161 = arith.constant dense<0.000000e+00> : vector<1x8x8xf32>
    %272 = tpu.matmul %269, %270, %cst_161 {dimension_numbers = #tpu.dot_dimension_numbers<[2], [2], [1], [1], [0, 0, 0, 1, 1, 1], [0], [0]>} : vector<1x8x8xf32>, vector<1x8x8xf32>, vector<1x8x8xf32> -> vector<1x8x8xf32>
    "tpu.trace_stop"() : () -> ()
    %cst_162 = arith.constant dense<0xFF800000> : vector<1x8xf32>
    %273 = vector.multi_reduction <maximumf>, %272, %cst_162 [2] : vector<1x8x8xf32> to vector<1x8xf32>
    %274 = vector.shape_cast %273 : vector<1x8xf32> to vector<1x8x1xf32>
    %275 = vector.broadcast %274 : vector<1x8x1xf32> to vector<1x8x8xf32>
    %276 = arith.subf %272, %275 : vector<1x8x8xf32>
    %277 = math.exp %276 : vector<1x8x8xf32>
    %cst_163 = arith.constant dense<0.000000e+00> : vector<1x8xf32>
    %278 = vector.multi_reduction <add>, %277, %cst_163 [2] : vector<1x8x8xf32> to vector<1x8xf32>
    %279 = vector.shape_cast %278 : vector<1x8xf32> to vector<1x8x1xf32>
    %280 = vector.broadcast %279 : vector<1x8x1xf32> to vector<1x8x8xf32>
    %281 = arith.divf %277, %280 : vector<1x8x8xf32>
    "tpu.trace_start"() <{level = 10 : i32, message = "bqk,bkd->bqd"}> : () -> ()
    %cst_164 = arith.constant dense<0.000000e+00> : vector<1x8x8xf32>
    %282 = tpu.matmul %281, %271, %cst_164 {dimension_numbers = #tpu.dot_dimension_numbers<[2], [1], [1], [2], [0, 0, 0, 1, 1, 2], [0], [0]>} : vector<1x8x8xf32>, vector<1x8x8xf32>, vector<1x8x8xf32> -> vector<1x8x8xf32>
    "tpu.trace_stop"() : () -> ()
    %283 = vector.shape_cast %282 : vector<1x8x8xf32> to vector<8x8xf32>
    %c4_165 = arith.constant 4 : index
    %c0_166 = arith.constant 0 : index
    %c0_167 = arith.constant 0 : index
    %284 = vector.load %arg7[%c4_165, %c0_166, %c0_167] : memref<8x8x32xf32, #tpu.memory_space<vmem>>, vector<1x8x32xf32>
    %285 = vector.shape_cast %284 : vector<1x8x32xf32> to vector<8x32xf32>
    %cst_168 = arith.constant dense<0.000000e+00> : vector<8x32xf32>
    %286 = tpu.matmul %283, %285, %cst_168 {dimension_numbers = #tpu.dot_dimension_numbers<[1], [0], [0], [1], [0, 0, 1, 1], [], []>} : vector<8x8xf32>, vector<8x32xf32>, vector<8x32xf32> -> vector<8x32xf32>
    %287 = arith.addf %247, %286 : vector<8x32xf32>
    %c15 = arith.constant 15 : index
    %c0_169 = arith.constant 0 : index
    %c0_170 = arith.constant 0 : index
    %288 = vector.load %arg5[%c15, %c0_169, %c0_170] : memref<24x32x8xf32, #tpu.memory_space<vmem>>, vector<1x32x8xf32>
    %289 = vector.shape_cast %288 : vector<1x32x8xf32> to vector<32x8xf32>
    %cst_171 = arith.constant dense<0.000000e+00> : vector<8x8xf32>
    %290 = tpu.matmul %238, %289, %cst_171 {dimension_numbers = #tpu.dot_dimension_numbers<[1], [0], [0], [1], [0, 0, 1, 1], [], []>} : vector<8x32xf32>, vector<32x8xf32>, vector<8x8xf32> -> vector<8x8xf32>
    %c15_172 = arith.constant 15 : index
    %c0_173 = arith.constant 0 : index
    %c0_174 = arith.constant 0 : index
    %291 = vector.load %arg6[%c15_172, %c0_173, %c0_174] : memref<24x1x8xf32, #tpu.memory_space<vmem>>, vector<1x1x8xf32>
    %292 = vector.shape_cast %291 : vector<1x1x8xf32> to vector<1x8xf32>
    %293 = vector.broadcast %292 : vector<1x8xf32> to vector<8x8xf32>
    %294 = arith.addf %290, %293 : vector<8x8xf32>
    %c16 = arith.constant 16 : index
    %c0_175 = arith.constant 0 : index
    %c0_176 = arith.constant 0 : index
    %295 = vector.load %arg5[%c16, %c0_175, %c0_176] : memref<24x32x8xf32, #tpu.memory_space<vmem>>, vector<1x32x8xf32>
    %296 = vector.shape_cast %295 : vector<1x32x8xf32> to vector<32x8xf32>
    %cst_177 = arith.constant dense<0.000000e+00> : vector<8x8xf32>
    %297 = tpu.matmul %238, %296, %cst_177 {dimension_numbers = #tpu.dot_dimension_numbers<[1], [0], [0], [1], [0, 0, 1, 1], [], []>} : vector<8x32xf32>, vector<32x8xf32>, vector<8x8xf32> -> vector<8x8xf32>
    %c16_178 = arith.constant 16 : index
    %c0_179 = arith.constant 0 : index
    %c0_180 = arith.constant 0 : index
    %298 = vector.load %arg6[%c16_178, %c0_179, %c0_180] : memref<24x1x8xf32, #tpu.memory_space<vmem>>, vector<1x1x8xf32>
    %299 = vector.shape_cast %298 : vector<1x1x8xf32> to vector<1x8xf32>
    %300 = vector.broadcast %299 : vector<1x8xf32> to vector<8x8xf32>
    %301 = arith.addf %297, %300 : vector<8x8xf32>
    %c17 = arith.constant 17 : index
    %c0_181 = arith.constant 0 : index
    %c0_182 = arith.constant 0 : index
    %302 = vector.load %arg5[%c17, %c0_181, %c0_182] : memref<24x32x8xf32, #tpu.memory_space<vmem>>, vector<1x32x8xf32>
    %303 = vector.shape_cast %302 : vector<1x32x8xf32> to vector<32x8xf32>
    %cst_183 = arith.constant dense<0.000000e+00> : vector<8x8xf32>
    %304 = tpu.matmul %238, %303, %cst_183 {dimension_numbers = #tpu.dot_dimension_numbers<[1], [0], [0], [1], [0, 0, 1, 1], [], []>} : vector<8x32xf32>, vector<32x8xf32>, vector<8x8xf32> -> vector<8x8xf32>
    %c17_184 = arith.constant 17 : index
    %c0_185 = arith.constant 0 : index
    %c0_186 = arith.constant 0 : index
    %305 = vector.load %arg6[%c17_184, %c0_185, %c0_186] : memref<24x1x8xf32, #tpu.memory_space<vmem>>, vector<1x1x8xf32>
    %306 = vector.shape_cast %305 : vector<1x1x8xf32> to vector<1x8xf32>
    %307 = vector.broadcast %306 : vector<1x8xf32> to vector<8x8xf32>
    %308 = arith.addf %304, %307 : vector<8x8xf32>
    %309 = vector.shape_cast %294 : vector<8x8xf32> to vector<1x8x8xf32>
    %310 = vector.shape_cast %301 : vector<8x8xf32> to vector<1x8x8xf32>
    %311 = vector.shape_cast %308 : vector<8x8xf32> to vector<1x8x8xf32>
    "tpu.trace_start"() <{level = 10 : i32, message = "bqd,bkd->bqk"}> : () -> ()
    %cst_187 = arith.constant dense<0.000000e+00> : vector<1x8x8xf32>
    %312 = tpu.matmul %309, %310, %cst_187 {dimension_numbers = #tpu.dot_dimension_numbers<[2], [2], [1], [1], [0, 0, 0, 1, 1, 1], [0], [0]>} : vector<1x8x8xf32>, vector<1x8x8xf32>, vector<1x8x8xf32> -> vector<1x8x8xf32>
    "tpu.trace_stop"() : () -> ()
    %cst_188 = arith.constant dense<0xFF800000> : vector<1x8xf32>
    %313 = vector.multi_reduction <maximumf>, %312, %cst_188 [2] : vector<1x8x8xf32> to vector<1x8xf32>
    %314 = vector.shape_cast %313 : vector<1x8xf32> to vector<1x8x1xf32>
    %315 = vector.broadcast %314 : vector<1x8x1xf32> to vector<1x8x8xf32>
    %316 = arith.subf %312, %315 : vector<1x8x8xf32>
    %317 = math.exp %316 : vector<1x8x8xf32>
    %cst_189 = arith.constant dense<0.000000e+00> : vector<1x8xf32>
    %318 = vector.multi_reduction <add>, %317, %cst_189 [2] : vector<1x8x8xf32> to vector<1x8xf32>
    %319 = vector.shape_cast %318 : vector<1x8xf32> to vector<1x8x1xf32>
    %320 = vector.broadcast %319 : vector<1x8x1xf32> to vector<1x8x8xf32>
    %321 = arith.divf %317, %320 : vector<1x8x8xf32>
    "tpu.trace_start"() <{level = 10 : i32, message = "bqk,bkd->bqd"}> : () -> ()
    %cst_190 = arith.constant dense<0.000000e+00> : vector<1x8x8xf32>
    %322 = tpu.matmul %321, %311, %cst_190 {dimension_numbers = #tpu.dot_dimension_numbers<[2], [1], [1], [2], [0, 0, 0, 1, 1, 2], [0], [0]>} : vector<1x8x8xf32>, vector<1x8x8xf32>, vector<1x8x8xf32> -> vector<1x8x8xf32>
    "tpu.trace_stop"() : () -> ()
    %323 = vector.shape_cast %322 : vector<1x8x8xf32> to vector<8x8xf32>
    %c5_191 = arith.constant 5 : index
    %c0_192 = arith.constant 0 : index
    %c0_193 = arith.constant 0 : index
    %324 = vector.load %arg7[%c5_191, %c0_192, %c0_193] : memref<8x8x32xf32, #tpu.memory_space<vmem>>, vector<1x8x32xf32>
    %325 = vector.shape_cast %324 : vector<1x8x32xf32> to vector<8x32xf32>
    %cst_194 = arith.constant dense<0.000000e+00> : vector<8x32xf32>
    %326 = tpu.matmul %323, %325, %cst_194 {dimension_numbers = #tpu.dot_dimension_numbers<[1], [0], [0], [1], [0, 0, 1, 1], [], []>} : vector<8x8xf32>, vector<8x32xf32>, vector<8x32xf32> -> vector<8x32xf32>
    %327 = arith.addf %287, %326 : vector<8x32xf32>
    %c18 = arith.constant 18 : index
    %c0_195 = arith.constant 0 : index
    %c0_196 = arith.constant 0 : index
    %328 = vector.load %arg5[%c18, %c0_195, %c0_196] : memref<24x32x8xf32, #tpu.memory_space<vmem>>, vector<1x32x8xf32>
    %329 = vector.shape_cast %328 : vector<1x32x8xf32> to vector<32x8xf32>
    %cst_197 = arith.constant dense<0.000000e+00> : vector<8x8xf32>
    %330 = tpu.matmul %238, %329, %cst_197 {dimension_numbers = #tpu.dot_dimension_numbers<[1], [0], [0], [1], [0, 0, 1, 1], [], []>} : vector<8x32xf32>, vector<32x8xf32>, vector<8x8xf32> -> vector<8x8xf32>
    %c18_198 = arith.constant 18 : index
    %c0_199 = arith.constant 0 : index
    %c0_200 = arith.constant 0 : index
    %331 = vector.load %arg6[%c18_198, %c0_199, %c0_200] : memref<24x1x8xf32, #tpu.memory_space<vmem>>, vector<1x1x8xf32>
    %332 = vector.shape_cast %331 : vector<1x1x8xf32> to vector<1x8xf32>
    %333 = vector.broadcast %332 : vector<1x8xf32> to vector<8x8xf32>
    %334 = arith.addf %330, %333 : vector<8x8xf32>
    %c19 = arith.constant 19 : index
    %c0_201 = arith.constant 0 : index
    %c0_202 = arith.constant 0 : index
    %335 = vector.load %arg5[%c19, %c0_201, %c0_202] : memref<24x32x8xf32, #tpu.memory_space<vmem>>, vector<1x32x8xf32>
    %336 = vector.shape_cast %335 : vector<1x32x8xf32> to vector<32x8xf32>
    %cst_203 = arith.constant dense<0.000000e+00> : vector<8x8xf32>
    %337 = tpu.matmul %238, %336, %cst_203 {dimension_numbers = #tpu.dot_dimension_numbers<[1], [0], [0], [1], [0, 0, 1, 1], [], []>} : vector<8x32xf32>, vector<32x8xf32>, vector<8x8xf32> -> vector<8x8xf32>
    %c19_204 = arith.constant 19 : index
    %c0_205 = arith.constant 0 : index
    %c0_206 = arith.constant 0 : index
    %338 = vector.load %arg6[%c19_204, %c0_205, %c0_206] : memref<24x1x8xf32, #tpu.memory_space<vmem>>, vector<1x1x8xf32>
    %339 = vector.shape_cast %338 : vector<1x1x8xf32> to vector<1x8xf32>
    %340 = vector.broadcast %339 : vector<1x8xf32> to vector<8x8xf32>
    %341 = arith.addf %337, %340 : vector<8x8xf32>
    %c20 = arith.constant 20 : index
    %c0_207 = arith.constant 0 : index
    %c0_208 = arith.constant 0 : index
    %342 = vector.load %arg5[%c20, %c0_207, %c0_208] : memref<24x32x8xf32, #tpu.memory_space<vmem>>, vector<1x32x8xf32>
    %343 = vector.shape_cast %342 : vector<1x32x8xf32> to vector<32x8xf32>
    %cst_209 = arith.constant dense<0.000000e+00> : vector<8x8xf32>
    %344 = tpu.matmul %238, %343, %cst_209 {dimension_numbers = #tpu.dot_dimension_numbers<[1], [0], [0], [1], [0, 0, 1, 1], [], []>} : vector<8x32xf32>, vector<32x8xf32>, vector<8x8xf32> -> vector<8x8xf32>
    %c20_210 = arith.constant 20 : index
    %c0_211 = arith.constant 0 : index
    %c0_212 = arith.constant 0 : index
    %345 = vector.load %arg6[%c20_210, %c0_211, %c0_212] : memref<24x1x8xf32, #tpu.memory_space<vmem>>, vector<1x1x8xf32>
    %346 = vector.shape_cast %345 : vector<1x1x8xf32> to vector<1x8xf32>
    %347 = vector.broadcast %346 : vector<1x8xf32> to vector<8x8xf32>
    %348 = arith.addf %344, %347 : vector<8x8xf32>
    %349 = vector.shape_cast %334 : vector<8x8xf32> to vector<1x8x8xf32>
    %350 = vector.shape_cast %341 : vector<8x8xf32> to vector<1x8x8xf32>
    %351 = vector.shape_cast %348 : vector<8x8xf32> to vector<1x8x8xf32>
    "tpu.trace_start"() <{level = 10 : i32, message = "bqd,bkd->bqk"}> : () -> ()
    %cst_213 = arith.constant dense<0.000000e+00> : vector<1x8x8xf32>
    %352 = tpu.matmul %349, %350, %cst_213 {dimension_numbers = #tpu.dot_dimension_numbers<[2], [2], [1], [1], [0, 0, 0, 1, 1, 1], [0], [0]>} : vector<1x8x8xf32>, vector<1x8x8xf32>, vector<1x8x8xf32> -> vector<1x8x8xf32>
    "tpu.trace_stop"() : () -> ()
    %cst_214 = arith.constant dense<0xFF800000> : vector<1x8xf32>
    %353 = vector.multi_reduction <maximumf>, %352, %cst_214 [2] : vector<1x8x8xf32> to vector<1x8xf32>
    %354 = vector.shape_cast %353 : vector<1x8xf32> to vector<1x8x1xf32>
    %355 = vector.broadcast %354 : vector<1x8x1xf32> to vector<1x8x8xf32>
    %356 = arith.subf %352, %355 : vector<1x8x8xf32>
    %357 = math.exp %356 : vector<1x8x8xf32>
    %cst_215 = arith.constant dense<0.000000e+00> : vector<1x8xf32>
    %358 = vector.multi_reduction <add>, %357, %cst_215 [2] : vector<1x8x8xf32> to vector<1x8xf32>
    %359 = vector.shape_cast %358 : vector<1x8xf32> to vector<1x8x1xf32>
    %360 = vector.broadcast %359 : vector<1x8x1xf32> to vector<1x8x8xf32>
    %361 = arith.divf %357, %360 : vector<1x8x8xf32>
    "tpu.trace_start"() <{level = 10 : i32, message = "bqk,bkd->bqd"}> : () -> ()
    %cst_216 = arith.constant dense<0.000000e+00> : vector<1x8x8xf32>
    %362 = tpu.matmul %361, %351, %cst_216 {dimension_numbers = #tpu.dot_dimension_numbers<[2], [1], [1], [2], [0, 0, 0, 1, 1, 2], [0], [0]>} : vector<1x8x8xf32>, vector<1x8x8xf32>, vector<1x8x8xf32> -> vector<1x8x8xf32>
    "tpu.trace_stop"() : () -> ()
    %363 = vector.shape_cast %362 : vector<1x8x8xf32> to vector<8x8xf32>
    %c6_217 = arith.constant 6 : index
    %c0_218 = arith.constant 0 : index
    %c0_219 = arith.constant 0 : index
    %364 = vector.load %arg7[%c6_217, %c0_218, %c0_219] : memref<8x8x32xf32, #tpu.memory_space<vmem>>, vector<1x8x32xf32>
    %365 = vector.shape_cast %364 : vector<1x8x32xf32> to vector<8x32xf32>
    %cst_220 = arith.constant dense<0.000000e+00> : vector<8x32xf32>
    %366 = tpu.matmul %363, %365, %cst_220 {dimension_numbers = #tpu.dot_dimension_numbers<[1], [0], [0], [1], [0, 0, 1, 1], [], []>} : vector<8x8xf32>, vector<8x32xf32>, vector<8x32xf32> -> vector<8x32xf32>
    %367 = arith.addf %327, %366 : vector<8x32xf32>
    %c21 = arith.constant 21 : index
    %c0_221 = arith.constant 0 : index
    %c0_222 = arith.constant 0 : index
    %368 = vector.load %arg5[%c21, %c0_221, %c0_222] : memref<24x32x8xf32, #tpu.memory_space<vmem>>, vector<1x32x8xf32>
    %369 = vector.shape_cast %368 : vector<1x32x8xf32> to vector<32x8xf32>
    %cst_223 = arith.constant dense<0.000000e+00> : vector<8x8xf32>
    %370 = tpu.matmul %238, %369, %cst_223 {dimension_numbers = #tpu.dot_dimension_numbers<[1], [0], [0], [1], [0, 0, 1, 1], [], []>} : vector<8x32xf32>, vector<32x8xf32>, vector<8x8xf32> -> vector<8x8xf32>
    %c21_224 = arith.constant 21 : index
    %c0_225 = arith.constant 0 : index
    %c0_226 = arith.constant 0 : index
    %371 = vector.load %arg6[%c21_224, %c0_225, %c0_226] : memref<24x1x8xf32, #tpu.memory_space<vmem>>, vector<1x1x8xf32>
    %372 = vector.shape_cast %371 : vector<1x1x8xf32> to vector<1x8xf32>
    %373 = vector.broadcast %372 : vector<1x8xf32> to vector<8x8xf32>
    %374 = arith.addf %370, %373 : vector<8x8xf32>
    %c22 = arith.constant 22 : index
    %c0_227 = arith.constant 0 : index
    %c0_228 = arith.constant 0 : index
    %375 = vector.load %arg5[%c22, %c0_227, %c0_228] : memref<24x32x8xf32, #tpu.memory_space<vmem>>, vector<1x32x8xf32>
    %376 = vector.shape_cast %375 : vector<1x32x8xf32> to vector<32x8xf32>
    %cst_229 = arith.constant dense<0.000000e+00> : vector<8x8xf32>
    %377 = tpu.matmul %238, %376, %cst_229 {dimension_numbers = #tpu.dot_dimension_numbers<[1], [0], [0], [1], [0, 0, 1, 1], [], []>} : vector<8x32xf32>, vector<32x8xf32>, vector<8x8xf32> -> vector<8x8xf32>
    %c22_230 = arith.constant 22 : index
    %c0_231 = arith.constant 0 : index
    %c0_232 = arith.constant 0 : index
    %378 = vector.load %arg6[%c22_230, %c0_231, %c0_232] : memref<24x1x8xf32, #tpu.memory_space<vmem>>, vector<1x1x8xf32>
    %379 = vector.shape_cast %378 : vector<1x1x8xf32> to vector<1x8xf32>
    %380 = vector.broadcast %379 : vector<1x8xf32> to vector<8x8xf32>
    %381 = arith.addf %377, %380 : vector<8x8xf32>
    %c23 = arith.constant 23 : index
    %c0_233 = arith.constant 0 : index
    %c0_234 = arith.constant 0 : index
    %382 = vector.load %arg5[%c23, %c0_233, %c0_234] : memref<24x32x8xf32, #tpu.memory_space<vmem>>, vector<1x32x8xf32>
    %383 = vector.shape_cast %382 : vector<1x32x8xf32> to vector<32x8xf32>
    %cst_235 = arith.constant dense<0.000000e+00> : vector<8x8xf32>
    %384 = tpu.matmul %238, %383, %cst_235 {dimension_numbers = #tpu.dot_dimension_numbers<[1], [0], [0], [1], [0, 0, 1, 1], [], []>} : vector<8x32xf32>, vector<32x8xf32>, vector<8x8xf32> -> vector<8x8xf32>
    %c23_236 = arith.constant 23 : index
    %c0_237 = arith.constant 0 : index
    %c0_238 = arith.constant 0 : index
    %385 = vector.load %arg6[%c23_236, %c0_237, %c0_238] : memref<24x1x8xf32, #tpu.memory_space<vmem>>, vector<1x1x8xf32>
    %386 = vector.shape_cast %385 : vector<1x1x8xf32> to vector<1x8xf32>
    %387 = vector.broadcast %386 : vector<1x8xf32> to vector<8x8xf32>
    %388 = arith.addf %384, %387 : vector<8x8xf32>
    %389 = vector.shape_cast %374 : vector<8x8xf32> to vector<1x8x8xf32>
    %390 = vector.shape_cast %381 : vector<8x8xf32> to vector<1x8x8xf32>
    %391 = vector.shape_cast %388 : vector<8x8xf32> to vector<1x8x8xf32>
    "tpu.trace_start"() <{level = 10 : i32, message = "bqd,bkd->bqk"}> : () -> ()
    %cst_239 = arith.constant dense<0.000000e+00> : vector<1x8x8xf32>
    %392 = tpu.matmul %389, %390, %cst_239 {dimension_numbers = #tpu.dot_dimension_numbers<[2], [2], [1], [1], [0, 0, 0, 1, 1, 1], [0], [0]>} : vector<1x8x8xf32>, vector<1x8x8xf32>, vector<1x8x8xf32> -> vector<1x8x8xf32>
    "tpu.trace_stop"() : () -> ()
    %cst_240 = arith.constant dense<0xFF800000> : vector<1x8xf32>
    %393 = vector.multi_reduction <maximumf>, %392, %cst_240 [2] : vector<1x8x8xf32> to vector<1x8xf32>
    %394 = vector.shape_cast %393 : vector<1x8xf32> to vector<1x8x1xf32>
    %395 = vector.broadcast %394 : vector<1x8x1xf32> to vector<1x8x8xf32>
    %396 = arith.subf %392, %395 : vector<1x8x8xf32>
    %397 = math.exp %396 : vector<1x8x8xf32>
    %cst_241 = arith.constant dense<0.000000e+00> : vector<1x8xf32>
    %398 = vector.multi_reduction <add>, %397, %cst_241 [2] : vector<1x8x8xf32> to vector<1x8xf32>
    %399 = vector.shape_cast %398 : vector<1x8xf32> to vector<1x8x1xf32>
    %400 = vector.broadcast %399 : vector<1x8x1xf32> to vector<1x8x8xf32>
    %401 = arith.divf %397, %400 : vector<1x8x8xf32>
    "tpu.trace_start"() <{level = 10 : i32, message = "bqk,bkd->bqd"}> : () -> ()
    %cst_242 = arith.constant dense<0.000000e+00> : vector<1x8x8xf32>
    %402 = tpu.matmul %401, %391, %cst_242 {dimension_numbers = #tpu.dot_dimension_numbers<[2], [1], [1], [2], [0, 0, 0, 1, 1, 2], [0], [0]>} : vector<1x8x8xf32>, vector<1x8x8xf32>, vector<1x8x8xf32> -> vector<1x8x8xf32>
    "tpu.trace_stop"() : () -> ()
    %403 = vector.shape_cast %402 : vector<1x8x8xf32> to vector<8x8xf32>
    %c7_243 = arith.constant 7 : index
    %c0_244 = arith.constant 0 : index
    %c0_245 = arith.constant 0 : index
    %404 = vector.load %arg7[%c7_243, %c0_244, %c0_245] : memref<8x8x32xf32, #tpu.memory_space<vmem>>, vector<1x8x32xf32>
    %405 = vector.shape_cast %404 : vector<1x8x32xf32> to vector<8x32xf32>
    %cst_246 = arith.constant dense<0.000000e+00> : vector<8x32xf32>
    %406 = tpu.matmul %403, %405, %cst_246 {dimension_numbers = #tpu.dot_dimension_numbers<[1], [0], [0], [1], [0, 0, 1, 1], [], []>} : vector<8x8xf32>, vector<8x32xf32>, vector<8x32xf32> -> vector<8x32xf32>
    %407 = arith.addf %367, %406 : vector<8x32xf32>
    %408 = vector.broadcast %241 : vector<1x32xf32> to vector<8x32xf32>
    %409 = arith.addf %407, %408 : vector<8x32xf32>
    %410 = arith.addf %238, %409 : vector<8x32xf32>
    %cst_247 = arith.constant dense<0.000000e+00> : vector<8xf32>
    %411 = vector.multi_reduction <add>, %410, %cst_247 [1] : vector<8x32xf32> to vector<8xf32>
    %412 = vector.shape_cast %411 : vector<8xf32> to vector<8x1xf32>
    %cst_248 = arith.constant 3.200000e+01 : f32
    %413 = vector.broadcast %cst_248 : f32 to vector<8x1xf32>
    %414 = arith.divf %412, %413 : vector<8x1xf32>
    %415 = vector.broadcast %414 : vector<8x1xf32> to vector<8x32xf32>
    %416 = arith.subf %410, %415 : vector<8x32xf32>
    %417 = arith.mulf %416, %416 : vector<8x32xf32>
    %cst_249 = arith.constant dense<0.000000e+00> : vector<8xf32>
    %418 = vector.multi_reduction <add>, %417, %cst_249 [1] : vector<8x32xf32> to vector<8xf32>
    %419 = vector.shape_cast %418 : vector<8xf32> to vector<8x1xf32>
    %cst_250 = arith.constant 3.200000e+01 : f32
    %420 = vector.broadcast %cst_250 : f32 to vector<8x1xf32>
    %421 = arith.divf %419, %420 : vector<8x1xf32>
    %cst_251 = arith.constant 9.99999974E-6 : f32
    %422 = vector.broadcast %cst_251 : f32 to vector<8x1xf32>
    %423 = arith.addf %421, %422 : vector<8x1xf32>
    %424 = math.rsqrt %423 : vector<8x1xf32>
    %425 = vector.broadcast %424 : vector<8x1xf32> to vector<8x32xf32>
    %426 = arith.mulf %416, %425 : vector<8x32xf32>
    %427 = vector.broadcast %242 : vector<1x32xf32> to vector<8x32xf32>
    %428 = arith.mulf %426, %427 : vector<8x32xf32>
    %429 = vector.broadcast %243 : vector<1x32xf32> to vector<8x32xf32>
    %430 = arith.addf %428, %429 : vector<8x32xf32>
    %c1_252 = arith.constant 1 : index
    %c0_253 = arith.constant 0 : index
    %c0_254 = arith.constant 0 : index
    %431 = vector.load %arg8[%c1_252, %c0_253, %c0_254] : memref<2x32x64xf32, #tpu.memory_space<vmem>>, vector<1x32x64xf32>
    %432 = vector.shape_cast %431 : vector<1x32x64xf32> to vector<32x64xf32>
    %cst_255 = arith.constant dense<0.000000e+00> : vector<8x64xf32>
    %433 = tpu.matmul %430, %432, %cst_255 {dimension_numbers = #tpu.dot_dimension_numbers<[1], [0], [0], [1], [0, 0, 1, 1], [], []>} : vector<8x32xf32>, vector<32x64xf32>, vector<8x64xf32> -> vector<8x64xf32>
    %c1_256 = arith.constant 1 : index
    %c0_257 = arith.constant 0 : index
    %c0_258 = arith.constant 0 : index
    %434 = vector.load %arg9[%c1_256, %c0_257, %c0_258] : memref<2x1x64xf32, #tpu.memory_space<vmem>>, vector<1x1x64xf32>
    %435 = vector.shape_cast %434 : vector<1x1x64xf32> to vector<1x64xf32>
    %436 = vector.broadcast %435 : vector<1x64xf32> to vector<8x64xf32>
    %437 = arith.addf %433, %436 : vector<8x64xf32>
    %cst_259 = arith.constant 0.000000e+00 : f32
    %438 = vector.broadcast %cst_259 : f32 to vector<8x64xf32>
    %439 = arith.maximumf %437, %438 : vector<8x64xf32>
    %c1_260 = arith.constant 1 : index
    %c0_261 = arith.constant 0 : index
    %c0_262 = arith.constant 0 : index
    %440 = vector.load %arg10[%c1_260, %c0_261, %c0_262] : memref<2x64x32xf32, #tpu.memory_space<vmem>>, vector<1x64x32xf32>
    %441 = vector.shape_cast %440 : vector<1x64x32xf32> to vector<64x32xf32>
    %cst_263 = arith.constant dense<0.000000e+00> : vector<8x32xf32>
    %442 = tpu.matmul %439, %441, %cst_263 {dimension_numbers = #tpu.dot_dimension_numbers<[1], [0], [0], [1], [0, 0, 1, 1], [], []>} : vector<8x64xf32>, vector<64x32xf32>, vector<8x32xf32> -> vector<8x32xf32>
    %443 = vector.broadcast %244 : vector<1x32xf32> to vector<8x32xf32>
    %444 = arith.addf %442, %443 : vector<8x32xf32>
    %445 = arith.addf %430, %444 : vector<8x32xf32>
    %cst_264 = arith.constant dense<0.000000e+00> : vector<8xf32>
    %446 = vector.multi_reduction <add>, %445, %cst_264 [1] : vector<8x32xf32> to vector<8xf32>
    %447 = vector.shape_cast %446 : vector<8xf32> to vector<8x1xf32>
    %cst_265 = arith.constant 3.200000e+01 : f32
    %448 = vector.broadcast %cst_265 : f32 to vector<8x1xf32>
    %449 = arith.divf %447, %448 : vector<8x1xf32>
    %450 = vector.broadcast %449 : vector<8x1xf32> to vector<8x32xf32>
    %451 = arith.subf %445, %450 : vector<8x32xf32>
    %452 = arith.mulf %451, %451 : vector<8x32xf32>
    %cst_266 = arith.constant dense<0.000000e+00> : vector<8xf32>
    %453 = vector.multi_reduction <add>, %452, %cst_266 [1] : vector<8x32xf32> to vector<8xf32>
    %454 = vector.shape_cast %453 : vector<8xf32> to vector<8x1xf32>
    %cst_267 = arith.constant 3.200000e+01 : f32
    %455 = vector.broadcast %cst_267 : f32 to vector<8x1xf32>
    %456 = arith.divf %454, %455 : vector<8x1xf32>
    %cst_268 = arith.constant 9.99999974E-6 : f32
    %457 = vector.broadcast %cst_268 : f32 to vector<8x1xf32>
    %458 = arith.addf %456, %457 : vector<8x1xf32>
    %459 = math.rsqrt %458 : vector<8x1xf32>
    %460 = vector.broadcast %459 : vector<8x1xf32> to vector<8x32xf32>
    %461 = arith.mulf %451, %460 : vector<8x32xf32>
    %462 = vector.broadcast %245 : vector<1x32xf32> to vector<8x32xf32>
    %463 = arith.mulf %461, %462 : vector<8x32xf32>
    %464 = vector.broadcast %246 : vector<1x32xf32> to vector<8x32xf32>
    %465 = arith.addf %463, %464 : vector<8x32xf32>
    %466 = vector.shape_cast %465 : vector<8x32xf32> to vector<1x8x32xf32>
    %c0_269 = arith.constant 0 : index
    %c0_270 = arith.constant 0 : index
    %467 = vector.load %arg12[%c0_269, %c0_270] : memref<1x32xf32, #tpu.memory_space<vmem>>, vector<1x32xf32>
    %468 = vector.shape_cast %467 : vector<1x32xf32> to vector<1x1x32xf32>
    %469 = vector.broadcast %468 : vector<1x1x32xf32> to vector<1x8x32xf32>
    %470 = arith.mulf %466, %469 : vector<1x8x32xf32>
    %cst_271 = arith.constant dense<0.000000e+00> : vector<1x8xf32>
    %471 = vector.multi_reduction <add>, %470, %cst_271 [2] : vector<1x8x32xf32> to vector<1x8xf32>
    %c0_272 = arith.constant 0 : index
    %c0_273 = arith.constant 0 : index
    %472 = vector.load %arg13[%c0_272, %c0_273] : memref<1x1xf32, #tpu.memory_space<vmem>>, vector<1x1xf32>
    %473 = vector.broadcast %472 : vector<1x1xf32> to vector<1x8xf32>
    %474 = arith.addf %471, %473 : vector<1x8xf32>
    %475 = arith.negf %474 : vector<1x8xf32>
    %476 = math.exp %475 : vector<1x8xf32>
    %cst_274 = arith.constant 1.000000e+00 : f32
    %477 = vector.broadcast %cst_274 : f32 to vector<1x8xf32>
    %478 = arith.addf %477, %476 : vector<1x8xf32>
    %479 = arith.divf %477, %478 : vector<1x8xf32>
    %480 = vector.shape_cast %479 : vector<1x8xf32> to vector<1x1x8xf32>
    %c0_275 = arith.constant 0 : index
    %c0_276 = arith.constant 0 : index
    %c0_277 = arith.constant 0 : index
    %481 = vector.load %arg14[%c0_275, %c0_276, %c0_277] : memref<1x1x8xf32, #tpu.memory_space<vmem>>, vector<1x1x8xf32>
    tpu.vector_store %arg14[%c0_275, %c0_276, %c0_277], %480 {strides = array<i32>} : memref<1x1x8xf32, #tpu.memory_space<vmem>>, vector<1x1x8xf32>,
    return
  }
  func.func @transform_0(%arg0: i32) -> (i32, i32, i32) {
    %c0_i32 = arith.constant 0 : i32
    %c0_i32_0 = arith.constant 0 : i32
    %c0_i32_1 = arith.constant 0 : i32
    return %arg0, %c0_i32, %c0_i32_0 : i32, i32, i32
  }
  func.func @transform_1(%arg0: i32) -> (i32, i32) {
    %c0_i32 = arith.constant 0 : i32
    %c0_i32_0 = arith.constant 0 : i32
    %c0_i32_1 = arith.constant 0 : i32
    return %c0_i32, %c0_i32_0 : i32, i32
  }
  func.func @transform_2(%arg0: i32) -> (i32, i32) {
    %c0_i32 = arith.constant 0 : i32
    %c0_i32_0 = arith.constant 0 : i32
    %c0_i32_1 = arith.constant 0 : i32
    return %c0_i32, %c0_i32_0 : i32, i32
  }
  func.func @transform_3(%arg0: i32) -> (i32, i32) {
    %c0_i32 = arith.constant 0 : i32
    %c0_i32_0 = arith.constant 0 : i32
    %c0_i32_1 = arith.constant 0 : i32
    return %c0_i32, %c0_i32_0 : i32, i32
  }
  func.func @transform_4(%arg0: i32) -> (i32, i32, i32) {
    %c0_i32 = arith.constant 0 : i32
    %c0_i32_0 = arith.constant 0 : i32
    %c0_i32_1 = arith.constant 0 : i32
    %c0_i32_2 = arith.constant 0 : i32
    return %c0_i32, %c0_i32_0, %c0_i32_1 : i32, i32, i32
  }
  func.func @transform_5(%arg0: i32) -> (i32, i32, i32) {
    %c0_i32 = arith.constant 0 : i32
    %c0_i32_0 = arith.constant 0 : i32
    %c0_i32_1 = arith.constant 0 : i32
    %c0_i32_2 = arith.constant 0 : i32
    return %c0_i32, %c0_i32_0, %c0_i32_1 : i32, i32, i32
  }
  func.func @transform_6(%arg0: i32) -> (i32, i32, i32) {
    %c0_i32 = arith.constant 0 : i32
    %c0_i32_0 = arith.constant 0 : i32
    %c0_i32_1 = arith.constant 0 : i32
    %c0_i32_2 = arith.constant 0 : i32
    return %c0_i32, %c0_i32_0, %c0_i32_1 : i32, i32, i32
  }
  func.func @transform_7(%arg0: i32) -> (i32, i32, i32) {
    %c0_i32 = arith.constant 0 : i32
    %c0_i32_0 = arith.constant 0 : i32
    %c0_i32_1 = arith.constant 0 : i32
    %c0_i32_2 = arith.constant 0 : i32
    return %c0_i32, %c0_i32_0, %c0_i32_1 : i32, i32, i32
  }
  func.func @transform_8(%arg0: i32) -> (i32, i32, i32) {
    %c0_i32 = arith.constant 0 : i32
    %c0_i32_0 = arith.constant 0 : i32
    %c0_i32_1 = arith.constant 0 : i32
    %c0_i32_2 = arith.constant 0 : i32
    return %c0_i32, %c0_i32_0, %c0_i32_1 : i32, i32, i32
  }
  func.func @transform_9(%arg0: i32) -> (i32, i32, i32) {
    %c0_i32 = arith.constant 0 : i32
    %c0_i32_0 = arith.constant 0 : i32
    %c0_i32_1 = arith.constant 0 : i32
    %c0_i32_2 = arith.constant 0 : i32
    return %c0_i32, %c0_i32_0, %c0_i32_1 : i32, i32, i32
  }
  func.func @transform_10(%arg0: i32) -> (i32, i32, i32) {
    %c0_i32 = arith.constant 0 : i32
    %c0_i32_0 = arith.constant 0 : i32
    %c0_i32_1 = arith.constant 0 : i32
    %c0_i32_2 = arith.constant 0 : i32
    return %c0_i32, %c0_i32_0, %c0_i32_1 : i32, i32, i32
  }
  func.func @transform_11(%arg0: i32) -> (i32, i32) {
    %c0_i32 = arith.constant 0 : i32
    %c0_i32_0 = arith.constant 0 : i32
    %c0_i32_1 = arith.constant 0 : i32
    return %c0_i32, %c0_i32_0 : i32, i32
  }
  func.func @transform_12(%arg0: i32) -> (i32, i32) {
    %c0_i32 = arith.constant 0 : i32
    %c0_i32_0 = arith.constant 0 : i32
    %c0_i32_1 = arith.constant 0 : i32
    return %c0_i32, %c0_i32_0 : i32, i32
  }
  func.func @transform_13(%arg0: i32) -> (i32, i32, i32) {
    %c0_i32 = arith.constant 0 : i32
    %c0_i32_0 = arith.constant 0 : i32
    %c0_i32_1 = arith.constant 0 : i32
    return %arg0, %c0_i32, %c0_i32_0 : i32, i32, i32
  }
}

</mosaic_0001>

<bundles_post_ra>
// kernel: time_series_transformer_forward.1
= control target key start
LH: loop header
LB: loop body
LE: loop exit
PB: predicated region body
PF: predicated region fallthrough
CT: control target
= control target key end

     0   :  { %s7209_s0 = inlined_call_operand.vmem [shape: f32[2,8,16], index: 0, kind: input, shape index: {}]   ;;  %s7210_s1 = inlined_call_operand.vmem [shape: f32[16,32], index: 1, kind: input, shape index: {}]   ;;  %s7211_s2 = inlined_call_operand.vmem [shape: f32[1,32], index: 2, kind: input, shape index: {}]   ;;  %s7212_s3 = inlined_call_operand.vmem [shape: f32[8,32], index: 3, kind: input, shape index: {}]   ;;  %s7213_s4 = inlined_call_operand.vmem [shape: f32[24,32,8], index: 4, kind: input, shape index: {}]   ;;  %s7214_s5 = inlined_call_operand.vmem [shape: f32[24,1,8], index: 5, kind: input, shape index: {}]   ;;  %s7215_s6 = inlined_call_operand.vmem [shape: f32[8,8,32], index: 6, kind: input, shape index: {}]   ;;  %s7216_s7 = inlined_call_operand.vmem [shape: f32[2,32,64], index: 7, kind: input, shape index: {}]   ;;  %s7217_s8 = inlined_call_operand.vmem [shape: f32[2,1,64], index: 8, kind: input, shape index: {}]   ;;  %s7218_s9 = inlined_call_operand.vmem [shape: f32[2,64,32], index: 9, kind: input, shape index: {}]   ;;  %s7219_s10 = inlined_call_operand.vmem [shape: f32[2,6,32], index: 10, kind: input, shape index: {}]   ;;  %s7220_s11 = inlined_call_operand.vmem [shape: f32[1,32], index: 11, kind: input, shape index: {}]   ;;  %s7221_s12 = inlined_call_operand.<no memory space> [shape: f32[1,1], index: 12, kind: input, shape index: {}]   ;;  %s7222_s13 = inlined_call_operand.hbm [shape: f32[2,1,8], index: 13, kind: output, shape index: {}]  }
   0x1   :  { %7223 = sst [smem:[#allocation6_spill]] %s7209_s0  ;;  %v18_v0 = vstv %s7221_s12 }
   0x2   :  { %7224 = sst [smem:[#allocation7_spill]] %s7210_s1  ;;  %19 = vst [vmem:[#allocation2] sm:$0x1] %v18_v0 }
   0x3   :  { %20 = vsyncpa [#allocation4], 0 }
   0x4   :  { %22 = vsyncpa [#allocation4 + $0x1], 0  ;;  %s6262_s27 = smov 0   ;;  %s6264_s28 = smov 0  }
   0x5   :  { %s6266_s29 = smov 0   ;;  %s6268_s30 = smov 0  }
   0x6 LB: > { %s6283_s12 = sadd.s32 4294967295, %s6182_s30   ;;  %s4964_s14 = sadd.s32 4294967294, %s6182_s30   ;;  %s6182_s30 = sphi %s6268_s30, %s7232_s30   ;;  %s6178_s29 = sphi %s6266_s29, %s7231_s29   ;;  %s6174_s28 = sphi %s6264_s28, %s7230_s28   ;;  %s6170_s27 = sphi %s6262_s27, %s7229_s27  }
   0x7   : > { %s6287_s15 = sadd.s32 1, %s6182_s30   ;;  %s313_s16 = sadd.s32 1, %s6178_s29 }
   0x8   : > { %s310_s17 = ssub.s32 %s6182_s30, %s6287_s15  ;;  %p323_p0 = scmp.ne.s32.totalorder %s6178_s29, %s6174_s28 }
   0x9   : > { %p311_p1 = scmp.eq.s32.totalorder %s310_s17, 0  ;;  %p324_p2 = scmp.eq.s32.totalorder %s6283_s12, 1 }
   0xa   : > { %p329_p3 = scmp.ne.s32.totalorder %s6174_s28, %s6170_s27  ;;  %p330_p4 = scmp.eq.s32.totalorder %s4964_s14, 1 }
   0xb   : > { %s6298_s18 = scalar_select %p311_p1, %s6178_s29, %s313_s16  }
   0xc   : > { %p6300_p5 = por %p324_p2, %p323_p0  ;;  %p6304_p6 = por %p330_p4, %p329_p3 }
   0xd   : > { %p4967_p7 = scmp.ge.s32.totalorder %s6182_s30, 1  ;;  %p391_p8 = scmp.lt.s32.totalorder %s6182_s30, 3 }
   0xf   : > { %p392_p9 = pnand %p4967_p7, %p391_p8 }
  0x10   : > { %s7227_s1 = sld [smem:[#allocation7_spill]] (!%p392_p9)  ;;  %p433_p10 = scmp.lt.s32.totalorder (!%p392_p9), %s6283_s12, 1  ;;  %v6184_v3 = vmov (!%p392_p9), 0.0|0.0   ;;  %vm6185_vm0 = vmmov (!%p392_p9), 0   ;;  %v6186_v5 = vmov (!%p392_p9), 0.0   ;;  %v524_v6 = vld [vmem:[%s7213_s4] sm:$0xff] (!%p392_p9) }
  0x11   : > { %395 = sbr.rel (%p392_p9) target bundleno = 10252 (0x280c), region = 72  ;;  %5848 = vmatprep.subr.bf16.mxu1 (!%p392_p9), %v6184_v3  ;;  %5401 = vmatprep.mubr.msk.f32.mxu1 (!%p392_p9), %vm6185_vm0, %v6186_v5  ;;  %v525_v7 = vld [vmem:[%s7213_s4 + $0x8] sm:$0xff] (!%p392_p9)  ;;  %v4973_v8 = vld [vmem:[%s7213_s4 + $0x20] sm:$0xff] (!%p392_p9)  ;;  %vm447_vm1 = vcmask (!%p392_p9), 130048   ;;  %s7228_s0 = sld [smem:[#allocation6_spill]] (!%p392_p9)  ;;  %v526_v13 = vld [vmem:[%s7213_s4 + $0x10] sm:$0xff] (!%p392_p9) }
  0x12   : > { %5857 = vmatprep.subr.bf16.mxu0 (!%p392_p9), %v6184_v3  ;;  %v4974_v9 = vld [vmem:[%s7213_s4 + $0x28] sm:$0xff] (!%p392_p9)  ;;  %5423 = vmatprep.mubr.msk.f32.mxu0 (!%p392_p9), %vm6185_vm0, %v6186_v5  ;;  %v5852_v11 = vpack.c.bf16 (!%p392_p9), %v525_v7, %v524_v6  ;;  %v527_v14 = vld [vmem:[%s7213_s4 + $0x18] sm:$0xff] (!%p392_p9)  ;;  %v4975_v16 = vld [vmem:[%s7213_s4 + $0x30] sm:$0xff] (!%p392_p9)  ;;  %vm535_vm2 = vcmask (!%p392_p9), 261120   ;;  %vm775_vm3 = vcmask (!%p392_p9), 64512   ;;  %vm2591_vm4 = vcmask (!%p392_p9), 523264  }
  0x13   : > { %v5858_v10 = vpack.c.bf16 (!%p392_p9), %v4974_v9, %v4973_v8  ;;  %v5855_v15 = vpack.c.bf16 (!%p392_p9), %v527_v14, %v526_v13  ;;  %v4976_v17 = vld [vmem:[%s7213_s4 + $0x38] sm:$0xff] (!%p392_p9)  ;;  %v4969_v19 = vld [vmem:[%s7211_s2] ss:$0 sm:$0xff] (!%p392_p9)  ;;  %v4981_v21 = vld [vmem:[%s7213_s4 + $0x48] sm:$0xff] (!%p392_p9)  ;;  %s431_s24 = sand.u32 (!%p392_p9), 1, %s6174_s28   ;;  %vm4894_vm5 = vcmask (!%p392_p9), 57344  }
  0x14   : > { %v5861_v18 = vpack.c.bf16 (!%p392_p9), %v4976_v17, %v4975_v16  ;;  %v4980_v20 = vld [vmem:[%s7213_s4 + $0x40] sm:$0xff] (!%p392_p9)  ;;  %v4982_v28 = vld [vmem:[%s7213_s4 + $0x50] sm:$0xff] (!%p392_p9)  ;;  %v4983_v29 = vld [vmem:[%s7213_s4 + $0x58] sm:$0xff] (!%p392_p9)  ;;  %s432_s26 = scalar_lea.vmem (!%p392_p9), [#allocation3], %s431_s24  ;;  %s4897_s21 = scalar_lea.sflag (!%p392_p9), [#allocation4], %s431_s24 }
  0x15   : > { %5859 = vmatpush3.bf16.msra.mxu0 (!%p392_p9), %v5858_v10  ;;  %v521_v23 = vld [vmem:[%s7212_s3] sm:$0xff] (!%p392_p9)  ;;  %v5864_v26 = vpack.c.bf16 (!%p392_p9), %v4981_v21, %v4980_v20  ;;  %v5867_v30 = vpack.c.bf16 (!%p392_p9), %v4983_v29, %v4982_v28  ;;  %v4991_v32 = vld [vmem:[%s7213_s4 + $0x68] sm:$0xff] (!%p392_p9)  ;;  %v4992_v34 = vld [vmem:[%s7213_s4 + $0x70] sm:$0xff] (!%p392_p9)  ;;  %s4909_s14 = sshll.u32 (!%p392_p9), %s432_s26, 4  ;;  %s7169_s14 = int_to_ptr.vmem [resolvable:$true] %s4909_s14 }
  0x16   : > { %v438_v1 = vld [vmem:[%s7227_s1] sm:$0xff] (!%p392_p9)  ;;  %v439_v2 = vld [vmem:[%s7227_s1 + $0x8] sm:$0xff] (!%p392_p9)  ;;  %5860 = vmatprep.subr.bf16.mxu0 (!%p392_p9), %v6184_v3  ;;  %v4993_v35 = vld [vmem:[%s7213_s4 + $0x78] sm:$0xff] (!%p392_p9) }
  0x17   : > { %v5849_v4 = vpack.c.bf16 (!%p392_p9), %v439_v2, %v438_v1  ;;  %v4990_v31 = vld [vmem:[%s7213_s4 + $0x60] sm:$0xff] (!%p392_p9)  ;;  %v5873_v36 = vpack.c.bf16 (!%p392_p9), %v4993_v35, %v4992_v34  ;;  %v5005_v38 = vld [vmem:[%s7213_s4 + $0xa8] sm:$0xff] (!%p392_p9)  ;;  %v5006_v40 = vld [vmem:[%s7213_s4 + $0xb0] sm:$0xff] (!%p392_p9) }
  0x18   : > { %s434_s22 = scalar_select %p433_p10, %s6283_s12, 1  ;;  %v5870_v33 = vpack.c.bf16 %v4991_v32, %v4990_v31  ;;  %v5004_v37 = vld [vmem:[%s7213_s4 + $0xa0] sm:$0xff]  ;;  %v5007_v41 = vld [vmem:[%s7213_s4 + $0xb8] sm:$0xff]  ;;  %v4998_v7 = vld [vmem:[%s7213_s4 + $0x88] sm:$0xff] }
  0x19   : > { %5850 = vmatpush3.bf16.msra.mxu1 %v5849_v4  ;;  %5862 = vmatpush3.bf16.msra.mxu0 %v5861_v18  ;;  %v5882_v39 = vpack.c.bf16 %v5005_v38, %v5004_v37  ;;  %v5885_v42 = vpack.c.bf16 %v5007_v41, %v5006_v40  ;;  %v4978_v43 = vld [vmem:[%s7214_s5 + $0x1] ss:$0 sm:$0xff]  ;;  %v4971_v46 = vld [vmem:[%s7214_s5] ss:$0 sm:$0xff]  ;;  %v4985_v51 = vld [vmem:[%s7214_s5 + $0x2] ss:$0 sm:$0xff] }
  0x1a   : > { %s4968_s25 = sshll.u32 %s434_s22, 3  ;;  %5851 = vmatprep.subr.bf16.mxu1 %v6184_v3  ;;  %5437 = vmatprep.subr.mxu0 %v6186_v5  ;;  %v4997_v6 = vld [vmem:[%s7213_s4 + $0x80] sm:$0xff]  ;;  %v5026_v41 = vld [vmem:[%s7213_s4 + $0xf0] sm:$0xff]  ;;  %s6120_s22 = scalar_lea.vmem %s7169_s14, 16 }
  0x1b   : > { %s436_s16 = scalar_lea.vmem %s7228_s0, %s4968_s25  ;;  %v5876_v9 = vpack.c.bf16 %v4998_v7, %v4997_v6  ;;  %v5002_v16 = vld [vmem:[%s7214_s5 + $0x4] ss:$0 sm:$0xff]  ;;  %v4995_v18 = vld [vmem:[%s7214_s5 + $0x3] ss:$0 sm:$0xff]  ;;  %v5009_v21 = vld [vmem:[%s7214_s5 + $0x5] ss:$0 sm:$0xff]  ;;  %p6121_p11 = scmp.ne.s32.totalorder %s7169_s14, %s6120_s22 }
  0x1c   : > { %v437_v12 = vld [vmem:[%s436_s16] sm:$0xff]  ;;  %s5195_s25 = sshll.u32 %s6283_s12, 4  ;;  %s6188_s12 = smov [#allocation3]  }
  0x1d   : > { %5402 = vmatmul.mubr.msk.f32.vlgmr.msra.gmra.mrb[0].mxu1 %vm447_vm1, %v437_v12  ;;  %v5000_v12 = vld [vmem:[%s7213_s4 + $0x98] sm:$0xff]  ;;  %v936_v37 = vld [vmem:[%s7215_s6] sm:$0xff]  ;;  %s7167_s0 = scalar_lea.hbm %s7222_s13, %s5195_s25  ;;  %p6122_p12 = pnand %p6121_p11, %p6300_p5 }
  0x1e   : > { %5853 = vmatpush3.bf16.msra.mxu1 %v5852_v11  ;;  %5412 = vmatprep.mubr.msk.f32.mxu1 %vm6185_vm0, %v6186_v5  ;;  %v4999_v11 = vld [vmem:[%s7213_s4 + $0x90] sm:$0xff]  ;;  %v5024_v38 = vld [vmem:[%s7213_s4 + $0xe0] sm:$0xff]  ;;  %s6124_s23 = sshll.u32 %s6188_s12, 4  ;;  %s6125_s23 = int_to_ptr.vmem [resolvable:$false] %s6124_s23 }
  0x1f   : > { %5854 = vmatprep.subr.bf16.mxu1 %v6184_v3  ;;  %v5879_v13 = vpack.c.bf16 %v5000_v12, %v4999_v11  ;;  %p6123_p13 = pneg %p6122_p12  ;;  %s6126_s1 = scalar_lea.vmem %s6125_s23, 32 }
  0x20   : > { %p6127_p0 = scmp.lt.s32.totalorder %s7169_s14, %s6125_s23  ;;  %p6128_p1 = scmp.lt.s32.totalorder %s6126_s1, %s6120_s22 }
  0x22   : > { %5856 = vmatpush3.bf16.msra.mxu1 %v5855_v15  ;;  %p6129_p2 = por %p6128_p1, %p6127_p0 }
  0x23   : > { %5863 = vmatprep.subr.bf16.mxu1 %v6184_v3 }
  0x24   : > { %p6130_p3 = pnand %p6129_p2, %p6123_p13 }
  0xf0   : > { %v517_v22 = vpop.f32.mrb[0].mxu1 }
  0xf1   : > { %v518_v24 = vadd.f32 %v4969_v19, %v517_v22  ;;  %v5403_v25 = vpop.f32.mrb[1].mxu1 }
  0xf3   : > { %v6370_v27 = vadd.f32 %v521_v23, %v518_v24 }
  0xf5   : > { %5413 = vmatmul.mubr.msk.f32.vlgmr.msra.gmra.mrb[2].mxu1 %vm535_vm2, %v6370_v27  ;;  %5424 = vmatmul.mubr.msk.f32.vlgmr.msra.gmra.mrb[0].mxu0 %vm535_vm2, %v6370_v27 }
  0xf6   : > { %5865 = vmatpush3.bf16.msra.mxu1 %v5864_v26  ;;  %5434 = vmatprep.mubr.msk.f32.mxu1 %vm6185_vm0, %v6186_v5 }
  0xf7   : > { %5866 = vmatprep.subr.bf16.mxu1 %v6184_v3  ;;  %5439 = vmatprep.mubr.msk.f32.mxu0 %vm6185_vm0, %v6186_v5 }
  0xfa   : > { %5868 = vmatpush3.bf16.msra.mxu1 %v5867_v30 }
  0xfb   : > { %5869 = vmatprep.subr.bf16.mxu1 %v6184_v3 }
  0xfd   : > { %5435 = vmatmul.mubr.msk.f32.vlgmr.msra.gmra.mrb[4].mxu1 %vm535_vm2, %v6370_v27 }
  0xfe   : > { %5871 = vmatpush3.bf16.msra.mxu1 %v5870_v33  ;;  %5455 = vmatprep.mubr.msk.f32.mxu1 %vm6185_vm0, %v6186_v5  ;;  %v5014_v33 = vld [vmem:[%s7215_s6 + $0x8] sm:$0xff] }
  0xff   : > { %5872 = vmatprep.subr.bf16.mxu1 %v6184_v3 }
 0x102   : > { %5874 = vmatpush3.bf16.msra.mxu1 %v5873_v36 }
 0x103   : > { %5881 = vmatprep.subr.bf16.mxu1 %v6184_v3 }
 0x105   : > { %5456 = vmatmul.mubr.msk.f32.vlgmr.msra.gmra.mrb[6].mxu1 %vm535_vm2, %v6370_v27 }
 0x106   : > { %5883 = vmatpush3.bf16.msra.mxu1 %v5882_v39  ;;  %5477 = vmatprep.mubr.msk.f32.mxu1 %vm6185_vm0, %v6186_v5  ;;  %v5025_v39 = vld [vmem:[%s7213_s4 + $0xe8] sm:$0xff] }
 0x107   : > { %5884 = vmatprep.subr.bf16.mxu1 %v6184_v3  ;;  %v5894_v40 = vpack.c.bf16 %v5025_v39, %v5024_v38  ;;  %v5050_v38 = vld [vmem:[%s7213_s4 + $0x140] sm:$0xff]  ;;  %v5051_v39 = vld [vmem:[%s7213_s4 + $0x148] sm:$0xff] }
 0x10a   : > { %5886 = vmatpush3.bf16.msra.mxu1 %v5885_v42  ;;  %v5027_v42 = vld [vmem:[%s7213_s4 + $0xf8] sm:$0xff] }
 0x10b   : > { %5490 = vmatprep.subr.mxu1 %v6186_v5 }
 0x10d   : > { %5478 = vmatmul.mubr.msk.f32.vlgmr.msra.gmra.mrb[8].mxu1 %vm535_vm2, %v6370_v27 }
 0x10e   : > { %5492 = vmatprep.mubr.msk.f32.mxu1 %vm6185_vm0, %v6186_v5  ;;  %5491 = vmatpush3.msra.mxu1 %v5014_v33  ;;  %v5058_v33 = vld [vmem:[%s7213_s4 + $0x168] sm:$0xff] }
 0x10f   : > { %5887 = vmatprep.subr.bf16.mxu1 %v6184_v3 }
 0x1c8   : > { %v605_v44 = vpop.f32.mrb[2].mxu1  ;;  %v688_v45 = vpop.f32.mrb[0].mxu0 }
 0x1c9   : > { %v689_v47 = vadd.f32 %v4978_v43, %v688_v45  ;;  %v5414_v48 = vpop.f32.mrb[3].mxu1  ;;  %v5425_v49 = vpop.f32.mrb[1].mxu0  ;;  %v606_v50 = vadd.f32 %v4971_v46, %v605_v44  ;;  %v5897_v43 = vpack.c.bf16 %v5027_v42, %v5026_v41  ;;  %v5017_v44 = vld [vmem:[%s7213_s4 + $0xc0] sm:$0xff]  ;;  %v5018_v45 = vld [vmem:[%s7213_s4 + $0xc8] sm:$0xff]  ;;  %v5052_v41 = vld [vmem:[%s7213_s4 + $0x150] sm:$0xff] }
 0x1ca   : > { %v5888_v46 = vpack.c.bf16 %v5018_v45, %v5017_v44  ;;  %v5020_v48 = vld [vmem:[%s7213_s4 + $0xd8] sm:$0xff] }
 0x1cb   : > { %5438 = vmatpush3.xpose.msk.msra.mxu0 %vm775_vm3, %v689_v47  ;;  %v5019_v47 = vld [vmem:[%s7213_s4 + $0xd0] sm:$0xff]  ;;  %v5053_v42 = vld [vmem:[%s7213_s4 + $0x158] sm:$0xff] }
 0x1cc   : > { %5442 = vmatprep.subr.mxu0 %v6186_v5  ;;  %v5915_v45 = vpack.c.bf16 %v5053_v42, %v5052_v41  ;;  %v2583_v41 = vld [vmem:[%s7218_s9 + $0x20] sm:$0xff]  ;;  %v2584_v42 = vld [vmem:[%s7218_s9 + $0x28] sm:$0xff] }
 0x1ce   : > { %5440 = vmatmul.mubr.msk.f32.vlgmr.msra.gmra.mrb[2].mxu0 %vm775_vm3, %v606_v50 }
 0x1cf   : > { %5444 = vmatprep.mubr.msk.f32.mxu0 %vm6185_vm0, %v6186_v5 }
 0x1d0   : > { %v771_v52 = vpop.f32.mrb[4].mxu1 }
 0x1d1   : > { %v772_v53 = vadd.f32 %v4985_v51, %v771_v52  ;;  %v5436_v54 = vpop.f32.mrb[5].mxu1  ;;  %v5891_v51 = vpack.c.bf16 %v5020_v48, %v5019_v47  ;;  %v5031_v52 = vld [vmem:[%s7213_s4 + $0x100] sm:$0xff] }
 0x1d3   : > { %5443 = vmatpush3.msra.mxu0 %v772_v53  ;;  %v5032_v53 = vld [vmem:[%s7213_s4 + $0x108] sm:$0xff] }
 0x1d4   : > { %5875 = vmatprep.subr.bf16.mxu0 %v6184_v3 }
 0x1d8   : > { %v1016_v55 = vpop.f32.mrb[6].mxu1 }
 0x1d9   : > { %v5457_v56 = vpop.f32.mrb[7].mxu1  ;;  %v1017_v22 = vadd.f32 %v4995_v18, %v1016_v55 }
 0x1da   : > { %v5900_v56 = vpack.c.bf16 %v5032_v53, %v5031_v52  ;;  %v5055_v53 = vld [vmem:[%s7214_s5 + $0xa] ss:$0 sm:$0xff] }
 0x1e0   : > { %v1182_v57 = vpop.f32.mrb[8].mxu1 }
 0x1e1   : > { %v5479_v58 = vpop.f32.mrb[9].mxu1  ;;  %v1183_v23 = vadd.f32 %v5009_v21, %v1182_v57  ;;  %v5033_v57 = vld [vmem:[%s7213_s4 + $0x110] sm:$0xff] }
 0x1e2   : > { %v5034_v58 = vld [vmem:[%s7213_s4 + $0x118] sm:$0xff]  ;;  %v5041_v21 = vld [vmem:[%s7215_s6 + $0x10] sm:$0xff] }
 0x2a1   : > { %v848_v59 = vpop.f32.mrb[2].mxu0 }
 0x2a2   : > { %v5441_v60 = vpop.f32.mrb[3].mxu0  ;;  %v852_v61 = vsel %vm775_vm3, %v848_v59, -inf }
 0x2a3   : > { %853 = vmax.xlane.f32.xlu0 %v852_v61  ;;  %v5903_v60 = vpack.c.bf16 %v5034_v58, %v5033_v57  ;;  %v5062_v58 = vld [vmem:[%s7214_s5 + $0xb] ss:$0 sm:$0xff] }
 0x330   : > { %v854_v62 = vpop.xlane.xlu0 %853 }
 0x331   : > { %v855_v63 = vsub.f32 %v848_v59, %v854_v62  ;;  %v5029_v59 = vld [vmem:[%s7214_s5 + $0x7] ss:$0 sm:$0xff] }
 0x333   : > { %v856_v0 = vmul.f32 1.442695, %v855_v63 }
 0x335   : > { %6076 = vpow2.f32 %v856_v0 }
 0x33f   : > { %v6077_v1 = vpop.eup %6076 }
 0x340   : > { %v858_v2 = vsel %vm775_vm3, %v6077_v1, 0.0 }
 0x341   : > { %859 = vadd.xlane.f32.xlu0 %v858_v2 }
 0x3ce   : > { %v860_v4 = vpop.xlane.xlu0 %859 }
 0x3cf   : > { %6078 = vrcp.f32 %v860_v4  ;;  %v5022_v4 = vld [vmem:[%s7214_s5 + $0x6] ss:$0 sm:$0xff] }
 0x3d9   : > { %v6079_v8 = vpop.eup %6078 }
 0x3da   : > { %v862_v10 = vmul.f32 %v6079_v8, %v6077_v1 }
 0x3dc   : > { %5445 = vmatmul.mubr.msk.f32.vlgmr.msra.gmra.mrb[4].mxu0 %vm775_vm3, %v862_v10 }
 0x3dd   : > { %5877 = vmatpush3.bf16.msra.mxu0 %v5876_v9  ;;  %5466 = vmatprep.mubr.msk.f32.mxu0 %vm6185_vm0, %v6186_v5  ;;  %v5036_v9 = vld [vmem:[%s7214_s5 + $0x8] ss:$0 sm:$0xff] }
 0x3de   : > { %5878 = vmatprep.subr.bf16.mxu0 %v6184_v3 }
 0x3e1   : > { %5880 = vmatpush3.bf16.msra.mxu0 %v5879_v13 }
 0x3e2   : > { %5480 = vmatprep.subr.mxu0 %v6186_v5 }
 0x3e4   : > { %5467 = vmatmul.mubr.msk.f32.vlgmr.msra.gmra.mrb[6].mxu0 %vm535_vm2, %v6370_v27 }
 0x3e5   : > { %5482 = vmatprep.mubr.msk.f32.mxu0 %vm6185_vm0, %v6186_v5 }
 0x4af   : > { %v932_v14 = vpop.f32.mrb[4].mxu0 }
 0x4b0   : > { %v5446_v15 = vpop.f32.mrb[5].mxu0 }
 0x4b7   : > { %v1099_v17 = vpop.f32.mrb[6].mxu0 }
 0x4b8   : > { %v1100_v19 = vadd.f32 %v5002_v16, %v1099_v17  ;;  %v5468_v20 = vpop.f32.mrb[7].mxu0 }
 0x4ba   : > { %5481 = vmatpush3.xpose.msk.msra.mxu0 %vm775_vm3, %v1100_v19 }
 0x4bb   : > { %5485 = vmatprep.subr.mxu0 %v6186_v5 }
 0x4bd   : > { %5483 = vmatmul.mubr.msk.f32.vlgmr.msra.gmra.mrb[8].mxu0 %vm775_vm3, %v1017_v22 }
 0x4be   : > { %5486 = vmatpush3.msra.mxu0 %v1183_v23  ;;  %5487 = vmatprep.mubr.msk.f32.mxu0 %vm6185_vm0, %v6186_v5  ;;  %v5043_v23 = vld [vmem:[%s7213_s4 + $0x120] sm:$0xff] }
 0x4bf   : > { %5495 = vmatprep.subr.mxu0 %v6186_v5 }
 0x590   : > { %v1258_v24 = vpop.f32.mrb[8].mxu0 }
 0x591   : > { %v5484_v25 = vpop.f32.mrb[9].mxu0  ;;  %v1262_v26 = vsel %vm775_vm3, %v1258_v24, -inf }
 0x592   : > { %1263 = vmax.xlane.f32.xlu1 %v1262_v26 }
 0x61f   : > { %v1264_v28 = vpop.xlane.xlu1 %1263 }
 0x620   : > { %v1265_v29 = vsub.f32 %v1258_v24, %v1264_v28  ;;  %v5044_v24 = vld [vmem:[%s7213_s4 + $0x128] sm:$0xff] }
 0x621   : > { %v5906_v26 = vpack.c.bf16 %v5044_v24, %v5043_v23 }
 0x622   : > { %v1266_v30 = vmul.f32 1.442695, %v1265_v29  ;;  %v5045_v29 = vld [vmem:[%s7213_s4 + $0x130] sm:$0xff] }
 0x624   : > { %6080 = vpow2.f32 %v1266_v30  ;;  %v5046_v30 = vld [vmem:[%s7213_s4 + $0x138] sm:$0xff] }
 0x62e   : > { %v6081_v31 = vpop.eup %6080 }
 0x62f   : > { %v1268_v32 = vsel %vm775_vm3, %v6081_v31, 0.0 }
 0x630   : > { %1269 = vadd.xlane.f32.xlu1 %v1268_v32  ;;  %v5057_v32 = vld [vmem:[%s7213_s4 + $0x160] sm:$0xff] }
 0x6bd   : > { %v1270_v34 = vpop.xlane.xlu1 %1269 }
 0x6be   : > { %6082 = vrcp.f32 %v1270_v34  ;;  %v5918_v34 = vpack.c.bf16 %v5058_v33, %v5057_v32  ;;  %v2497_v33 = vld [vmem:[%s7216_s7 + $0x18] sm:$0xff] }
 0x6c8   : > { %v6083_v35 = vpop.eup %6082 }
 0x6c9   : > { %v1272_v36 = vmul.f32 %v6083_v35, %v6081_v31  ;;  %v5909_v31 = vpack.c.bf16 %v5046_v30, %v5045_v29  ;;  %v5059_v35 = vld [vmem:[%s7213_s4 + $0x170] sm:$0xff]  ;;  %v2494_v30 = vld [vmem:[%s7216_s7] sm:$0xff] }
 0x6cb   : > { %5488 = vmatmul.mubr.msk.f32.vlgmr.msra.gmra.mrb[10].mxu0 %vm775_vm3, %v1272_v36  ;;  %v5060_v36 = vld [vmem:[%s7213_s4 + $0x178] sm:$0xff] }
 0x6cc   : > { %5496 = vmatpush3.msra.mxu0 %v936_v37  ;;  %5497 = vmatprep.mubr.msk.f32.mxu0 %vm6185_vm0, %v6186_v5  ;;  %v5921_v37 = vpack.c.bf16 %v5060_v36, %v5059_v35  ;;  %v2579_v35 = vld [vmem:[%s7218_s9] sm:$0xff]  ;;  %v2580_v36 = vld [vmem:[%s7218_s9 + $0x8] sm:$0xff] }
 0x6cd   : > { %5893 = vmatprep.subr.bf16.mxu0 %v6184_v3 }
 0x6cf   : > { %5498 = vmatmul.mubr.msk.f32.vlgmr.msra.gmra.mrb[12].mxu0 %vm775_vm3, %v932_v14 }
 0x6d0   : > { %5895 = vmatpush3.bf16.msra.mxu0 %v5894_v40  ;;  %5519 = vmatprep.mubr.msk.f32.mxu0 %vm6185_vm0, %v6186_v5  ;;  %v5912_v40 = vpack.c.bf16 %v5051_v39, %v5050_v38  ;;  %v5930_v38 = vpack.c.bf16 %v2580_v36, %v2579_v35  ;;  %v2582_v39 = vld [vmem:[%s7218_s9 + $0x18] sm:$0xff] }
 0x6d1   : > { %5896 = vmatprep.subr.bf16.mxu0 %v6184_v3 }
 0x6d4   : > { %5898 = vmatpush3.bf16.msra.mxu0 %v5897_v43 }
 0x6d5   : > { %5533 = vmatprep.subr.mxu0 %v6186_v5 }
 0x6d7   : > { %5520 = vmatmul.mubr.msk.f32.vlgmr.msra.gmra.mrb[14].mxu0 %vm535_vm2, %v6370_v27 }
 0x6d8   : > { %5535 = vmatprep.mubr.msk.f32.mxu0 %vm6185_vm0, %v6186_v5 }
 0x79e   : > { %v1342_v49 = vpop.f32.mrb[10].mxu0 }
 0x79f   : > { %v5489_v50 = vpop.f32.mrb[11].mxu0  ;;  %5493 = vmatmul.mubr.msk.f32.vlgmr.msra.gmra.mrb[10].mxu1 %vm775_vm3, %v1342_v49 }
 0x7a0   : > { %5889 = vmatpush3.bf16.msra.mxu1 %v5888_v46  ;;  %5508 = vmatprep.mubr.msk.f32.mxu1 %vm6185_vm0, %v6186_v5 }
 0x7a1   : > { %5890 = vmatprep.subr.bf16.mxu1 %v6184_v3 }
 0x7a2   : > { %v1490_v54 = vpop.f32.mrb[12].mxu0 }
 0x7a3   : > { %v5499_v55 = vpop.f32.mrb[13].mxu0 }
 0x7a4   : > { %5892 = vmatpush3.bf16.msra.mxu1 %v5891_v51  ;;  %v5048_v55 = vld [vmem:[%s7214_s5 + $0x9] ss:$0 sm:$0xff] }
 0x7a5   : > { %5899 = vmatprep.subr.bf16.mxu1 %v6184_v3 }
 0x7a7   : > { %5509 = vmatmul.mubr.msk.f32.vlgmr.msra.gmra.mrb[12].mxu1 %vm535_vm2, %v6370_v27 }
 0x7a8   : > { %5901 = vmatpush3.bf16.msra.mxu1 %v5900_v56  ;;  %5530 = vmatprep.mubr.msk.f32.mxu1 %vm6185_vm0, %v6186_v5 }
 0x7a9   : > { %5902 = vmatprep.subr.bf16.mxu1 %v6184_v3 }
 0x7aa   : > { %v1656_v61 = vpop.f32.mrb[14].mxu0 }
 0x7ab   : > { %v1657_v62 = vadd.f32 %v5029_v59, %v1656_v61  ;;  %v5521_v63 = vpop.f32.mrb[15].mxu0 }
 0x7ac   : > { %5904 = vmatpush3.bf16.msra.mxu1 %v5903_v60 }
 0x7ad   : > { %5534 = vmatpush3.xpose.msk.msra.mxu0 %vm775_vm3, %v1657_v62  ;;  %5543 = vmatprep.subr.mxu1 %v6186_v5 }
 0x7ae   : > { %5538 = vmatprep.subr.mxu0 %v6186_v5 }
 0x7af   : > { %5531 = vmatmul.mubr.msk.f32.vlgmr.msra.gmra.mrb[14].mxu1 %vm535_vm2, %v6370_v27 }
 0x7b0   : > { %5545 = vmatprep.mubr.msk.f32.mxu1 %vm6185_vm0, %v6186_v5  ;;  %5544 = vmatpush3.msra.mxu1 %v5041_v21 }
 0x7b1   : > { %5911 = vmatprep.subr.bf16.mxu1 %v6184_v3 }
 0x872   : > { %v1417_v0 = vpop.f32.mrb[10].mxu1 }
 0x873   : > { %v6559_v1 = vadd.f32 %v1490_v54, %v1417_v0  ;;  %v5494_v2 = vpop.f32.mrb[11].mxu1 }
 0x87a   : > { %v1573_v6 = vpop.f32.mrb[12].mxu1 }
 0x87b   : > { %v1574_v7 = vadd.f32 %v5022_v4, %v1573_v6  ;;  %v5510_v8 = vpop.f32.mrb[13].mxu1 }
 0x87d   : > { %5536 = vmatmul.mubr.msk.f32.vlgmr.msra.gmra.mrb[16].mxu0 %vm775_vm3, %v1574_v7  ;;  %v5067_v7 = vld [vmem:[%s7215_s6 + $0x18] sm:$0xff] }
 0x87e   : > { %5540 = vmatprep.mubr.msk.f32.mxu0 %vm6185_vm0, %v6186_v5 }
 0x882   : > { %v1739_v10 = vpop.f32.mrb[14].mxu1 }
 0x883   : > { %v1740_v11 = vadd.f32 %v5036_v9, %v1739_v10  ;;  %v5532_v12 = vpop.f32.mrb[15].mxu1 }
 0x885   : > { %5539 = vmatpush3.msra.mxu0 %v1740_v11 }
 0x886   : > { %5905 = vmatprep.subr.bf16.mxu0 %v6184_v3 }
 0x950   : > { %v1815_v13 = vpop.f32.mrb[16].mxu0 }
 0x951   : > { %v5537_v14 = vpop.f32.mrb[17].mxu0  ;;  %v1819_v15 = vsel %vm775_vm3, %v1815_v13, -inf }
 0x952   : > { %1820 = vmax.xlane.f32.xlu0 %v1819_v15 }
 0x9df   : > { %v1821_v16 = vpop.xlane.xlu0 %1820 }
 0x9e0   : > { %v1822_v17 = vsub.f32 %v1815_v13, %v1821_v16  ;;  %v2464_v13 = vlaneseq  ;;  %v6674_v16 = vld [vmem:[%s7219_s10] sm:$0x3f] }
 0x9e2   : > { %v1823_v18 = vmul.f32 1.442695, %v1822_v17  ;;  %v6666_v14 = vshrl.u32 %v2464_v13, 7 }
 0x9e4   : > { %6084 = vpow2.f32 %v1823_v18  ;;  %v6669_v15 = vsub.s32 0, %v6666_v14 }
 0x9e6   : > { %v2467_v17 = vrot.slane %v6674_v16, %v6669_v15 }
 0x9ee   : > { %v6085_v19 = vpop.eup %6084 }
 0x9ef   : > { %v1825_v20 = vsel %vm775_vm3, %v6085_v19, 0.0 }
 0x9f0   : > { %1826 = vadd.xlane.f32.xlu1 %v1825_v20 }
 0xa7d   : > { %v1827_v22 = vpop.xlane.xlu1 %1826 }
 0xa7e   : > { %6086 = vrcp.f32 %v1827_v22 }
 0xa88   : > { %v6087_v25 = vpop.eup %6086 }
 0xa89   : > { %v1829_v28 = vmul.f32 %v6087_v25, %v6085_v19 }
 0xa8b   : > { %5541 = vmatmul.mubr.msk.f32.vlgmr.msra.gmra.mrb[18].mxu0 %vm775_vm3, %v1829_v28 }
 0xa8c   : > { %5907 = vmatpush3.bf16.msra.mxu0 %v5906_v26  ;;  %5556 = vmatprep.mubr.msk.f32.mxu0 %vm6185_vm0, %v6186_v5 }
 0xa8d   : > { %5908 = vmatprep.subr.bf16.mxu0 %v6184_v3 }
 0xa90   : > { %5910 = vmatpush3.bf16.msra.mxu0 %v5909_v31  ;;  %v2495_v31 = vld [vmem:[%s7216_s7 + $0x8] sm:$0xff] }
 0xa91   : > { %5917 = vmatprep.subr.bf16.mxu0 %v6184_v3  ;;  %v5924_v32 = vpack.c.bf16 %v2495_v31, %v2494_v30 }
 0xa93   : > { %5557 = vmatmul.mubr.msk.f32.vlgmr.msra.gmra.mrb[20].mxu0 %vm535_vm2, %v6370_v27 }
 0xa94   : > { %5919 = vmatpush3.bf16.msra.mxu0 %v5918_v34  ;;  %5578 = vmatprep.mubr.msk.f32.mxu0 %vm6185_vm0, %v6186_v5 }
 0xa95   : > { %5920 = vmatprep.subr.bf16.mxu0 %v6184_v3 }
 0xa98   : > { %5922 = vmatpush3.bf16.msra.mxu0 %v5921_v37  ;;  %v2581_v37 = vld [vmem:[%s7218_s9 + $0x10] sm:$0xff] }
 0xa99   : > { %5591 = vmatprep.subr.mxu0 %v6186_v5 }
 0xa9b   : > { %5579 = vmatmul.mubr.msk.f32.vlgmr.msra.gmra.mrb[22].mxu0 %vm535_vm2, %v6370_v27 }
 0xa9c   : > { %5593 = vmatprep.mubr.msk.f32.mxu0 %vm6185_vm0, %v6186_v5  ;;  %5592 = vmatpush3.msra.mxu0 %v5067_v7 }
 0xa9d   : > { %5929 = vmatprep.subr.bf16.mxu0 %v6184_v3 }
 0xb5e   : > { %v1899_v43 = vpop.f32.mrb[18].mxu0 }
 0xb5f   : > { %v5542_v44 = vpop.f32.mrb[19].mxu0  ;;  %5546 = vmatmul.mubr.msk.f32.vlgmr.msra.gmra.mrb[16].mxu1 %vm775_vm3, %v1899_v43  ;;  %v5936_v43 = vpack.c.bf16 %v2584_v42, %v2583_v41 }
 0xb60   : > { %5913 = vmatpush3.bf16.msra.mxu1 %v5912_v40  ;;  %5567 = vmatprep.mubr.msk.f32.mxu1 %vm6185_vm0, %v6186_v5  ;;  %v5933_v40 = vpack.c.bf16 %v2582_v39, %v2581_v37  ;;  %v5081_v39 = vld [vmem:[%s7213_s4 + $0x1a8] sm:$0xff] }
 0xb61   : > { %5914 = vmatprep.subr.bf16.mxu1 %v6184_v3 }
 0xb64   : > { %5916 = vmatpush3.bf16.msra.mxu1 %v5915_v45 }
 0xb65   : > { %5581 = vmatprep.subr.mxu1 %v6186_v5 }
 0xb66   : > { %v2058_v46 = vpop.f32.mrb[20].mxu0 }
 0xb67   : > { %v5558_v47 = vpop.f32.mrb[21].mxu0  ;;  %5568 = vmatmul.mubr.msk.f32.vlgmr.msra.gmra.mrb[18].mxu1 %vm535_vm2, %v6370_v27  ;;  %v2059_v59 = vadd.f32 %v5048_v55, %v2058_v46  ;;  %v2585_v55 = vld [vmem:[%s7218_s9 + $0x30] sm:$0xff] }
 0xb68   : > { %5583 = vmatprep.mubr.msk.f32.mxu1 %vm6185_vm0, %v6186_v5  ;;  %v2486_v47 = vsub.s32 1, %v6666_v14 }
 0xb6e   : > { %v2224_v48 = vpop.f32.mrb[22].mxu0 }
 0xb6f   : > { %v5580_v49 = vpop.f32.mrb[23].mxu0  ;;  %v2225_v60 = vadd.f32 %v5062_v58, %v2224_v48  ;;  %v2491_v48 = vsub.s32 2, %v6666_v14  ;;  %v5069_v58 = vld [vmem:[%s7217_s8] ss:$0 sm:$0xff] }
 0xb70   : > { %v2487_v49 = vrot.slane %v6674_v16, %v2486_v47 }
 0xc32   : > { %v1974_v50 = vpop.f32.mrb[16].mxu1 }
 0xc33   : > { %v1978_v51 = vadd.f32 %v1974_v50, %v6559_v1  ;;  %v5547_v52 = vpop.f32.mrb[17].mxu1 }
 0xc34   : > { %v2492_v52 = vrot.slane %v6674_v16, %v2491_v48 }
 0xc3a   : > { %v2141_v54 = vpop.f32.mrb[18].mxu1 }
 0xc3b   : > { %v2142_v56 = vadd.f32 %v5055_v53, %v2141_v54  ;;  %v5569_v57 = vpop.f32.mrb[19].mxu1 }
 0xc3d   : > { %5582 = vmatpush3.xpose.msk.msra.mxu1 %vm775_vm3, %v2142_v56  ;;  %v2586_v56 = vld [vmem:[%s7218_s9 + $0x38] sm:$0xff] }
 0xc3e   : > { %5586 = vmatprep.subr.mxu1 %v6186_v5  ;;  %v5939_v57 = vpack.c.bf16 %v2586_v56, %v2585_v55  ;;  %v5098_v55 = vld [vmem:[%s7213_s4 + $0x1e0] sm:$0xff]  ;;  %v5099_v56 = vld [vmem:[%s7213_s4 + $0x1e8] sm:$0xff] }
 0xc40   : > { %5584 = vmatmul.mubr.msk.f32.vlgmr.msra.gmra.mrb[20].mxu1 %vm775_vm3, %v2059_v59 }
 0xc41   : > { %5587 = vmatpush3.msra.mxu1 %v2225_v60  ;;  %5588 = vmatprep.mubr.msk.f32.mxu1 %vm6185_vm0, %v6186_v5 }
 0xc42   : > { %5923 = vmatprep.subr.bf16.mxu1 %v6184_v3 }
 0xd13   : > { %v2300_v61 = vpop.f32.mrb[20].mxu1 }
 0xd14   : > { %v5585_v62 = vpop.f32.mrb[21].mxu1  ;;  %v2304_v63 = vsel %vm775_vm3, %v2300_v61, -inf }
 0xd15   : > { %2305 = vmax.xlane.f32.xlu0 %v2304_v63  ;;  %v2589_v63 = vsub.s32 3, %v6666_v14 }
 0xda2   : > { %v2306_v0 = vpop.xlane.xlu0 %2305 }
 0xda3   : > { %v2307_v1 = vsub.f32 %v2300_v61, %v2306_v0  ;;  %v2590_v0 = vrot.slane %v6674_v16, %v2589_v63 }
 0xda5   : > { %v2308_v2 = vmul.f32 1.442695, %v2307_v1 }
 0xda7   : > { %6088 = vpow2.f32 %v2308_v2 }
 0xdb1   : > { %v6089_v4 = vpop.eup %6088 }
 0xdb2   : > { %v2310_v6 = vsel %vm775_vm3, %v6089_v4, 0.0 }
 0xdb3   : > { %2311 = vadd.xlane.f32.xlu1 %v2310_v6 }
 0xe40   : > { %v2312_v8 = vpop.xlane.xlu1 %2311 }
 0xe41   : > { %6090 = vrcp.f32 %v2312_v8 }
 0xe4b   : > { %v6091_v9 = vpop.eup %6090 }
 0xe4c   : > { %v2314_v10 = vmul.f32 %v6091_v9, %v6089_v4 }
 0xe4e   : > { %5589 = vmatmul.mubr.msk.f32.vlgmr.msra.gmra.mrb[22].mxu1 %vm775_vm3, %v2314_v10 }
 0xe4f   : > { %5604 = vmatprep.mubr.msk.f32.mxu1 %vm6185_vm0, %v6186_v5  ;;  %5925 = vmatpush3.bf16.msra.mxu1 %v5924_v32 }
 0xe50   : > { %5926 = vmatprep.subr.bf16.mxu1 %v6184_v3 }
 0xf21   : > { %v2384_v11 = vpop.f32.mrb[22].mxu1 }
 0xf22   : > { %v5590_v12 = vpop.f32.mrb[23].mxu1  ;;  %5594 = vmatmul.mubr.msk.f32.vlgmr.msra.gmra.mrb[24].mxu0 %vm775_vm3, %v2384_v11 }
 0xf23   : > { %5623 = vmatprep.mubr.msk.f32.mxu0 %vm6185_vm0, %v6186_v5  ;;  %5931 = vmatpush3.bf16.msra.mxu0 %v5930_v38  ;;  %v5080_v38 = vld [vmem:[%s7213_s4 + $0x1a0] sm:$0xff] }
 0xf24   : > { %5932 = vmatprep.subr.bf16.mxu0 %v6184_v3  ;;  %v5948_v41 = vpack.c.bf16 %v5081_v39, %v5080_v38  ;;  %v5110_v39 = vld [vmem:[%s7214_s5 + $0x10] ss:$0 sm:$0xff] }
 0xf27   : > { %5934 = vmatpush3.bf16.msra.mxu0 %v5933_v40 }
 0xf28   : > { %5935 = vmatprep.subr.bf16.mxu0 %v6184_v3 }
 0xf2b   : > { %5937 = vmatpush3.bf16.msra.mxu0 %v5936_v43  ;;  %v5082_v43 = vld [vmem:[%s7213_s4 + $0x1b0] sm:$0xff] }
 0xf2c   : > { %5938 = vmatprep.subr.bf16.mxu0 %v6184_v3 }
 0xf2f   : > { %5940 = vmatpush3.bf16.msra.mxu0 %v5939_v57  ;;  %v5078_v57 = vld [vmem:[%s7214_s5 + $0xc] ss:$0 sm:$0xff] }
 0xf30   : > { %5953 = vmatprep.subr.bf16.mxu0 %v6184_v3 }
 0xff5   : > { %v2459_v18 = vpop.f32.mrb[24].mxu0 }
 0xff6   : > { %v2463_v19 = vadd.f32 %v2459_v18, %v1978_v51  ;;  %v5595_v20 = vpop.f32.mrb[25].mxu0  ;;  %v5074_v18 = vld [vmem:[%s7213_s4 + $0x188] sm:$0xff] }
 0xff7   : > { %v5087_v20 = vld [vmem:[%s7213_s4 + $0x1c0] sm:$0xff] }
 0xff8   : > { %v2468_v21 = vadd.f32 %v2467_v17, %v2463_v19  ;;  %v5073_v17 = vld [vmem:[%s7213_s4 + $0x180] sm:$0xff] }
 0xff9   : > { %v5942_v19 = vpack.c.bf16 %v5074_v18, %v5073_v17 }
 0xffa   : > { %v2469_v22 = vadd.f32 %v2468_v21, %v6370_v27  ;;  %v2496_v27 = vld [vmem:[%s7216_s7 + $0x10] sm:$0xff]  ;;  %v5088_v21 = vld [vmem:[%s7213_s4 + $0x1c8] sm:$0xff] }
 0xffb   : > { %v5927_v34 = vpack.c.bf16 %v2497_v33, %v2496_v27  ;;  %v2681_v27 = vsub.s32 4, %v6666_v14  ;;  %v2686_v33 = vsub.s32 5, %v6666_v14 }
 0xffc   : > { %v2470_v23 = vsel %vm535_vm2, %v2469_v22, 0.0 }
 0xffd   : > { %2471 = vadd.xlane.f32.xlu0 %v2470_v23  ;;  %5928 = vmatpush3.bf16.msra.mxu1 %v5927_v34  ;;  %v5075_v23 = vld [vmem:[%s7213_s4 + $0x190] sm:$0xff]  ;;  %v2682_v34 = vrot.slane %v6674_v16, %v2681_v27  ;;  %v2687_v36 = vrot.slane %v6674_v16, %v2686_v33  ;;  %v5083_v16 = vld [vmem:[%s7213_s4 + $0x1b8] sm:$0xff] }
 0xffe   : > { %5941 = vmatprep.subr.bf16.mxu1 %v6184_v3 }
0x108a   : > { %v2472_v24 = vpop.xlane.xlu0 %2471 }
0x108b   : > { %v2474_v25 = vmul.f32 0.03125, %v2472_v24  ;;  %v5076_v24 = vld [vmem:[%s7213_s4 + $0x198] sm:$0xff] }
0x108d   : > { %v2475_v26 = vsub.f32 %v2469_v22, %v2474_v25  ;;  %v5954_v22 = vpack.c.bf16 %v5088_v21, %v5087_v20  ;;  %v5945_v25 = vpack.c.bf16 %v5076_v24, %v5075_v23 }
0x108f   : > { %v2476_v28 = vmul.f32 %v2475_v26, %v2475_v26 }
0x1091   : > { %v2477_v29 = vsel %vm535_vm2, %v2476_v28, 0.0  ;;  %v5090_v28 = vld [vmem:[%s7213_s4 + $0x1d8] sm:$0xff] }
0x1092   : > { %2478 = vadd.xlane.f32.xlu1 %v2477_v29 }
0x111f   : > { %v2479_v44 = vpop.xlane.xlu1 %2478 }
0x1120   : > { %v2480_v45 = vmul.f32 0.03125, %v2479_v44  ;;  %v5951_v44 = vpack.c.bf16 %v5083_v16, %v5082_v43 }
0x1122   : > { %v2481_v46 = vadd.f32 1e-05, %v2480_v45  ;;  %v5092_v45 = vld [vmem:[%s7214_s5 + $0xe] ss:$0 sm:$0xff] }
0x1124   : > { %6092 = vrsqrt.f32 %v2481_v46 }
0x112e   : > { %v6093_v50 = vpop.eup %6092 }
0x112f   : > { %v2483_v51 = vmul.f32 %v6093_v50, %v2475_v26  ;;  %v5089_v26 = vld [vmem:[%s7213_s4 + $0x1d0] sm:$0xff] }
0x1130   : > { %v5957_v29 = vpack.c.bf16 %v5090_v28, %v5089_v26  ;;  %v5105_v28 = vld [vmem:[%s7213_s4 + $0x200] sm:$0xff] }
0x1131   : > { %v2488_v53 = vmul.f32 %v2487_v49, %v2483_v51 }
0x1133   : > { %v2493_v54 = vadd.f32 %v2492_v52, %v2488_v53  ;;  %v5085_v53 = vld [vmem:[%s7214_s5 + $0xd] ss:$0 sm:$0xff] }
0x1135   : > { %5605 = vmatmul.mubr.msk.f32.vlgmr.msra.gmra.mrb[24].mxu1 %vm535_vm2, %v2493_v54 }
0x1136   : > { %5634 = vmatprep.mubr.msk.f32.mxu1 %vm6185_vm0, %v6186_v5  ;;  %5943 = vmatpush3.bf16.msra.mxu1 %v5942_v19 }
0x1137   : > { %5944 = vmatprep.subr.bf16.mxu1 %v6184_v3 }
0x113a   : > { %5946 = vmatpush3.bf16.msra.mxu1 %v5945_v25 }
0x113b   : > { %5947 = vmatprep.subr.bf16.mxu1 %v6184_v3 }
0x1208   : > { %v2574_v59 = vpop.f32.mrb[24].mxu1 }
0x1209   : > { %v2575_v60 = vadd.f32 %v5069_v58, %v2574_v59  ;;  %v5606_v61 = vpop.f32.mrb[25].mxu1 }
0x120b   : > { %v2578_v62 = vmax.f32 %v2575_v60, 0.0  ;;  %v5960_v60 = vpack.c.bf16 %v5099_v56, %v5098_v55 }
0x120d   : > { %5624 = vmatmul.mubr.msk.f32.vlgmr.msra.gmra.mrb[26].mxu0 %vm2591_vm4, %v2578_v62  ;;  %v5100_v62 = vld [vmem:[%s7213_s4 + $0x1f0] sm:$0xff] }
0x120e   : > { %5656 = vmatprep.mubr.msk.f32.mxu0 %vm6185_vm0, %v6186_v5  ;;  %5955 = vmatpush3.bf16.msra.mxu0 %v5954_v22 }
0x120f   : > { %5956 = vmatprep.subr.bf16.mxu0 %v6184_v3 }
0x1212   : > { %5958 = vmatpush3.bf16.msra.mxu0 %v5957_v29  ;;  %v5106_v29 = vld [vmem:[%s7213_s4 + $0x208] sm:$0xff] }
0x1213   : > { %5664 = vmatprep.subr.mxu0 %v6186_v5 }
0x12e0   : > { %v2661_v1 = vpop.f32.mrb[26].mxu0 }
0x12e1   : > { %v2662_v2 = vadd.f32 %v2661_v1, %v2590_v0  ;;  %v5625_v4 = vpop.f32.mrb[27].mxu0  ;;  %v5101_v0 = vld [vmem:[%s7213_s4 + $0x1f8] sm:$0xff] }
0x12e2   : > { %v5963_v1 = vpack.c.bf16 %v5101_v0, %v5100_v62  ;;  %v5113_v4 = vld [vmem:[%s7213_s4 + $0x228] sm:$0xff]  ;;  %v5132_v62 = vld [vmem:[%s7213_s4 + $0x260] sm:$0xff] }
0x12e3   : > { %v2665_v6 = vadd.f32 %v2662_v2, %v2493_v54  ;;  %v5112_v2 = vld [vmem:[%s7213_s4 + $0x220] sm:$0xff]  ;;  %v5133_v0 = vld [vmem:[%s7213_s4 + $0x268] sm:$0xff] }
0x12e5   : > { %v2666_v7 = vsel %vm535_vm2, %v2665_v6, 0.0 }
0x12e6   : > { %2667 = vadd.xlane.f32.xlu0 %v2666_v7  ;;  %v5114_v7 = vld [vmem:[%s7213_s4 + $0x230] sm:$0xff] }
0x1373   : > { %v2668_v8 = vpop.xlane.xlu0 %2667 }
0x1374   : > { %v2669_v9 = vmul.f32 0.03125, %v2668_v8  ;;  %v5115_v8 = vld [vmem:[%s7213_s4 + $0x238] sm:$0xff] }
0x1376   : > { %v2670_v10 = vsub.f32 %v2665_v6, %v2669_v9  ;;  %v5972_v6 = vpack.c.bf16 %v5113_v4, %v5112_v2  ;;  %v5975_v9 = vpack.c.bf16 %v5115_v8, %v5114_v7  ;;  %v5134_v2 = vld [vmem:[%s7213_s4 + $0x270] sm:$0xff]  ;;  %v5135_v4 = vld [vmem:[%s7213_s4 + $0x278] sm:$0xff]  ;;  %v5125_v7 = vld [vmem:[%s7213_s4 + $0x240] sm:$0xff] }
0x1377   : > { %v5126_v8 = vld [vmem:[%s7213_s4 + $0x248] sm:$0xff] }
0x1378   : > { %v2671_v11 = vmul.f32 %v2670_v10, %v2670_v10 }
0x137a   : > { %v2672_v12 = vsel %vm535_vm2, %v2671_v11, 0.0 }
0x137b   : > { %2673 = vadd.xlane.f32.xlu1 %v2672_v12 }
0x1408   : > { %v2674_v30 = vpop.xlane.xlu1 %2673 }
0x1409   : > { %v2675_v31 = vmul.f32 0.03125, %v2674_v30 }
0x140b   : > { %v2676_v32 = vadd.f32 1e-05, %v2675_v31  ;;  %v5966_v31 = vpack.c.bf16 %v5106_v29, %v5105_v28 }
0x140d   : > { %6094 = vrsqrt.f32 %v2676_v32 }
0x1417   : > { %v6095_v35 = vpop.eup %6094 }
0x1418   : > { %v2678_v37 = vmul.f32 %v6095_v35, %v2670_v10  ;;  %v5108_v35 = vld [vmem:[%s7213_s4 + $0x218] sm:$0xff] }
0x141a   : > { %v2683_v40 = vmul.f32 %v2682_v34, %v2678_v37  ;;  %v5107_v34 = vld [vmem:[%s7213_s4 + $0x210] sm:$0xff] }
0x141c   : > { %v6788_v42 = vadd.f32 %v2687_v36, %v2683_v40  ;;  %v5969_v36 = vpack.c.bf16 %v5108_v35, %v5107_v34 }
0x141e   : > { %5635 = vmatmul.mubr.msk.f32.vlgmr.msra.gmra.mrb[26].mxu1 %vm535_vm2, %v6788_v42  ;;  %5657 = vmatmul.mubr.msk.f32.vlgmr.msra.gmra.mrb[28].mxu0 %vm535_vm2, %v6788_v42 }
0x141f   : > { %5949 = vmatpush3.bf16.msra.mxu1 %v5948_v41  ;;  %5645 = vmatprep.mubr.msk.f32.mxu1 %vm6185_vm0, %v6186_v5  ;;  %v5103_v41 = vld [vmem:[%s7214_s5 + $0xf] ss:$0 sm:$0xff] }
0x1420   : > { %5950 = vmatprep.subr.bf16.mxu1 %v6184_v3  ;;  %5666 = vmatprep.mubr.msk.f32.mxu0 %vm6185_vm0, %v6186_v5 }
0x1423   : > { %5952 = vmatpush3.bf16.msra.mxu1 %v5951_v44  ;;  %v5117_v44 = vld [vmem:[%s7214_s5 + $0x11] ss:$0 sm:$0xff] }
0x1424   : > { %5659 = vmatprep.subr.mxu1 %v6186_v5 }
0x1426   : > { %5646 = vmatmul.mubr.msk.f32.vlgmr.msra.gmra.mrb[28].mxu1 %vm535_vm2, %v6788_v42 }
0x1427   : > { %5661 = vmatprep.mubr.msk.f32.mxu1 %vm6185_vm0, %v6186_v5 }
0x14f1   : > { %v2773_v46 = vpop.f32.mrb[26].mxu1  ;;  %v2939_v49 = vpop.f32.mrb[28].mxu0 }
0x14f2   : > { %v2940_v50 = vadd.f32 %v5092_v45, %v2939_v49  ;;  %v5636_v51 = vpop.f32.mrb[27].mxu1  ;;  %v5658_v52 = vpop.f32.mrb[29].mxu0  ;;  %v2774_v61 = vadd.f32 %v5078_v57, %v2773_v46  ;;  %v5122_v57 = vld [vmem:[%s7215_s6 + $0x28] sm:$0xff] }
0x14f4   : > { %5665 = vmatpush3.msra.mxu0 %v2940_v50 }
0x14f5   : > { %5965 = vmatprep.subr.bf16.mxu0 %v6184_v3 }
0x14f9   : > { %v2856_v54 = vpop.f32.mrb[28].mxu1 }
0x14fa   : > { %v2857_v58 = vadd.f32 %v5085_v53, %v2856_v54  ;;  %v5647_v59 = vpop.f32.mrb[29].mxu1 }
0x14fc   : > { %5660 = vmatpush3.xpose.msk.msra.mxu1 %vm775_vm3, %v2857_v58 }
0x14fd   : > { %5959 = vmatprep.subr.bf16.mxu1 %v6184_v3 }
0x14ff   : > { %5662 = vmatmul.mubr.msk.f32.vlgmr.msra.gmra.mrb[30].mxu1 %vm775_vm3, %v2774_v61  ;;  %v5097_v61 = vld [vmem:[%s7215_s6 + $0x20] sm:$0xff] }
0x1500   : > { %5961 = vmatpush3.bf16.msra.mxu1 %v5960_v60  ;;  %5677 = vmatprep.mubr.msk.f32.mxu1 %vm6185_vm0, %v6186_v5 }
0x1501   : > { %5962 = vmatprep.subr.bf16.mxu1 %v6184_v3 }
0x1504   : > { %5964 = vmatpush3.bf16.msra.mxu1 %v5963_v1  ;;  %v5984_v1 = vpack.c.bf16 %v5133_v0, %v5132_v62  ;;  %v5154_v62 = vld [vmem:[%s7213_s4 + $0x2b8] sm:$0xff] }
0x1505   : > { %5971 = vmatprep.subr.bf16.mxu1 %v6184_v3 }
0x1507   : > { %5678 = vmatmul.mubr.msk.f32.vlgmr.msra.gmra.mrb[32].mxu1 %vm535_vm2, %v6788_v42 }
0x1508   : > { %5973 = vmatpush3.bf16.msra.mxu1 %v5972_v6  ;;  %5699 = vmatprep.mubr.msk.f32.mxu1 %vm6185_vm0, %v6186_v5  ;;  %v5987_v6 = vpack.c.bf16 %v5135_v4, %v5134_v2  ;;  %v5166_v2 = vld [vmem:[%s7213_s4 + $0x2e8] sm:$0xff] }
0x1509   : > { %5974 = vmatprep.subr.bf16.mxu1 %v6184_v3 }
0x150c   : > { %5976 = vmatpush3.bf16.msra.mxu1 %v5975_v9  ;;  %v5978_v9 = vpack.c.bf16 %v5126_v8, %v5125_v7  ;;  %v5168_v7 = vld [vmem:[%s7213_s4 + $0x2f8] sm:$0xff] }
0x150d   : > { %5712 = vmatprep.subr.mxu1 %v6186_v5 }
0x150f   : > { %5700 = vmatmul.mubr.msk.f32.vlgmr.msra.gmra.mrb[34].mxu1 %vm535_vm2, %v6788_v42 }
0x1510   : > { %5714 = vmatprep.mubr.msk.f32.mxu1 %vm6185_vm0, %v6186_v5  ;;  %5713 = vmatpush3.msra.mxu1 %v5122_v57  ;;  %v5152_v57 = vld [vmem:[%s7213_s4 + $0x2a8] sm:$0xff] }
0x1511   : > { %5977 = vmatprep.subr.bf16.mxu1 %v6184_v3 }
0x15d2   : > { %v3015_v10 = vpop.f32.mrb[30].mxu1 }
0x15d3   : > { %v5663_v11 = vpop.f32.mrb[31].mxu1  ;;  %v3019_v12 = vsel %vm775_vm3, %v3015_v10, -inf }
0x15d4   : > { %3020 = vmax.xlane.f32.xlu0 %v3019_v12  ;;  %v5128_v11 = vld [vmem:[%s7213_s4 + $0x258] sm:$0xff] }
0x15da   : > { %v3184_v17 = vpop.f32.mrb[32].mxu1 }
0x15db   : > { %v5679_v18 = vpop.f32.mrb[33].mxu1  ;;  %v3185_v45 = vadd.f32 %v5103_v41, %v3184_v17 }
0x15e2   : > { %v3350_v19 = vpop.f32.mrb[34].mxu1 }
0x15e3   : > { %v5701_v20 = vpop.f32.mrb[35].mxu1  ;;  %v3351_v46 = vadd.f32 %v5117_v44, %v3350_v19  ;;  %v5139_v19 = vld [vmem:[%s7213_s4 + $0x280] sm:$0xff] }
0x15e4   : > { %v5140_v20 = vld [vmem:[%s7213_s4 + $0x288] sm:$0xff] }
0x1661   : > { %v3021_v21 = vpop.xlane.xlu0 %3020 }
0x1662   : > { %v3022_v22 = vsub.f32 %v3015_v10, %v3021_v21  ;;  %v5127_v10 = vld [vmem:[%s7213_s4 + $0x250] sm:$0xff] }
0x1663   : > { %v5981_v18 = vpack.c.bf16 %v5128_v11, %v5127_v10  ;;  %v5159_v10 = vld [vmem:[%s7213_s4 + $0x2c8] sm:$0xff] }
0x1664   : > { %v3023_v23 = vmul.f32 1.442695, %v3022_v22 }
0x1666   : > { %6096 = vpow2.f32 %v3023_v23  ;;  %v5990_v23 = vpack.c.bf16 %v5140_v20, %v5139_v19 }
0x1670   : > { %v6097_v24 = vpop.eup %6096 }
0x1671   : > { %v3025_v25 = vsel %vm775_vm3, %v6097_v24, 0.0 }
0x1672   : > { %3026 = vadd.xlane.f32.xlu1 %v3025_v25  ;;  %v5142_v25 = vld [vmem:[%s7213_s4 + $0x298] sm:$0xff] }
0x16ff   : > { %v3027_v26 = vpop.xlane.xlu1 %3026 }
0x1700   : > { %6098 = vrcp.f32 %v3027_v26  ;;  %v5137_v26 = vld [vmem:[%s7214_s5 + $0x13] ss:$0 sm:$0xff] }
0x170a   : > { %v6099_v30 = vpop.eup %6098 }
0x170b   : > { %v3029_v32 = vmul.f32 %v6099_v30, %v6097_v24  ;;  %v5141_v24 = vld [vmem:[%s7213_s4 + $0x290] sm:$0xff] }
0x170c   : > { %v5993_v28 = vpack.c.bf16 %v5142_v25, %v5141_v24 }
0x170d   : > { %5667 = vmatmul.mubr.msk.f32.vlgmr.msra.gmra.mrb[30].mxu0 %vm775_vm3, %v3029_v32 }
0x170e   : > { %5967 = vmatpush3.bf16.msra.mxu0 %v5966_v31  ;;  %5688 = vmatprep.mubr.msk.f32.mxu0 %vm6185_vm0, %v6186_v5 }
0x170f   : > { %5968 = vmatprep.subr.bf16.mxu0 %v6184_v3 }
0x1712   : > { %5970 = vmatpush3.bf16.msra.mxu0 %v5969_v36  ;;  %v5130_v36 = vld [vmem:[%s7214_s5 + $0x12] ss:$0 sm:$0xff] }
0x1713   : > { %5702 = vmatprep.subr.mxu0 %v6186_v5 }
0x1715   : > { %5689 = vmatmul.mubr.msk.f32.vlgmr.msra.gmra.mrb[32].mxu0 %vm535_vm2, %v6788_v42 }
0x1716   : > { %5704 = vmatprep.mubr.msk.f32.mxu0 %vm6185_vm0, %v6186_v5 }
0x17e0   : > { %v3099_v37 = vpop.f32.mrb[30].mxu0 }
0x17e1   : > { %v5668_v38 = vpop.f32.mrb[31].mxu0 }
0x17e8   : > { %v3267_v40 = vpop.f32.mrb[32].mxu0 }
0x17e9   : > { %v3268_v43 = vadd.f32 %v5110_v39, %v3267_v40  ;;  %v5690_v16 = vpop.f32.mrb[33].mxu0  ;;  %v5144_v40 = vld [vmem:[%s7214_s5 + $0x14] ss:$0 sm:$0xff] }
0x17eb   : > { %5703 = vmatpush3.xpose.msk.msra.mxu0 %vm775_vm3, %v3268_v43 }
0x17ec   : > { %5707 = vmatprep.subr.mxu0 %v6186_v5 }
0x17ee   : > { %5705 = vmatmul.mubr.msk.f32.vlgmr.msra.gmra.mrb[34].mxu0 %vm775_vm3, %v3185_v45 }
0x17ef   : > { %5708 = vmatpush3.msra.mxu0 %v3351_v46  ;;  %5709 = vmatprep.mubr.msk.f32.mxu0 %vm6185_vm0, %v6186_v5 }
0x17f0   : > { %5717 = vmatprep.subr.mxu0 %v6186_v5 }
0x18c1   : > { %v3426_v49 = vpop.f32.mrb[34].mxu0 }
0x18c2   : > { %v5706_v50 = vpop.f32.mrb[35].mxu0  ;;  %v3430_v51 = vsel %vm775_vm3, %v3426_v49, -inf }
0x18c3   : > { %3431 = vmax.xlane.f32.xlu0 %v3430_v51 }
0x1950   : > { %v3432_v52 = vpop.xlane.xlu0 %3431 }
0x1951   : > { %v3433_v53 = vsub.f32 %v3426_v49, %v3432_v52 }
0x1953   : > { %v3434_v54 = vmul.f32 1.442695, %v3433_v53 }
0x1955   : > { %6100 = vpow2.f32 %v3434_v54  ;;  %v5149_v54 = vld [vmem:[%s7215_s6 + $0x30] sm:$0xff] }
0x195f   : > { %v6101_v55 = vpop.eup %6100 }
0x1960   : > { %v3436_v56 = vsel %vm775_vm3, %v6101_v55, 0.0 }
0x1961   : > { %3437 = vadd.xlane.f32.xlu1 %v3436_v56  ;;  %v5151_v56 = vld [vmem:[%s7213_s4 + $0x2a0] sm:$0xff] }
0x19ee   : > { %v3438_v58 = vpop.xlane.xlu1 %3437 }
0x19ef   : > { %6102 = vrcp.f32 %v3438_v58 }
0x19f9   : > { %v6103_v59 = vpop.eup %6102 }
0x19fa   : > { %v3440_v60 = vmul.f32 %v6103_v59, %v6101_v55  ;;  %v5996_v59 = vpack.c.bf16 %v5152_v57, %v5151_v56 }
0x19fc   : > { %5710 = vmatmul.mubr.msk.f32.vlgmr.msra.gmra.mrb[36].mxu0 %vm775_vm3, %v3440_v60 }
0x19fd   : > { %5718 = vmatpush3.msra.mxu0 %v5097_v61  ;;  %5719 = vmatprep.mubr.msk.f32.mxu0 %vm6185_vm0, %v6186_v5  ;;  %v5153_v61 = vld [vmem:[%s7213_s4 + $0x2b0] sm:$0xff] }
0x19fe   : > { %5983 = vmatprep.subr.bf16.mxu0 %v6184_v3  ;;  %v5999_v0 = vpack.c.bf16 %v5154_v62, %v5153_v61 }
0x1a00   : > { %5720 = vmatmul.mubr.msk.f32.vlgmr.msra.gmra.mrb[38].mxu0 %vm775_vm3, %v3099_v37 }
0x1a01   : > { %5985 = vmatpush3.bf16.msra.mxu0 %v5984_v1  ;;  %5741 = vmatprep.mubr.msk.f32.mxu0 %vm6185_vm0, %v6186_v5  ;;  %v5165_v1 = vld [vmem:[%s7213_s4 + $0x2e0] sm:$0xff] }
0x1a02   : > { %5986 = vmatprep.subr.bf16.mxu0 %v6184_v3  ;;  %v6008_v4 = vpack.c.bf16 %v5166_v2, %v5165_v1 }
0x1a05   : > { %5988 = vmatpush3.bf16.msra.mxu0 %v5987_v6  ;;  %v5167_v6 = vld [vmem:[%s7213_s4 + $0x2f0] sm:$0xff] }
0x1a06   : > { %5755 = vmatprep.subr.mxu0 %v6186_v5  ;;  %v6011_v8 = vpack.c.bf16 %v5168_v7, %v5167_v6  ;;  %v5178_v6 = vld [vmem:[%s7216_s7 + $0x28] sm:$0xff] }
0x1a08   : > { %5742 = vmatmul.mubr.msk.f32.vlgmr.msra.gmra.mrb[40].mxu0 %vm535_vm2, %v6788_v42 }
0x1a09   : > { %5757 = vmatprep.mubr.msk.f32.mxu0 %vm6185_vm0, %v6186_v5 }
0x1acf   : > { %v3510_v12 = vpop.f32.mrb[36].mxu0 }
0x1ad0   : > { %v5711_v17 = vpop.f32.mrb[37].mxu0  ;;  %5715 = vmatmul.mubr.msk.f32.vlgmr.msra.gmra.mrb[36].mxu1 %vm775_vm3, %v3510_v12  ;;  %v5160_v12 = vld [vmem:[%s7213_s4 + $0x2d0] sm:$0xff] }
0x1ad1   : > { %5979 = vmatpush3.bf16.msra.mxu1 %v5978_v9  ;;  %5730 = vmatprep.mubr.msk.f32.mxu1 %vm6185_vm0, %v6186_v5  ;;  %v5158_v9 = vld [vmem:[%s7213_s4 + $0x2c0] sm:$0xff]  ;;  %v5161_v17 = vld [vmem:[%s7213_s4 + $0x2d8] sm:$0xff] }
0x1ad2   : > { %5980 = vmatprep.subr.bf16.mxu1 %v6184_v3  ;;  %v6002_v11 = vpack.c.bf16 %v5159_v10, %v5158_v9  ;;  %v6005_v20 = vpack.c.bf16 %v5161_v17, %v5160_v12  ;;  %v5184_v10 = vld [vmem:[%s7218_s9 + $0x40] sm:$0xff]  ;;  %v5186_v12 = vld [vmem:[%s7218_s9 + $0x50] sm:$0xff] }
0x1ad3   : > { %v3658_v21 = vpop.f32.mrb[38].mxu0 }
0x1ad4   : > { %v5721_v22 = vpop.f32.mrb[39].mxu0 }
0x1ad5   : > { %5982 = vmatpush3.bf16.msra.mxu1 %v5981_v18 }
0x1ad6   : > { %5989 = vmatprep.subr.bf16.mxu1 %v6184_v3 }
0x1ad8   : > { %5731 = vmatmul.mubr.msk.f32.vlgmr.msra.gmra.mrb[38].mxu1 %vm535_vm2, %v6788_v42 }
0x1ad9   : > { %5991 = vmatpush3.bf16.msra.mxu1 %v5990_v23  ;;  %5752 = vmatprep.mubr.msk.f32.mxu1 %vm6185_vm0, %v6186_v5 }
0x1ada   : > { %5992 = vmatprep.subr.bf16.mxu1 %v6184_v3 }
0x1adb   : > { %v3824_v29 = vpop.f32.mrb[40].mxu0 }
0x1adc   : > { %v3825_v30 = vadd.f32 %v5137_v26, %v3824_v29  ;;  %v5743_v31 = vpop.f32.mrb[41].mxu0  ;;  %v5163_v29 = vld [vmem:[%s7214_s5 + $0x16] ss:$0 sm:$0xff] }
0x1add   : > { %5994 = vmatpush3.bf16.msra.mxu1 %v5993_v28  ;;  %v5156_v31 = vld [vmem:[%s7214_s5 + $0x15] ss:$0 sm:$0xff] }
0x1ade   : > { %5756 = vmatpush3.xpose.msk.msra.mxu0 %vm775_vm3, %v3825_v30  ;;  %5765 = vmatprep.subr.mxu1 %v6186_v5 }
0x1adf   : > { %5760 = vmatprep.subr.mxu0 %v6186_v5 }
0x1ae0   : > { %5753 = vmatmul.mubr.msk.f32.vlgmr.msra.gmra.mrb[40].mxu1 %vm535_vm2, %v6788_v42 }
0x1ae1   : > { %5767 = vmatprep.mubr.msk.f32.mxu1 %vm6185_vm0, %v6186_v5  ;;  %5766 = vmatpush3.msra.mxu1 %v5149_v54  ;;  %v7086_v54 = vld [vmem:[%s7219_s10 + $0x8] sm:$0x3f] }
0x1ae2   : > { %6001 = vmatprep.subr.bf16.mxu1 %v6184_v3 }
0x1ba3   : > { %v3585_v32 = vpop.f32.mrb[36].mxu1 }
0x1ba4   : > { %v6977_v34 = vadd.f32 %v3658_v21, %v3585_v32  ;;  %v5716_v35 = vpop.f32.mrb[37].mxu1 }
0x1bab   : > { %v3741_v37 = vpop.f32.mrb[38].mxu1 }
0x1bac   : > { %v3742_v38 = vadd.f32 %v5130_v36, %v3741_v37  ;;  %v5732_v39 = vpop.f32.mrb[39].mxu1  ;;  %v5170_v36 = vld [vmem:[%s7214_s5 + $0x17] ss:$0 sm:$0xff] }
0x1bae   : > { %5758 = vmatmul.mubr.msk.f32.vlgmr.msra.gmra.mrb[42].mxu0 %vm775_vm3, %v3742_v38 }
0x1baf   : > { %5762 = vmatprep.mubr.msk.f32.mxu0 %vm6185_vm0, %v6186_v5 }
0x1bb3   : > { %v3907_v41 = vpop.f32.mrb[40].mxu1 }
0x1bb4   : > { %v3908_v43 = vadd.f32 %v5144_v40, %v3907_v41  ;;  %v5754_v16 = vpop.f32.mrb[41].mxu1 }
0x1bb6   : > { %5761 = vmatpush3.msra.mxu0 %v3908_v43 }
0x1bb7   : > { %5995 = vmatprep.subr.bf16.mxu0 %v6184_v3 }
0x1c81   : > { %v3983_v44 = vpop.f32.mrb[42].mxu0 }
0x1c82   : > { %v5759_v45 = vpop.f32.mrb[43].mxu0  ;;  %v3987_v46 = vsel %vm775_vm3, %v3983_v44, -inf }
0x1c83   : > { %3988 = vmax.xlane.f32.xlu0 %v3987_v46  ;;  %v5175_v46 = vld [vmem:[%s7215_s6 + $0x38] sm:$0xff] }
0x1d10   : > { %v3989_v49 = vpop.xlane.xlu0 %3988 }
0x1d11   : > { %v3990_v50 = vsub.f32 %v3983_v44, %v3989_v49 }
0x1d13   : > { %v3991_v51 = vmul.f32 1.442695, %v3990_v50 }
0x1d15   : > { %6104 = vpow2.f32 %v3991_v51 }
0x1d1f   : > { %v6105_v52 = vpop.eup %6104 }
0x1d20   : > { %v3993_v53 = vsel %vm775_vm3, %v6105_v52, 0.0 }
0x1d21   : > { %3994 = vadd.xlane.f32.xlu1 %v3993_v53 }
0x1dae   : > { %v3995_v55 = vpop.xlane.xlu1 %3994 }
0x1daf   : > { %6106 = vrcp.f32 %v3995_v55  ;;  %v4635_v55 = vrot.slane %v7086_v54, %v6669_v15 }
0x1db9   : > { %v6107_v58 = vpop.eup %6106 }
0x1dba   : > { %v3997_v60 = vmul.f32 %v6107_v58, %v6105_v52 }
0x1dbc   : > { %5763 = vmatmul.mubr.msk.f32.vlgmr.msra.gmra.mrb[44].mxu0 %vm775_vm3, %v3997_v60 }
0x1dbd   : > { %5997 = vmatpush3.bf16.msra.mxu0 %v5996_v59  ;;  %5778 = vmatprep.mubr.msk.f32.mxu0 %vm6185_vm0, %v6186_v5 }
0x1dbe   : > { %5998 = vmatprep.subr.bf16.mxu0 %v6184_v3 }
0x1dc1   : > { %6000 = vmatpush3.bf16.msra.mxu0 %v5999_v0 }
0x1dc2   : > { %6007 = vmatprep.subr.bf16.mxu0 %v6184_v3 }
0x1dc4   : > { %5779 = vmatmul.mubr.msk.f32.vlgmr.msra.gmra.mrb[46].mxu0 %vm535_vm2, %v6788_v42 }
0x1dc5   : > { %6009 = vmatpush3.bf16.msra.mxu0 %v6008_v4  ;;  %5800 = vmatprep.mubr.msk.f32.mxu0 %vm6185_vm0, %v6186_v5  ;;  %v5177_v4 = vld [vmem:[%s7216_s7 + $0x20] sm:$0xff] }
0x1dc6   : > { %6010 = vmatprep.subr.bf16.mxu0 %v6184_v3  ;;  %v6014_v7 = vpack.c.bf16 %v5178_v6, %v5177_v4 }
0x1dc9   : > { %6012 = vmatpush3.bf16.msra.mxu0 %v6011_v8  ;;  %v5180_v8 = vld [vmem:[%s7216_s7 + $0x38] sm:$0xff] }
0x1dca   : > { %5813 = vmatprep.subr.mxu0 %v6186_v5 }
0x1dcc   : > { %5801 = vmatmul.mubr.msk.f32.vlgmr.msra.gmra.mrb[48].mxu0 %vm535_vm2, %v6788_v42 }
0x1dcd   : > { %5815 = vmatprep.mubr.msk.f32.mxu0 %vm6185_vm0, %v6186_v5  ;;  %5814 = vmatpush3.msra.mxu0 %v5175_v46 }
0x1dce   : > { %6019 = vmatprep.subr.bf16.mxu0 %v6184_v3 }
0x1e8f   : > { %v4067_v18 = vpop.f32.mrb[44].mxu0 }
0x1e90   : > { %v5764_v19 = vpop.f32.mrb[45].mxu0  ;;  %5768 = vmatmul.mubr.msk.f32.vlgmr.msra.gmra.mrb[42].mxu1 %vm775_vm3, %v4067_v18  ;;  %v5187_v18 = vld [vmem:[%s7218_s9 + $0x58] sm:$0xff] }
0x1e91   : > { %6003 = vmatpush3.bf16.msra.mxu1 %v6002_v11  ;;  %5789 = vmatprep.mubr.msk.f32.mxu1 %vm6185_vm0, %v6186_v5  ;;  %v5185_v11 = vld [vmem:[%s7218_s9 + $0x48] sm:$0xff]  ;;  %v6023_v19 = vpack.c.bf16 %v5187_v18, %v5186_v12 }
0x1e92   : > { %6004 = vmatprep.subr.bf16.mxu1 %v6184_v3  ;;  %v6020_v17 = vpack.c.bf16 %v5185_v11, %v5184_v10 }
0x1e95   : > { %6006 = vmatpush3.bf16.msra.mxu1 %v6005_v20  ;;  %v5188_v20 = vld [vmem:[%s7218_s9 + $0x60] sm:$0xff] }
0x1e96   : > { %5803 = vmatprep.subr.mxu1 %v6186_v5 }
0x1e97   : > { %v4226_v21 = vpop.f32.mrb[46].mxu0 }
0x1e98   : > { %v5780_v22 = vpop.f32.mrb[47].mxu0  ;;  %5790 = vmatmul.mubr.msk.f32.vlgmr.msra.gmra.mrb[44].mxu1 %vm535_vm2, %v6788_v42  ;;  %v4227_v37 = vadd.f32 %v5156_v31, %v4226_v21  ;;  %v5189_v21 = vld [vmem:[%s7218_s9 + $0x68] sm:$0xff] }
0x1e99   : > { %5805 = vmatprep.mubr.msk.f32.mxu1 %vm6185_vm0, %v6186_v5  ;;  %v6026_v22 = vpack.c.bf16 %v5189_v21, %v5188_v20 }
0x1e9f   : > { %v4392_v23 = vpop.f32.mrb[48].mxu0 }
0x1ea0   : > { %v5802_v24 = vpop.f32.mrb[49].mxu0 }
0x1f63   : > { %v4142_v25 = vpop.f32.mrb[42].mxu1 }
0x1f64   : > { %v4146_v26 = vadd.f32 %v4142_v25, %v6977_v34  ;;  %v5769_v28 = vpop.f32.mrb[43].mxu1  ;;  %v4393_v34 = vadd.f32 %v5170_v36, %v4392_v23 }
0x1f6b   : > { %v4309_v30 = vpop.f32.mrb[44].mxu1 }
0x1f6c   : > { %v4310_v32 = vadd.f32 %v5163_v29, %v4309_v30  ;;  %v5791_v35 = vpop.f32.mrb[45].mxu1  ;;  %v4659_v30 = vrot.slane %v7086_v54, %v2491_v48 }
0x1f6d   : > { %v5191_v35 = vld [vmem:[%s7218_s9 + $0x78] sm:$0xff] }
0x1f6e   : > { %5804 = vmatpush3.xpose.msk.msra.mxu1 %vm775_vm3, %v4310_v32 }
0x1f6f   : > { %5808 = vmatprep.subr.mxu1 %v6186_v5 }
0x1f71   : > { %5806 = vmatmul.mubr.msk.f32.vlgmr.msra.gmra.mrb[46].mxu1 %vm775_vm3, %v4227_v37 }
0x1f72   : > { %5809 = vmatpush3.msra.mxu1 %v4393_v34  ;;  %5810 = vmatprep.mubr.msk.f32.mxu1 %vm6185_vm0, %v6186_v5 }
0x1f73   : > { %6013 = vmatprep.subr.bf16.mxu1 %v6184_v3 }
0x2044   : > { %v4468_v38 = vpop.f32.mrb[46].mxu1 }
0x2045   : > { %v5807_v39 = vpop.f32.mrb[47].mxu1  ;;  %v4472_v40 = vsel %vm775_vm3, %v4468_v38, -inf }
0x2046   : > { %4473 = vmax.xlane.f32.xlu0 %v4472_v40  ;;  %v4760_v39 = vrot.slane %v7086_v54, %v2589_v63 }
0x20d3   : > { %v4474_v41 = vpop.xlane.xlu0 %4473 }
0x20d4   : > { %v4475_v43 = vsub.f32 %v4468_v38, %v4474_v41 }
0x20d6   : > { %v4476_v16 = vmul.f32 1.442695, %v4475_v43 }
0x20d8   : > { %6108 = vpow2.f32 %v4476_v16 }
0x20e2   : > { %v6109_v44 = vpop.eup %6108 }
0x20e3   : > { %v4478_v45 = vsel %vm775_vm3, %v6109_v44, 0.0 }
0x20e4   : > { %4479 = vadd.xlane.f32.xlu1 %v4478_v45 }
0x2171   : > { %v4480_v49 = vpop.xlane.xlu1 %4479 }
0x2172   : > { %6110 = vrcp.f32 %v4480_v49 }
0x217c   : > { %v6111_v50 = vpop.eup %6110 }
0x217d   : > { %v4482_v51 = vmul.f32 %v6111_v50, %v6109_v44 }
0x217f   : > { %5811 = vmatmul.mubr.msk.f32.vlgmr.msra.gmra.mrb[48].mxu1 %vm775_vm3, %v4482_v51 }
0x2180   : > { %5826 = vmatprep.mubr.msk.f32.mxu1 %vm6185_vm0, %v6186_v5  ;;  %6015 = vmatpush3.bf16.msra.mxu1 %v6014_v7 }
0x2181   : > { %6016 = vmatprep.subr.bf16.mxu1 %v6184_v3 }
0x2252   : > { %v4552_v52 = vpop.f32.mrb[48].mxu1 }
0x2253   : > { %v5812_v53 = vpop.f32.mrb[49].mxu1  ;;  %5816 = vmatmul.mubr.msk.f32.vlgmr.msra.gmra.mrb[50].mxu0 %vm775_vm3, %v4552_v52  ;;  %v4869_v52 = vld [vmem:[#allocation2] sm:$0x1] }
0x2254   : > { %5845 = vmatprep.mubr.msk.f32.mxu0 %vm6185_vm0, %v6186_v5  ;;  %6021 = vmatpush3.bf16.msra.mxu0 %v6020_v17  ;;  %v6187_v53 = vmov 0  }
0x2255   : > { %6022 = vmatprep.subr.bf16.mxu0 %v6184_v3  ;;  %6074 = vset.pattern.permute.xlu1 %v6187_v53 }
0x2256   : > { %6075 = vset.pattern.permute.xlu0 %v6187_v53 }
0x2258   : > { %6024 = vmatpush3.bf16.msra.mxu0 %v6023_v19 }
0x2259   : > { %6025 = vmatprep.subr.bf16.mxu0 %v6184_v3 }
0x225c   : > { %6027 = vmatpush3.bf16.msra.mxu0 %v6026_v22 }
0x225d   : > { %6028 = vmatprep.subr.bf16.mxu0 %v6184_v3  ;;  %v5190_v3 = vld [vmem:[%s7218_s9 + $0x70] sm:$0xff] }
0x225e   : > { %v6029_v36 = vpack.c.bf16 %v5191_v35, %v5190_v3 }
0x2260   : > { %6030 = vmatpush3.bf16.msra.mxu0 %v6029_v36 }
0x2326   : > { %v4627_v56 = vpop.f32.mrb[50].mxu0 }
0x2327   : > { %v4631_v57 = vadd.f32 %v4627_v56, %v4146_v26  ;;  %v5817_v58 = vpop.f32.mrb[51].mxu0  ;;  %v4654_v26 = vrot.slane %v7086_v54, %v2486_v47  ;;  %v5182_v47 = vld [vmem:[%s7217_s8 + $0x1] ss:$0 sm:$0xff] }
0x2329   : > { %v4636_v59 = vadd.f32 %v4635_v55, %v4631_v57  ;;  %v4851_v57 = vrot.slane %v7086_v54, %v2681_v27 }
0x232b   : > { %v4637_v60 = vadd.f32 %v4636_v59, %v6788_v42  ;;  %v5179_v42 = vld [vmem:[%s7216_s7 + $0x30] sm:$0xff] }
0x232c   : > { %v6017_v9 = vpack.c.bf16 %v5180_v8, %v5179_v42  ;;  %v4888_v42 = vand.u32 127, %v2464_v13 }
0x232d   : > { %v4638_v61 = vsel %vm535_vm2, %v4637_v60, 0.0 }
0x232e   : > { %4639 = vadd.xlane.f32.xlu0 %v4638_v61  ;;  %6018 = vmatpush3.bf16.msra.mxu1 %v6017_v9  ;;  %v4891_v8 = vsub.s32 %v4888_v42, %v6666_v14 }
0x23bb   : > { %v4640_v62 = vpop.xlane.xlu0 %4639 }
0x23bc   : > { %v4641_v0 = vmul.f32 0.03125, %v4640_v62  ;;  %v5193_v62 = vld [vmem:[%s7220_s11] ss:$0 sm:$0xff] }
0x23be   : > { %v4642_v5 = vsub.f32 %v4637_v60, %v4641_v0  ;;  %v4856_v60 = vrot.slane %v7086_v54, %v2686_v33 }
0x23c0   : > { %v4643_v1 = vmul.f32 %v4642_v5, %v4642_v5 }
0x23c2   : > { %v4644_v2 = vsel %vm535_vm2, %v4643_v1, 0.0 }
0x23c3   : > { %4645 = vadd.xlane.f32.xlu1 %v4644_v2 }
0x2450   : > { %v4646_v23 = vpop.xlane.xlu1 %4645 }
0x2451   : > { %v4647_v24 = vmul.f32 0.03125, %v4646_v23 }
0x2453   : > { %v4648_v25 = vadd.f32 1e-05, %v4647_v24 }
0x2455   : > { %6112 = vrsqrt.f32 %v4648_v25 }
0x245f   : > { %v6113_v28 = vpop.eup %6112 }
0x2460   : > { %v4650_v29 = vmul.f32 %v6113_v28, %v4642_v5 }
0x2462   : > { %v4655_v31 = vmul.f32 %v4654_v26, %v4650_v29 }
0x2464   : > { %v4660_v32 = vadd.f32 %v4659_v30, %v4655_v31 }
0x2466   : > { %5827 = vmatmul.mubr.msk.f32.vlgmr.msra.gmra.mrb[50].mxu1 %vm535_vm2, %v4660_v32 }
0x2539   : > { %v4743_v37 = vpop.f32.mrb[50].mxu1 }
0x253a   : > { %v4744_v48 = vadd.f32 %v5182_v47, %v4743_v37  ;;  %v5828_v34 = vpop.f32.mrb[51].mxu1 }
0x253c   : > { %v4747_v38 = vmax.f32 %v4744_v48, 0.0 }
0x253e   : > { %5846 = vmatmul.mubr.msk.f32.vlgmr.msra.gmra.mrb[52].mxu0 %vm2591_vm4, %v4747_v38 }
0x2611   : > { %v4830_v40 = vpop.f32.mrb[52].mxu0 }
0x2612   : > { %v4831_v41 = vadd.f32 %v4830_v40, %v4760_v39  ;;  %v5847_v43 = vpop.f32.mrb[53].mxu0 }
0x2614   : > { %v4834_v16 = vadd.f32 %v4831_v41, %v4660_v32 }
0x2616   : > { %v4835_v44 = vsel %vm535_vm2, %v4834_v16, 0.0 }
0x2617   : > { %4836 = vadd.xlane.f32.xlu0 %v4835_v44 }
0x26a4   : > { %v4837_v45 = vpop.xlane.xlu0 %4836 }
0x26a5   : > { %v4838_v46 = vmul.f32 0.03125, %v4837_v45 }
0x26a7   : > { %v4839_v49 = vsub.f32 %v4834_v16, %v4838_v46 }
0x26a9   : > { %v4840_v50 = vmul.f32 %v4839_v49, %v4839_v49 }
0x26ab   : > { %v4841_v51 = vsel %vm535_vm2, %v4840_v50, 0.0 }
0x26ac   : > { %4842 = vadd.xlane.f32.xlu1 %v4841_v51 }
0x26bd   : > { %4872 = vperm.xlu1 %6074, %v4869_v52  }
0x2739   : > { %v4843_v63 = vpop.xlane.xlu1 %4842 }
0x273a   : > { %v4844_v55 = vmul.f32 0.03125, %v4843_v63 }
0x273c   : > { %v4845_v56 = vadd.f32 1e-05, %v4844_v55 }
0x273d   : > { %v4873_v2 = vpop.permute.xlu1 %4872 }
0x273e   : > { %6114 = vrsqrt.f32 %v4845_v56  ;;  %v4878_v27 = vrot.slane %v4873_v2, %v6669_v15 }
0x2748   : > { %v6115_v58 = vpop.eup %6114 }
0x2749   : > { %v4847_v59 = vmul.f32 %v6115_v58, %v4839_v49 }
0x274b   : > { %v4852_v61 = vmul.f32 %v4851_v57, %v4847_v59 }
0x274d   : > { %v4857_v0 = vadd.f32 %v4856_v60, %v4852_v61 }
0x274f   : > { %v4865_v5 = vmul.f32 %v5193_v62, %v4857_v0 }
0x2751   : > { %v4866_v1 = vsel %vm535_vm2, %v4865_v5, 0.0 }
0x2752   : > { %4867 = vadd.xlane.f32.xlu0 %v4866_v1 }
0x27df   : > { %v4868_v4 = vpop.xlane.xlu0 %4867 }
0x27e0   : > { %v4879_v6 = vadd.f32 %v4878_v27, %v4868_v4 }
0x27e2   : > { %v5194_v7 = vmul.f32 -1.442695, %v4879_v6 }
0x27e4   : > { %6116 = vpow2.f32 %v5194_v7 }
0x27ee   : > { %v6117_v33 = vpop.eup %6116 }
0x27ef   : > { %v4883_v54 = vadd.f32 1.0, %v6117_v33 }
0x27f1   : > { %6118 = vrcp.f32 %v4883_v54 }
0x27fb   : > { %v6119_v9 = vpop.eup %6118 }
0x27fc   : > { %v4892_v10 = vrot.slane %v6119_v9, %v4891_v8 }
0x27fe   : > { %4895 = vst.msk [vmem:[%s432_s26] sm:$0x1] %vm4894_vm5, %v4892_v10 }
0x27ff   : > { %6133 = shalt.err (!%p6130_p3)
}
0x2800   : > { %s6134_s24 = scalar_lea.hbm %s7167_s0, 16  ;;  %s6138_s16 = scalar_lea.hbm %s7222_s13, 32 }
0x2801   : > { %p6135_p4 = scmp.ne.s32.totalorder %s7167_s0, %s6134_s24  ;;  %p6139_p9 = scmp.lt.u32.totalorder %s7167_s0, %s7222_s13 }
0x2802   : > { %p6140_p10 = scmp.lt.u32.totalorder %s6138_s16, %s6134_s24  ;;  %p6142_p12 = scmp.lt.u32.totalorder %s6134_s24, %s7167_s0 }
0x2803   : > { %p6136_p7 = pnand %p6135_p4, %p6300_p5 }
0x2804   : > { %p6141_p11 = por %p6140_p10, %p6139_p9 }
0x2805   : > { %p6137_p8 = pneg %p6136_p7 }
0x2806   : > { %p6143_p13 = por %p6142_p12, %p6141_p11 }
0x2808   : > { %p6144_p0 = pnand %p6143_p13, %p6137_p8 }
0x280a   : > { %6147 = shalt.err (!%p6144_p0)
}
0x280b   : > { %6031 = dma.vmem_to_hbm [thread:$0]  (%p6300_p5), %s7169_s14, 16, %s7167_s0, %s4897_s21  }
0x280c PF: > { %p6037_p1 = scmp.ge.s32.totalorder %s6182_s30, 2  ;;  %s4921_s1 = sand.u32 1, %s6170_s27  }
0x280d   : > { %s4922_s22 = scalar_lea.sflag [#allocation4], %s4921_s1 }
0x280e   : > { %p6034_p2 = pnand %p6037_p1, %p6304_p6 }
0x2810   : > { %6165 = dma.done.wait (!%p6034_p2), %s4922_s22, 16  }
0x2811   : > { %6167 = vsyncadd (!%p6034_p2), %s4922_s22, 4294967280  ;;  %p25_p3 = scmp.ge.s32.totalorder %s6287_s15, 4   ;;  %s7229_s27 = smov %s6174_s28 }
0x2812   : > { %s7230_s28 = smov %s6178_s29  ;;  %s7231_s29 = smov %s6298_s18 }
0x2813   : > { %s7232_s30 = smov %s6287_s15  ;;  %27 = sbr.rel (!%p25_p3) target bundleno = 6 (0x6), region = 164 }
0x281a   :  { %4926 = vsyncpa [#allocation4], 1 }
0x281b   :  { %4928 = vsyncpa [#allocation4 + $0x1], 1 }

</bundles_post_ra>
